<compile_context>
chip_gen: v7x
topology: tpu7x:2x2x1
jax: 0.10.0
libtpu: 0.0.40
codegen_flags: <defaults>
</compile_context>

<pallas_src>
import jax
import jax.numpy as jnp
from jax import lax
from jax.experimental import pallas as pl
from jax.experimental.pallas import tpu as pltpu


_PARAM_NAMES = ("w1", "b1", "w2s", "b2s", "w2t", "b2t", "wc", "bc")
_NP = len(_PARAM_NAMES)


# ----------------------------------------------------------------------------
# Conv-tap validity masks (computed once in plain JAX, passed as a kernel input)
# ----------------------------------------------------------------------------
def _conv_masks(H, W):
    """(9, 1, H*W) f32 masks: mask[k, 0, h*W+w] == 1 iff tap k of a 3x3 SAME
    conv reads a true in-image neighbour at output position (h, w)."""
    hh = jnp.arange(H)[:, None]
    ww = jnp.arange(W)[None, :]
    masks = []
    for kh in range(3):
        for kw in range(3):
            dh, dw = kh - 1, kw - 1
            valid = ((hh + dh >= 0) & (hh + dh < H)
                     & (ww + dw >= 0) & (ww + dw < W))
            masks.append(valid.reshape(1, H * W).astype(jnp.float32))
    return jnp.stack(masks, axis=0)


# ----------------------------------------------------------------------------
# Fused MABlock kernel factory
# ----------------------------------------------------------------------------
def _make_mablock_kernel(in_split1, in_split2, H, W, pad):
    HW = H * W

    def _affine(xi, xr, w1, b1, w2s, b2s, w2t, b2t):
        # 'fc' module (two 1x1 convs + ReLU) and the mutual-affine transform.
        t = jnp.dot(w1[...], xr, preferred_element_type=jnp.float32) + b1[...]
        t = jnp.maximum(t, 0.0)
        scale = jnp.dot(w2s[...], t, preferred_element_type=jnp.float32) + b2s[...]
        trans = jnp.dot(w2t[...], t, preferred_element_type=jnp.float32) + b2t[...]
        sig = pl.reciprocal(1.0 + jnp.exp(-scale), approx=True)   # EUP slot
        return xi * sig + trans

    def _conv3x3(y, wc, bc, masks_ref, ypad_ref):
        # 3x3 SAME conv fused in VMEM: stage y once into a lane-aligned padded
        # buffer, then accumulate 9 shifted (C_out, C_in) @ (C_in, HW) dots.
        ci = y.shape[0]
        co = wc.shape[1]
        ypad_ref[0:ci, pad:pad + HW] = y            # aligned staging store
        ypad = ypad_ref[0:ci, :]                    # single aligned reload
        acc = jnp.zeros((co, HW), jnp.float32) + bc[...]
        for k in range(9):
            dh, dw = k // 3 - 1, k % 3 - 1
            s = dh * W + dw
            ys = ypad[:, pad + s:pad + s + HW] * masks_ref[k]
            acc = acc + jnp.dot(wc[k], ys, preferred_element_type=jnp.float32)
        return acc

    def _maconv(x_val, branch_refs, in_split, masks_ref, ypad_ref):
        C = x_val.shape[0]
        offs = [0]
        for s in in_split:
            offs.append(offs[-1] + s)
        outs = []
        for i, p in enumerate(branch_refs):
            w1, b1, w2s, b2s, w2t, b2t, wc, bc = p
            xi = x_val[offs[i]:offs[i + 1], :]
            if offs[i] == 0:                        # split=2 fast paths: no concat
                xr = x_val[offs[i + 1]:, :]
            elif offs[i + 1] == C:
                xr = x_val[:offs[i], :]
            else:
                xr = jnp.concatenate(
                    [x_val[:offs[i], :], x_val[offs[i + 1]:, :]], axis=0)
            y = _affine(xi, xr, w1, b1, w2s, b2s, w2t, b2t)
            outs.append(_conv3x3(y, wc, bc, masks_ref, ypad_ref))
        return outs

    nb1 = len(in_split1)
    nb2 = len(in_split2)

    def kernel(masks_ref, x_ref, *refs):
        out_ref, ypad_ref = refs[-2], refs[-1]
        w_refs = refs[:-2]
        p1 = [w_refs[_NP * i:_NP * (i + 1)] for i in range(nb1)]
        p2 = [w_refs[_NP * (nb1 + i):_NP * (nb1 + i + 1)] for i in range(nb2)]

        # Clear the padded conv buffer (its halo columns must be exactly 0).
        ypad_ref[...] = jnp.zeros(ypad_ref.shape, jnp.float32)

        x = x_ref[0]                                # (C, H*W), lane-dense

        # MAConv1 + ReLU: all intermediates stay in VMEM (no HBM round trip).
        z1 = _maconv(x, p1, in_split1, masks_ref, ypad_ref)
        h1 = jnp.concatenate([jnp.maximum(z, 0.0) for z in z1], axis=0)

        # MAConv2 + fused residual add; one lane-dense full-C output store.
        z2 = _maconv(h1, p2, in_split2, masks_ref, ypad_ref)
        out_ref[0] = jnp.concatenate(z2, axis=0) + x

    return kernel


# ----------------------------------------------------------------------------
# Public wrapper: NCHW in / NCHW out, a single pallas_call over the batch.
# ----------------------------------------------------------------------------
def mablock_pallas(x_nchw, params1, params2):
    B, C, H, W = x_nchw.shape
    HW = H * W
    C_out = sum(params2["out_split"])
    assert C_out == C, "residual add requires out_channels == in_channels"
    assert sum(params1["out_split"]) == sum(params2["in_split"])

    # Lane-aligned halo for the in-VMEM padded conv staging buffer (>= W + 1).
    pad = ((W + 1 + 127) // 128) * 128
    max_ci = max(list(params1["in_split"]) + list(params2["in_split"]))

    x_flat = x_nchw.reshape(B, C, HW)               # NCHW is already (C, HW)-major
    masks = _conv_masks(H, W)

    weight_arrays, weight_specs = [], []
    for params in (params1, params2):
        for br in params["branches"]:
            for name in _PARAM_NAMES:
                a = br[name]
                weight_arrays.append(a)
                weight_specs.append(
                    pl.BlockSpec(a.shape, lambda b, nd=a.ndim: (0,) * nd))

    kernel = _make_mablock_kernel(
        tuple(params1["in_split"]), tuple(params2["in_split"]), H, W, pad)

    out = pl.pallas_call(
        kernel,
        out_shape=jax.ShapeDtypeStruct((B, C_out, HW), jnp.float32),
        grid_spec=pltpu.PrefetchScalarGridSpec(
            num_scalar_prefetch=0,
            grid=(B,),              # >= 2 parallel steps -> both v7x TensorCores
            in_specs=[
                pl.BlockSpec(masks.shape, lambda b: (0, 0, 0)),
                pl.BlockSpec((1, C, HW), lambda b: (b, 0, 0)),
            ] + weight_specs,
            out_specs=pl.BlockSpec((1, C_out, HW), lambda b: (b, 0, 0)),
            scratch_shapes=[pltpu.VMEM((max_ci, HW + 2 * pad), jnp.float32)],
        ),
        compiler_params=pltpu.CompilerParams(
            dimension_semantics=("parallel",)),
    )(masks, x_flat, *weight_arrays)
    return out.reshape(B, C_out, H, W)


# ----------------------------------------------------------------------------
# Deterministic parameter construction (mirrors MAConv.__init__ shapes)
# ----------------------------------------------------------------------------
def make_maconv_params(key, in_channels, out_channels, split=2, reduction=2):
    splits = [1.0 / split] * split
    in_split, in_split_rest, out_split = [], [], []
    for i in range(split):
        isp = (round(in_channels * splits[i]) if i < split - 1
               else in_channels - sum(in_split))
        irest = in_channels - isp
        # NOTE: replicates the original PyTorch code's use of `in_channels` here.
        osp = (round(out_channels * splits[i]) if i < split - 1
               else in_channels - sum(out_split))
        in_split.append(isp)
        in_split_rest.append(irest)
        out_split.append(osp)
    branches = []
    for i in range(split):
        key, *ks = jax.random.split(key, 9)
        hid = in_split_rest[i] // reduction
        ci, co = in_split[i], out_split[i]
        branches.append(dict(
            # channel-major ("transposed") layouts: dots are W @ X with X=(C, HW)
            w1=0.1 * jax.random.normal(ks[0], (hid, in_split_rest[i]), jnp.float32),
            b1=0.1 * jax.random.normal(ks[1], (hid, 1), jnp.float32),
            w2s=0.1 * jax.random.normal(ks[2], (ci, hid), jnp.float32),
            b2s=0.1 * jax.random.normal(ks[3], (ci, 1), jnp.float32),
            w2t=0.1 * jax.random.normal(ks[4], (ci, hid), jnp.float32),
            b2t=0.1 * jax.random.normal(ks[5], (ci, 1), jnp.float32),
            # 3x3 conv weights laid out per tap: (9, C_out, C_in), k = kh*3+kw
            wc=0.1 * jax.random.normal(ks[6], (9, co, ci), jnp.float32),
            bc=0.1 * jax.random.normal(ks[7], (co, 1), jnp.float32),
        ))
    return dict(branches=branches, in_split=in_split, out_split=out_split), key


# ----------------------------------------------------------------------------
# Pure-JAX reference (independent conv via lax.conv_general_dilated)
# ----------------------------------------------------------------------------
def ref_maconv(x_nhwc, params):
    in_split = params["in_split"]
    offs = [0]
    for s in in_split:
        offs.append(offs[-1] + s)
    outs = []
    for i, p in enumerate(params["branches"]):
        xi = x_nhwc[..., offs[i]:offs[i + 1]]
        xr = jnp.concatenate(
            [x_nhwc[..., :offs[i]], x_nhwc[..., offs[i + 1]:]], axis=-1)
        t = jnp.maximum(jnp.einsum("bhwc,oc->bhwo", xr, p["w1"]) + p["b1"][:, 0], 0.0)
        scale = jnp.einsum("bhwc,oc->bhwo", t, p["w2s"]) + p["b2s"][:, 0]
        trans = jnp.einsum("bhwc,oc->bhwo", t, p["w2t"]) + p["b2t"][:, 0]
        y = xi * jax.nn.sigmoid(scale) + trans
        w_hwio = jnp.transpose(
            p["wc"].reshape((3, 3) + p["wc"].shape[1:]), (0, 1, 3, 2))
        o = lax.conv_general_dilated(
            y, w_hwio, (1, 1), "SAME",
            dimension_numbers=("NHWC", "HWIO", "NHWC")) + p["bc"][:, 0]
        outs.append(o)
    return jnp.concatenate(outs, axis=-1)


def ref_mablock(x_nchw, params1, params2):
    x = jnp.transpose(x_nchw, (0, 2, 3, 1))
    h = ref_maconv(x, params1)
    h = jnp.maximum(h, 0.0)
    h = ref_maconv(h, params2)
    return jnp.transpose(x + h, (0, 3, 1, 2))


# ----------------------------------------------------------------------------
if __name__ == "__main__":
    B, C, H, W = 2, 8, 16, 16          # small shapes; in_channels == out_channels
    key = jax.random.PRNGKey(0)
    key, kx = jax.random.split(key)
    x = jax.random.normal(kx, (B, C, H, W), jnp.float32)

    params1, key = make_maconv_params(key, C, C, split=2, reduction=2)
    params2, key = make_maconv_params(key, C, C, split=2, reduction=2)

    out = jax.block_until_ready(mablock_pallas(x, params1, params2))
    ref = ref_mablock(x, params1, params2)

    assert out.shape == (B, C, H, W)
    err = float(jnp.max(jnp.abs(out - ref)))
    # Tolerance is loosened solely because the sigmoid uses the EUP's
    # approximate reciprocal (pl.reciprocal(..., approx=True)); any real logic
    # bug (wrong tap/mask/weight layout) produces errors of order 0.1 - 1.
    assert jnp.allclose(out, ref, rtol=1e-2, atol=1e-2), f"max abs err {err}"

    print("KERNEL_OK")
</pallas_src>

<mosaic_0001>
module attributes {stable_mosaic.version = 11 : i64} {
  func.func @kernel(%arg0: i32, %arg1: memref<9x1x256xf32, #tpu.memory_space<vmem>>, %arg2: memref<1x8x256xf32, #tpu.memory_space<vmem>>, %arg3: memref<2x4xf32, #tpu.memory_space<vmem>>, %arg4: memref<2x1xf32, #tpu.memory_space<vmem>>, %arg5: memref<4x2xf32, #tpu.memory_space<vmem>>, %arg6: memref<4x1xf32, #tpu.memory_space<vmem>>, %arg7: memref<4x2xf32, #tpu.memory_space<vmem>>, %arg8: memref<4x1xf32, #tpu.memory_space<vmem>>, %arg9: memref<9x4x4xf32, #tpu.memory_space<vmem>>, %arg10: memref<4x1xf32, #tpu.memory_space<vmem>>, %arg11: memref<2x4xf32, #tpu.memory_space<vmem>>, %arg12: memref<2x1xf32, #tpu.memory_space<vmem>>, %arg13: memref<4x2xf32, #tpu.memory_space<vmem>>, %arg14: memref<4x1xf32, #tpu.memory_space<vmem>>, %arg15: memref<4x2xf32, #tpu.memory_space<vmem>>, %arg16: memref<4x1xf32, #tpu.memory_space<vmem>>, %arg17: memref<9x4x4xf32, #tpu.memory_space<vmem>>, %arg18: memref<4x1xf32, #tpu.memory_space<vmem>>, %arg19: memref<2x4xf32, #tpu.memory_space<vmem>>, %arg20: memref<2x1xf32, #tpu.memory_space<vmem>>, %arg21: memref<4x2xf32, #tpu.memory_space<vmem>>, %arg22: memref<4x1xf32, #tpu.memory_space<vmem>>, %arg23: memref<4x2xf32, #tpu.memory_space<vmem>>, %arg24: memref<4x1xf32, #tpu.memory_space<vmem>>, %arg25: memref<9x4x4xf32, #tpu.memory_space<vmem>>, %arg26: memref<4x1xf32, #tpu.memory_space<vmem>>, %arg27: memref<2x4xf32, #tpu.memory_space<vmem>>, %arg28: memref<2x1xf32, #tpu.memory_space<vmem>>, %arg29: memref<4x2xf32, #tpu.memory_space<vmem>>, %arg30: memref<4x1xf32, #tpu.memory_space<vmem>>, %arg31: memref<4x2xf32, #tpu.memory_space<vmem>>, %arg32: memref<4x1xf32, #tpu.memory_space<vmem>>, %arg33: memref<9x4x4xf32, #tpu.memory_space<vmem>>, %arg34: memref<4x1xf32, #tpu.memory_space<vmem>>, %arg35: memref<1x8x256xf32, #tpu.memory_space<vmem>>, %arg36: memref<4x512xf32, #tpu.memory_space<vmem>>) attributes {dimension_semantics = [#tpu.dimension_semantics<parallel>], iteration_bounds = array<i64: 2>, scalar_prefetch = 0 : i64, scratch_operands = 1 : i64, tpu.core_type = #tpu.core_type<tc>, window_params = [{pipeline_mode = #tpu.pipeline_mode<synchronous>, transform_indices = @transform_0, window_bounds = array<i64: 9, 1, 256>}, {transform_indices = @transform_1, window_bounds = array<i64: 1, 8, 256>}, {pipeline_mode = #tpu.pipeline_mode<synchronous>, transform_indices = @transform_2, window_bounds = array<i64: 2, 4>}, {pipeline_mode = #tpu.pipeline_mode<synchronous>, transform_indices = @transform_3, window_bounds = array<i64: 2, 1>}, {pipeline_mode = #tpu.pipeline_mode<synchronous>, transform_indices = @transform_4, window_bounds = array<i64: 4, 2>}, {pipeline_mode = #tpu.pipeline_mode<synchronous>, transform_indices = @transform_5, window_bounds = array<i64: 4, 1>}, {pipeline_mode = #tpu.pipeline_mode<synchronous>, transform_indices = @transform_6, window_bounds = array<i64: 4, 2>}, {pipeline_mode = #tpu.pipeline_mode<synchronous>, transform_indices = @transform_7, window_bounds = array<i64: 4, 1>}, {pipeline_mode = #tpu.pipeline_mode<synchronous>, transform_indices = @transform_8, window_bounds = array<i64: 9, 4, 4>}, {pipeline_mode = #tpu.pipeline_mode<synchronous>, transform_indices = @transform_9, window_bounds = array<i64: 4, 1>}, {pipeline_mode = #tpu.pipeline_mode<synchronous>, transform_indices = @transform_10, window_bounds = array<i64: 2, 4>}, {pipeline_mode = #tpu.pipeline_mode<synchronous>, transform_indices = @transform_11, window_bounds = array<i64: 2, 1>}, {pipeline_mode = #tpu.pipeline_mode<synchronous>, transform_indices = @transform_12, window_bounds = array<i64: 4, 2>}, {pipeline_mode = #tpu.pipeline_mode<synchronous>, transform_indices = @transform_13, window_bounds = array<i64: 4, 1>}, {pipeline_mode = #tpu.pipeline_mode<synchronous>, transform_indices = @transform_14, window_bounds = array<i64: 4, 2>}, {pipeline_mode = #tpu.pipeline_mode<synchronous>, transform_indices = @transform_15, window_bounds = array<i64: 4, 1>}, {pipeline_mode = #tpu.pipeline_mode<synchronous>, transform_indices = @transform_16, window_bounds = array<i64: 9, 4, 4>}, {pipeline_mode = #tpu.pipeline_mode<synchronous>, transform_indices = @transform_17, window_bounds = array<i64: 4, 1>}, {pipeline_mode = #tpu.pipeline_mode<synchronous>, transform_indices = @transform_18, window_bounds = array<i64: 2, 4>}, {pipeline_mode = #tpu.pipeline_mode<synchronous>, transform_indices = @transform_19, window_bounds = array<i64: 2, 1>}, {pipeline_mode = #tpu.pipeline_mode<synchronous>, transform_indices = @transform_20, window_bounds = array<i64: 4, 2>}, {pipeline_mode = #tpu.pipeline_mode<synchronous>, transform_indices = @transform_21, window_bounds = array<i64: 4, 1>}, {pipeline_mode = #tpu.pipeline_mode<synchronous>, transform_indices = @transform_22, window_bounds = array<i64: 4, 2>}, {pipeline_mode = #tpu.pipeline_mode<synchronous>, transform_indices = @transform_23, window_bounds = array<i64: 4, 1>}, {pipeline_mode = #tpu.pipeline_mode<synchronous>, transform_indices = @transform_24, window_bounds = array<i64: 9, 4, 4>}, {pipeline_mode = #tpu.pipeline_mode<synchronous>, transform_indices = @transform_25, window_bounds = array<i64: 4, 1>}, {pipeline_mode = #tpu.pipeline_mode<synchronous>, transform_indices = @transform_26, window_bounds = array<i64: 2, 4>}, {pipeline_mode = #tpu.pipeline_mode<synchronous>, transform_indices = @transform_27, window_bounds = array<i64: 2, 1>}, {pipeline_mode = #tpu.pipeline_mode<synchronous>, transform_indices = @transform_28, window_bounds = array<i64: 4, 2>}, {pipeline_mode = #tpu.pipeline_mode<synchronous>, transform_indices = @transform_29, window_bounds = array<i64: 4, 1>}, {pipeline_mode = #tpu.pipeline_mode<synchronous>, transform_indices = @transform_30, window_bounds = array<i64: 4, 2>}, {pipeline_mode = #tpu.pipeline_mode<synchronous>, transform_indices = @transform_31, window_bounds = array<i64: 4, 1>}, {pipeline_mode = #tpu.pipeline_mode<synchronous>, transform_indices = @transform_32, window_bounds = array<i64: 9, 4, 4>}, {pipeline_mode = #tpu.pipeline_mode<synchronous>, transform_indices = @transform_33, window_bounds = array<i64: 4, 1>}, {transform_indices = @transform_34, window_bounds = array<i64: 1, 8, 256>}]} {
    %cst = arith.constant 0.000000e+00 : f32
    %0 = vector.broadcast %cst : f32 to vector<4x512xf32>
    %c0 = arith.constant 0 : index
    %c0_0 = arith.constant 0 : index
    %1 = vector.load %arg36[%c0, %c0_0] : memref<4x512xf32, #tpu.memory_space<vmem>>, vector<4x512xf32>
    tpu.vector_store %arg36[%c0, %c0_0], %0 {strides = array<i32>} : memref<4x512xf32, #tpu.memory_space<vmem>>, vector<4x512xf32>,
    %c0_1 = arith.constant 0 : index
    %c0_2 = arith.constant 0 : index
    %c0_3 = arith.constant 0 : index
    %2 = vector.load %arg2[%c0_1, %c0_2, %c0_3] : memref<1x8x256xf32, #tpu.memory_space<vmem>>, vector<1x8x256xf32>
    %3 = vector.shape_cast %2 : vector<1x8x256xf32> to vector<8x256xf32>
    %4 = vector.extract_strided_slice %3 {offsets = [0, 0], sizes = [4, 256], strides = [1, 1]} : vector<8x256xf32> to vector<4x256xf32>
    %5 = vector.extract_strided_slice %3 {offsets = [4, 0], sizes = [4, 256], strides = [1, 1]} : vector<8x256xf32> to vector<4x256xf32>
    %c0_4 = arith.constant 0 : index
    %c0_5 = arith.constant 0 : index
    %6 = vector.load %arg3[%c0_4, %c0_5] : memref<2x4xf32, #tpu.memory_space<vmem>>, vector<2x4xf32>
    %cst_6 = arith.constant dense<0.000000e+00> : vector<2x256xf32>
    %7 = tpu.matmul %6, %5, %cst_6 {dimension_numbers = #tpu.dot_dimension_numbers<[1], [0], [0], [1], [0, 0, 1, 1], [], []>} : vector<2x4xf32>, vector<4x256xf32>, vector<2x256xf32> -> vector<2x256xf32>
    %c0_7 = arith.constant 0 : index
    %c0_8 = arith.constant 0 : index
    %8 = vector.load %arg4[%c0_7, %c0_8] : memref<2x1xf32, #tpu.memory_space<vmem>>, vector<2x1xf32>
    %9 = vector.broadcast %8 : vector<2x1xf32> to vector<2x256xf32>
    %10 = arith.addf %7, %9 : vector<2x256xf32>
    %cst_9 = arith.constant 0.000000e+00 : f32
    %11 = vector.broadcast %cst_9 : f32 to vector<2x256xf32>
    %12 = arith.maximumf %10, %11 : vector<2x256xf32>
    %c0_10 = arith.constant 0 : index
    %c0_11 = arith.constant 0 : index
    %13 = vector.load %arg5[%c0_10, %c0_11] : memref<4x2xf32, #tpu.memory_space<vmem>>, vector<4x2xf32>
    %cst_12 = arith.constant dense<0.000000e+00> : vector<4x256xf32>
    %14 = tpu.matmul %13, %12, %cst_12 {dimension_numbers = #tpu.dot_dimension_numbers<[1], [0], [0], [1], [0, 0, 1, 1], [], []>} : vector<4x2xf32>, vector<2x256xf32>, vector<4x256xf32> -> vector<4x256xf32>
    %c0_13 = arith.constant 0 : index
    %c0_14 = arith.constant 0 : index
    %15 = vector.load %arg6[%c0_13, %c0_14] : memref<4x1xf32, #tpu.memory_space<vmem>>, vector<4x1xf32>
    %16 = vector.broadcast %15 : vector<4x1xf32> to vector<4x256xf32>
    %17 = arith.addf %14, %16 : vector<4x256xf32>
    %c0_15 = arith.constant 0 : index
    %c0_16 = arith.constant 0 : index
    %18 = vector.load %arg7[%c0_15, %c0_16] : memref<4x2xf32, #tpu.memory_space<vmem>>, vector<4x2xf32>
    %cst_17 = arith.constant dense<0.000000e+00> : vector<4x256xf32>
    %19 = tpu.matmul %18, %12, %cst_17 {dimension_numbers = #tpu.dot_dimension_numbers<[1], [0], [0], [1], [0, 0, 1, 1], [], []>} : vector<4x2xf32>, vector<2x256xf32>, vector<4x256xf32> -> vector<4x256xf32>
    %c0_18 = arith.constant 0 : index
    %c0_19 = arith.constant 0 : index
    %20 = vector.load %arg8[%c0_18, %c0_19] : memref<4x1xf32, #tpu.memory_space<vmem>>, vector<4x1xf32>
    %21 = vector.broadcast %20 : vector<4x1xf32> to vector<4x256xf32>
    %22 = arith.addf %19, %21 : vector<4x256xf32>
    %cst_20 = arith.constant 0.000000e+00 : f32
    %23 = vector.broadcast %cst_20 : f32 to vector<4x256xf32>
    %24 = arith.subf %23, %17 : vector<4x256xf32>
    %25 = math.exp %24 : vector<4x256xf32>
    %cst_21 = arith.constant 1.000000e+00 : f32
    %26 = vector.broadcast %cst_21 : f32 to vector<4x256xf32>
    %27 = arith.addf %26, %25 : vector<4x256xf32>
    %28 = tpu.reciprocal %27 {approx = true} : vector<4x256xf32> -> vector<4x256xf32>
    %29 = arith.mulf %4, %28 : vector<4x256xf32>
    %30 = arith.addf %29, %22 : vector<4x256xf32>
    %c0_22 = arith.constant 0 : index
    %c128 = arith.constant 128 : index
    %31 = vector.load %arg36[%c0_22, %c128] : memref<4x512xf32, #tpu.memory_space<vmem>>, vector<4x256xf32>
    tpu.vector_store %arg36[%c0_22, %c128], %30 {strides = array<i32>} : memref<4x512xf32, #tpu.memory_space<vmem>>, vector<4x256xf32>,
    %c0_23 = arith.constant 0 : index
    %c0_24 = arith.constant 0 : index
    %32 = vector.load %arg36[%c0_23, %c0_24] : memref<4x512xf32, #tpu.memory_space<vmem>>, vector<4x512xf32>
    %cst_25 = arith.constant 0.000000e+00 : f32
    %33 = vector.broadcast %cst_25 : f32 to vector<4x256xf32>
    %c0_26 = arith.constant 0 : index
    %c0_27 = arith.constant 0 : index
    %34 = vector.load %arg10[%c0_26, %c0_27] : memref<4x1xf32, #tpu.memory_space<vmem>>, vector<4x1xf32>
    %35 = vector.broadcast %34 : vector<4x1xf32> to vector<4x256xf32>
    %36 = arith.addf %33, %35 : vector<4x256xf32>
    %37 = vector.extract_strided_slice %32 {offsets = [0, 111], sizes = [4, 256], strides = [1, 1]} : vector<4x512xf32> to vector<4x256xf32>
    %c0_28 = arith.constant 0 : index
    %c0_29 = arith.constant 0 : index
    %c0_30 = arith.constant 0 : index
    %38 = vector.load %arg1[%c0_28, %c0_29, %c0_30] : memref<9x1x256xf32, #tpu.memory_space<vmem>>, vector<1x1x256xf32>
    %39 = vector.shape_cast %38 : vector<1x1x256xf32> to vector<1x256xf32>
    %40 = vector.broadcast %39 : vector<1x256xf32> to vector<4x256xf32>
    %41 = arith.mulf %37, %40 : vector<4x256xf32>
    %c0_31 = arith.constant 0 : index
    %c0_32 = arith.constant 0 : index
    %c0_33 = arith.constant 0 : index
    %42 = vector.load %arg9[%c0_31, %c0_32, %c0_33] : memref<9x4x4xf32, #tpu.memory_space<vmem>>, vector<1x4x4xf32>
    %43 = vector.shape_cast %42 : vector<1x4x4xf32> to vector<4x4xf32>
    %cst_34 = arith.constant dense<0.000000e+00> : vector<4x256xf32>
    %44 = tpu.matmul %43, %41, %cst_34 {dimension_numbers = #tpu.dot_dimension_numbers<[1], [0], [0], [1], [0, 0, 1, 1], [], []>} : vector<4x4xf32>, vector<4x256xf32>, vector<4x256xf32> -> vector<4x256xf32>
    %45 = arith.addf %36, %44 : vector<4x256xf32>
    %46 = vector.extract_strided_slice %32 {offsets = [0, 112], sizes = [4, 256], strides = [1, 1]} : vector<4x512xf32> to vector<4x256xf32>
    %c1 = arith.constant 1 : index
    %c0_35 = arith.constant 0 : index
    %c0_36 = arith.constant 0 : index
    %47 = vector.load %arg1[%c1, %c0_35, %c0_36] : memref<9x1x256xf32, #tpu.memory_space<vmem>>, vector<1x1x256xf32>
    %48 = vector.shape_cast %47 : vector<1x1x256xf32> to vector<1x256xf32>
    %49 = vector.broadcast %48 : vector<1x256xf32> to vector<4x256xf32>
    %50 = arith.mulf %46, %49 : vector<4x256xf32>
    %c1_37 = arith.constant 1 : index
    %c0_38 = arith.constant 0 : index
    %c0_39 = arith.constant 0 : index
    %51 = vector.load %arg9[%c1_37, %c0_38, %c0_39] : memref<9x4x4xf32, #tpu.memory_space<vmem>>, vector<1x4x4xf32>
    %52 = vector.shape_cast %51 : vector<1x4x4xf32> to vector<4x4xf32>
    %cst_40 = arith.constant dense<0.000000e+00> : vector<4x256xf32>
    %53 = tpu.matmul %52, %50, %cst_40 {dimension_numbers = #tpu.dot_dimension_numbers<[1], [0], [0], [1], [0, 0, 1, 1], [], []>} : vector<4x4xf32>, vector<4x256xf32>, vector<4x256xf32> -> vector<4x256xf32>
    %54 = arith.addf %45, %53 : vector<4x256xf32>
    %55 = vector.extract_strided_slice %32 {offsets = [0, 113], sizes = [4, 256], strides = [1, 1]} : vector<4x512xf32> to vector<4x256xf32>
    %c2 = arith.constant 2 : index
    %c0_41 = arith.constant 0 : index
    %c0_42 = arith.constant 0 : index
    %56 = vector.load %arg1[%c2, %c0_41, %c0_42] : memref<9x1x256xf32, #tpu.memory_space<vmem>>, vector<1x1x256xf32>
    %57 = vector.shape_cast %56 : vector<1x1x256xf32> to vector<1x256xf32>
    %58 = vector.broadcast %57 : vector<1x256xf32> to vector<4x256xf32>
    %59 = arith.mulf %55, %58 : vector<4x256xf32>
    %c2_43 = arith.constant 2 : index
    %c0_44 = arith.constant 0 : index
    %c0_45 = arith.constant 0 : index
    %60 = vector.load %arg9[%c2_43, %c0_44, %c0_45] : memref<9x4x4xf32, #tpu.memory_space<vmem>>, vector<1x4x4xf32>
    %61 = vector.shape_cast %60 : vector<1x4x4xf32> to vector<4x4xf32>
    %cst_46 = arith.constant dense<0.000000e+00> : vector<4x256xf32>
    %62 = tpu.matmul %61, %59, %cst_46 {dimension_numbers = #tpu.dot_dimension_numbers<[1], [0], [0], [1], [0, 0, 1, 1], [], []>} : vector<4x4xf32>, vector<4x256xf32>, vector<4x256xf32> -> vector<4x256xf32>
    %63 = arith.addf %54, %62 : vector<4x256xf32>
    %64 = vector.extract_strided_slice %32 {offsets = [0, 127], sizes = [4, 256], strides = [1, 1]} : vector<4x512xf32> to vector<4x256xf32>
    %c3 = arith.constant 3 : index
    %c0_47 = arith.constant 0 : index
    %c0_48 = arith.constant 0 : index
    %65 = vector.load %arg1[%c3, %c0_47, %c0_48] : memref<9x1x256xf32, #tpu.memory_space<vmem>>, vector<1x1x256xf32>
    %66 = vector.shape_cast %65 : vector<1x1x256xf32> to vector<1x256xf32>
    %67 = vector.broadcast %66 : vector<1x256xf32> to vector<4x256xf32>
    %68 = arith.mulf %64, %67 : vector<4x256xf32>
    %c3_49 = arith.constant 3 : index
    %c0_50 = arith.constant 0 : index
    %c0_51 = arith.constant 0 : index
    %69 = vector.load %arg9[%c3_49, %c0_50, %c0_51] : memref<9x4x4xf32, #tpu.memory_space<vmem>>, vector<1x4x4xf32>
    %70 = vector.shape_cast %69 : vector<1x4x4xf32> to vector<4x4xf32>
    %cst_52 = arith.constant dense<0.000000e+00> : vector<4x256xf32>
    %71 = tpu.matmul %70, %68, %cst_52 {dimension_numbers = #tpu.dot_dimension_numbers<[1], [0], [0], [1], [0, 0, 1, 1], [], []>} : vector<4x4xf32>, vector<4x256xf32>, vector<4x256xf32> -> vector<4x256xf32>
    %72 = arith.addf %63, %71 : vector<4x256xf32>
    %73 = vector.extract_strided_slice %32 {offsets = [0, 128], sizes = [4, 256], strides = [1, 1]} : vector<4x512xf32> to vector<4x256xf32>
    %c4 = arith.constant 4 : index
    %c0_53 = arith.constant 0 : index
    %c0_54 = arith.constant 0 : index
    %74 = vector.load %arg1[%c4, %c0_53, %c0_54] : memref<9x1x256xf32, #tpu.memory_space<vmem>>, vector<1x1x256xf32>
    %75 = vector.shape_cast %74 : vector<1x1x256xf32> to vector<1x256xf32>
    %76 = vector.broadcast %75 : vector<1x256xf32> to vector<4x256xf32>
    %77 = arith.mulf %73, %76 : vector<4x256xf32>
    %c4_55 = arith.constant 4 : index
    %c0_56 = arith.constant 0 : index
    %c0_57 = arith.constant 0 : index
    %78 = vector.load %arg9[%c4_55, %c0_56, %c0_57] : memref<9x4x4xf32, #tpu.memory_space<vmem>>, vector<1x4x4xf32>
    %79 = vector.shape_cast %78 : vector<1x4x4xf32> to vector<4x4xf32>
    %cst_58 = arith.constant dense<0.000000e+00> : vector<4x256xf32>
    %80 = tpu.matmul %79, %77, %cst_58 {dimension_numbers = #tpu.dot_dimension_numbers<[1], [0], [0], [1], [0, 0, 1, 1], [], []>} : vector<4x4xf32>, vector<4x256xf32>, vector<4x256xf32> -> vector<4x256xf32>
    %81 = arith.addf %72, %80 : vector<4x256xf32>
    %82 = vector.extract_strided_slice %32 {offsets = [0, 129], sizes = [4, 256], strides = [1, 1]} : vector<4x512xf32> to vector<4x256xf32>
    %c5 = arith.constant 5 : index
    %c0_59 = arith.constant 0 : index
    %c0_60 = arith.constant 0 : index
    %83 = vector.load %arg1[%c5, %c0_59, %c0_60] : memref<9x1x256xf32, #tpu.memory_space<vmem>>, vector<1x1x256xf32>
    %84 = vector.shape_cast %83 : vector<1x1x256xf32> to vector<1x256xf32>
    %85 = vector.broadcast %84 : vector<1x256xf32> to vector<4x256xf32>
    %86 = arith.mulf %82, %85 : vector<4x256xf32>
    %c5_61 = arith.constant 5 : index
    %c0_62 = arith.constant 0 : index
    %c0_63 = arith.constant 0 : index
    %87 = vector.load %arg9[%c5_61, %c0_62, %c0_63] : memref<9x4x4xf32, #tpu.memory_space<vmem>>, vector<1x4x4xf32>
    %88 = vector.shape_cast %87 : vector<1x4x4xf32> to vector<4x4xf32>
    %cst_64 = arith.constant dense<0.000000e+00> : vector<4x256xf32>
    %89 = tpu.matmul %88, %86, %cst_64 {dimension_numbers = #tpu.dot_dimension_numbers<[1], [0], [0], [1], [0, 0, 1, 1], [], []>} : vector<4x4xf32>, vector<4x256xf32>, vector<4x256xf32> -> vector<4x256xf32>
    %90 = arith.addf %81, %89 : vector<4x256xf32>
    %91 = vector.extract_strided_slice %32 {offsets = [0, 143], sizes = [4, 256], strides = [1, 1]} : vector<4x512xf32> to vector<4x256xf32>
    %c6 = arith.constant 6 : index
    %c0_65 = arith.constant 0 : index
    %c0_66 = arith.constant 0 : index
    %92 = vector.load %arg1[%c6, %c0_65, %c0_66] : memref<9x1x256xf32, #tpu.memory_space<vmem>>, vector<1x1x256xf32>
    %93 = vector.shape_cast %92 : vector<1x1x256xf32> to vector<1x256xf32>
    %94 = vector.broadcast %93 : vector<1x256xf32> to vector<4x256xf32>
    %95 = arith.mulf %91, %94 : vector<4x256xf32>
    %c6_67 = arith.constant 6 : index
    %c0_68 = arith.constant 0 : index
    %c0_69 = arith.constant 0 : index
    %96 = vector.load %arg9[%c6_67, %c0_68, %c0_69] : memref<9x4x4xf32, #tpu.memory_space<vmem>>, vector<1x4x4xf32>
    %97 = vector.shape_cast %96 : vector<1x4x4xf32> to vector<4x4xf32>
    %cst_70 = arith.constant dense<0.000000e+00> : vector<4x256xf32>
    %98 = tpu.matmul %97, %95, %cst_70 {dimension_numbers = #tpu.dot_dimension_numbers<[1], [0], [0], [1], [0, 0, 1, 1], [], []>} : vector<4x4xf32>, vector<4x256xf32>, vector<4x256xf32> -> vector<4x256xf32>
    %99 = arith.addf %90, %98 : vector<4x256xf32>
    %100 = vector.extract_strided_slice %32 {offsets = [0, 144], sizes = [4, 256], strides = [1, 1]} : vector<4x512xf32> to vector<4x256xf32>
    %c7 = arith.constant 7 : index
    %c0_71 = arith.constant 0 : index
    %c0_72 = arith.constant 0 : index
    %101 = vector.load %arg1[%c7, %c0_71, %c0_72] : memref<9x1x256xf32, #tpu.memory_space<vmem>>, vector<1x1x256xf32>
    %102 = vector.shape_cast %101 : vector<1x1x256xf32> to vector<1x256xf32>
    %103 = vector.broadcast %102 : vector<1x256xf32> to vector<4x256xf32>
    %104 = arith.mulf %100, %103 : vector<4x256xf32>
    %c7_73 = arith.constant 7 : index
    %c0_74 = arith.constant 0 : index
    %c0_75 = arith.constant 0 : index
    %105 = vector.load %arg9[%c7_73, %c0_74, %c0_75] : memref<9x4x4xf32, #tpu.memory_space<vmem>>, vector<1x4x4xf32>
    %106 = vector.shape_cast %105 : vector<1x4x4xf32> to vector<4x4xf32>
    %cst_76 = arith.constant dense<0.000000e+00> : vector<4x256xf32>
    %107 = tpu.matmul %106, %104, %cst_76 {dimension_numbers = #tpu.dot_dimension_numbers<[1], [0], [0], [1], [0, 0, 1, 1], [], []>} : vector<4x4xf32>, vector<4x256xf32>, vector<4x256xf32> -> vector<4x256xf32>
    %108 = arith.addf %99, %107 : vector<4x256xf32>
    %109 = vector.extract_strided_slice %32 {offsets = [0, 145], sizes = [4, 256], strides = [1, 1]} : vector<4x512xf32> to vector<4x256xf32>
    %c8 = arith.constant 8 : index
    %c0_77 = arith.constant 0 : index
    %c0_78 = arith.constant 0 : index
    %110 = vector.load %arg1[%c8, %c0_77, %c0_78] : memref<9x1x256xf32, #tpu.memory_space<vmem>>, vector<1x1x256xf32>
    %111 = vector.shape_cast %110 : vector<1x1x256xf32> to vector<1x256xf32>
    %112 = vector.broadcast %111 : vector<1x256xf32> to vector<4x256xf32>
    %113 = arith.mulf %109, %112 : vector<4x256xf32>
    %c8_79 = arith.constant 8 : index
    %c0_80 = arith.constant 0 : index
    %c0_81 = arith.constant 0 : index
    %114 = vector.load %arg9[%c8_79, %c0_80, %c0_81] : memref<9x4x4xf32, #tpu.memory_space<vmem>>, vector<1x4x4xf32>
    %115 = vector.shape_cast %114 : vector<1x4x4xf32> to vector<4x4xf32>
    %cst_82 = arith.constant dense<0.000000e+00> : vector<4x256xf32>
    %116 = tpu.matmul %115, %113, %cst_82 {dimension_numbers = #tpu.dot_dimension_numbers<[1], [0], [0], [1], [0, 0, 1, 1], [], []>} : vector<4x4xf32>, vector<4x256xf32>, vector<4x256xf32> -> vector<4x256xf32>
    %117 = arith.addf %108, %116 : vector<4x256xf32>
    %118 = vector.extract_strided_slice %3 {offsets = [4, 0], sizes = [4, 256], strides = [1, 1]} : vector<8x256xf32> to vector<4x256xf32>
    %119 = vector.extract_strided_slice %3 {offsets = [0, 0], sizes = [4, 256], strides = [1, 1]} : vector<8x256xf32> to vector<4x256xf32>
    %c0_83 = arith.constant 0 : index
    %c0_84 = arith.constant 0 : index
    %120 = vector.load %arg11[%c0_83, %c0_84] : memref<2x4xf32, #tpu.memory_space<vmem>>, vector<2x4xf32>
    %cst_85 = arith.constant dense<0.000000e+00> : vector<2x256xf32>
    %121 = tpu.matmul %120, %119, %cst_85 {dimension_numbers = #tpu.dot_dimension_numbers<[1], [0], [0], [1], [0, 0, 1, 1], [], []>} : vector<2x4xf32>, vector<4x256xf32>, vector<2x256xf32> -> vector<2x256xf32>
    %c0_86 = arith.constant 0 : index
    %c0_87 = arith.constant 0 : index
    %122 = vector.load %arg12[%c0_86, %c0_87] : memref<2x1xf32, #tpu.memory_space<vmem>>, vector<2x1xf32>
    %123 = vector.broadcast %122 : vector<2x1xf32> to vector<2x256xf32>
    %124 = arith.addf %121, %123 : vector<2x256xf32>
    %cst_88 = arith.constant 0.000000e+00 : f32
    %125 = vector.broadcast %cst_88 : f32 to vector<2x256xf32>
    %126 = arith.maximumf %124, %125 : vector<2x256xf32>
    %c0_89 = arith.constant 0 : index
    %c0_90 = arith.constant 0 : index
    %127 = vector.load %arg13[%c0_89, %c0_90] : memref<4x2xf32, #tpu.memory_space<vmem>>, vector<4x2xf32>
    %cst_91 = arith.constant dense<0.000000e+00> : vector<4x256xf32>
    %128 = tpu.matmul %127, %126, %cst_91 {dimension_numbers = #tpu.dot_dimension_numbers<[1], [0], [0], [1], [0, 0, 1, 1], [], []>} : vector<4x2xf32>, vector<2x256xf32>, vector<4x256xf32> -> vector<4x256xf32>
    %c0_92 = arith.constant 0 : index
    %c0_93 = arith.constant 0 : index
    %129 = vector.load %arg14[%c0_92, %c0_93] : memref<4x1xf32, #tpu.memory_space<vmem>>, vector<4x1xf32>
    %130 = vector.broadcast %129 : vector<4x1xf32> to vector<4x256xf32>
    %131 = arith.addf %128, %130 : vector<4x256xf32>
    %c0_94 = arith.constant 0 : index
    %c0_95 = arith.constant 0 : index
    %132 = vector.load %arg15[%c0_94, %c0_95] : memref<4x2xf32, #tpu.memory_space<vmem>>, vector<4x2xf32>
    %cst_96 = arith.constant dense<0.000000e+00> : vector<4x256xf32>
    %133 = tpu.matmul %132, %126, %cst_96 {dimension_numbers = #tpu.dot_dimension_numbers<[1], [0], [0], [1], [0, 0, 1, 1], [], []>} : vector<4x2xf32>, vector<2x256xf32>, vector<4x256xf32> -> vector<4x256xf32>
    %c0_97 = arith.constant 0 : index
    %c0_98 = arith.constant 0 : index
    %134 = vector.load %arg16[%c0_97, %c0_98] : memref<4x1xf32, #tpu.memory_space<vmem>>, vector<4x1xf32>
    %135 = vector.broadcast %134 : vector<4x1xf32> to vector<4x256xf32>
    %136 = arith.addf %133, %135 : vector<4x256xf32>
    %cst_99 = arith.constant 0.000000e+00 : f32
    %137 = vector.broadcast %cst_99 : f32 to vector<4x256xf32>
    %138 = arith.subf %137, %131 : vector<4x256xf32>
    %139 = math.exp %138 : vector<4x256xf32>
    %cst_100 = arith.constant 1.000000e+00 : f32
    %140 = vector.broadcast %cst_100 : f32 to vector<4x256xf32>
    %141 = arith.addf %140, %139 : vector<4x256xf32>
    %142 = tpu.reciprocal %141 {approx = true} : vector<4x256xf32> -> vector<4x256xf32>
    %143 = arith.mulf %118, %142 : vector<4x256xf32>
    %144 = arith.addf %143, %136 : vector<4x256xf32>
    %c0_101 = arith.constant 0 : index
    %c128_102 = arith.constant 128 : index
    %145 = vector.load %arg36[%c0_101, %c128_102] : memref<4x512xf32, #tpu.memory_space<vmem>>, vector<4x256xf32>
    tpu.vector_store %arg36[%c0_101, %c128_102], %144 {strides = array<i32>} : memref<4x512xf32, #tpu.memory_space<vmem>>, vector<4x256xf32>,
    %c0_103 = arith.constant 0 : index
    %c0_104 = arith.constant 0 : index
    %146 = vector.load %arg36[%c0_103, %c0_104] : memref<4x512xf32, #tpu.memory_space<vmem>>, vector<4x512xf32>
    %cst_105 = arith.constant 0.000000e+00 : f32
    %147 = vector.broadcast %cst_105 : f32 to vector<4x256xf32>
    %c0_106 = arith.constant 0 : index
    %c0_107 = arith.constant 0 : index
    %148 = vector.load %arg18[%c0_106, %c0_107] : memref<4x1xf32, #tpu.memory_space<vmem>>, vector<4x1xf32>
    %149 = vector.broadcast %148 : vector<4x1xf32> to vector<4x256xf32>
    %150 = arith.addf %147, %149 : vector<4x256xf32>
    %151 = vector.extract_strided_slice %146 {offsets = [0, 111], sizes = [4, 256], strides = [1, 1]} : vector<4x512xf32> to vector<4x256xf32>
    %c0_108 = arith.constant 0 : index
    %c0_109 = arith.constant 0 : index
    %c0_110 = arith.constant 0 : index
    %152 = vector.load %arg1[%c0_108, %c0_109, %c0_110] : memref<9x1x256xf32, #tpu.memory_space<vmem>>, vector<1x1x256xf32>
    %153 = vector.shape_cast %152 : vector<1x1x256xf32> to vector<1x256xf32>
    %154 = vector.broadcast %153 : vector<1x256xf32> to vector<4x256xf32>
    %155 = arith.mulf %151, %154 : vector<4x256xf32>
    %c0_111 = arith.constant 0 : index
    %c0_112 = arith.constant 0 : index
    %c0_113 = arith.constant 0 : index
    %156 = vector.load %arg17[%c0_111, %c0_112, %c0_113] : memref<9x4x4xf32, #tpu.memory_space<vmem>>, vector<1x4x4xf32>
    %157 = vector.shape_cast %156 : vector<1x4x4xf32> to vector<4x4xf32>
    %cst_114 = arith.constant dense<0.000000e+00> : vector<4x256xf32>
    %158 = tpu.matmul %157, %155, %cst_114 {dimension_numbers = #tpu.dot_dimension_numbers<[1], [0], [0], [1], [0, 0, 1, 1], [], []>} : vector<4x4xf32>, vector<4x256xf32>, vector<4x256xf32> -> vector<4x256xf32>
    %159 = arith.addf %150, %158 : vector<4x256xf32>
    %160 = vector.extract_strided_slice %146 {offsets = [0, 112], sizes = [4, 256], strides = [1, 1]} : vector<4x512xf32> to vector<4x256xf32>
    %c1_115 = arith.constant 1 : index
    %c0_116 = arith.constant 0 : index
    %c0_117 = arith.constant 0 : index
    %161 = vector.load %arg1[%c1_115, %c0_116, %c0_117] : memref<9x1x256xf32, #tpu.memory_space<vmem>>, vector<1x1x256xf32>
    %162 = vector.shape_cast %161 : vector<1x1x256xf32> to vector<1x256xf32>
    %163 = vector.broadcast %162 : vector<1x256xf32> to vector<4x256xf32>
    %164 = arith.mulf %160, %163 : vector<4x256xf32>
    %c1_118 = arith.constant 1 : index
    %c0_119 = arith.constant 0 : index
    %c0_120 = arith.constant 0 : index
    %165 = vector.load %arg17[%c1_118, %c0_119, %c0_120] : memref<9x4x4xf32, #tpu.memory_space<vmem>>, vector<1x4x4xf32>
    %166 = vector.shape_cast %165 : vector<1x4x4xf32> to vector<4x4xf32>
    %cst_121 = arith.constant dense<0.000000e+00> : vector<4x256xf32>
    %167 = tpu.matmul %166, %164, %cst_121 {dimension_numbers = #tpu.dot_dimension_numbers<[1], [0], [0], [1], [0, 0, 1, 1], [], []>} : vector<4x4xf32>, vector<4x256xf32>, vector<4x256xf32> -> vector<4x256xf32>
    %168 = arith.addf %159, %167 : vector<4x256xf32>
    %169 = vector.extract_strided_slice %146 {offsets = [0, 113], sizes = [4, 256], strides = [1, 1]} : vector<4x512xf32> to vector<4x256xf32>
    %c2_122 = arith.constant 2 : index
    %c0_123 = arith.constant 0 : index
    %c0_124 = arith.constant 0 : index
    %170 = vector.load %arg1[%c2_122, %c0_123, %c0_124] : memref<9x1x256xf32, #tpu.memory_space<vmem>>, vector<1x1x256xf32>
    %171 = vector.shape_cast %170 : vector<1x1x256xf32> to vector<1x256xf32>
    %172 = vector.broadcast %171 : vector<1x256xf32> to vector<4x256xf32>
    %173 = arith.mulf %169, %172 : vector<4x256xf32>
    %c2_125 = arith.constant 2 : index
    %c0_126 = arith.constant 0 : index
    %c0_127 = arith.constant 0 : index
    %174 = vector.load %arg17[%c2_125, %c0_126, %c0_127] : memref<9x4x4xf32, #tpu.memory_space<vmem>>, vector<1x4x4xf32>
    %175 = vector.shape_cast %174 : vector<1x4x4xf32> to vector<4x4xf32>
    %cst_128 = arith.constant dense<0.000000e+00> : vector<4x256xf32>
    %176 = tpu.matmul %175, %173, %cst_128 {dimension_numbers = #tpu.dot_dimension_numbers<[1], [0], [0], [1], [0, 0, 1, 1], [], []>} : vector<4x4xf32>, vector<4x256xf32>, vector<4x256xf32> -> vector<4x256xf32>
    %177 = arith.addf %168, %176 : vector<4x256xf32>
    %178 = vector.extract_strided_slice %146 {offsets = [0, 127], sizes = [4, 256], strides = [1, 1]} : vector<4x512xf32> to vector<4x256xf32>
    %c3_129 = arith.constant 3 : index
    %c0_130 = arith.constant 0 : index
    %c0_131 = arith.constant 0 : index
    %179 = vector.load %arg1[%c3_129, %c0_130, %c0_131] : memref<9x1x256xf32, #tpu.memory_space<vmem>>, vector<1x1x256xf32>
    %180 = vector.shape_cast %179 : vector<1x1x256xf32> to vector<1x256xf32>
    %181 = vector.broadcast %180 : vector<1x256xf32> to vector<4x256xf32>
    %182 = arith.mulf %178, %181 : vector<4x256xf32>
    %c3_132 = arith.constant 3 : index
    %c0_133 = arith.constant 0 : index
    %c0_134 = arith.constant 0 : index
    %183 = vector.load %arg17[%c3_132, %c0_133, %c0_134] : memref<9x4x4xf32, #tpu.memory_space<vmem>>, vector<1x4x4xf32>
    %184 = vector.shape_cast %183 : vector<1x4x4xf32> to vector<4x4xf32>
    %cst_135 = arith.constant dense<0.000000e+00> : vector<4x256xf32>
    %185 = tpu.matmul %184, %182, %cst_135 {dimension_numbers = #tpu.dot_dimension_numbers<[1], [0], [0], [1], [0, 0, 1, 1], [], []>} : vector<4x4xf32>, vector<4x256xf32>, vector<4x256xf32> -> vector<4x256xf32>
    %186 = arith.addf %177, %185 : vector<4x256xf32>
    %187 = vector.extract_strided_slice %146 {offsets = [0, 128], sizes = [4, 256], strides = [1, 1]} : vector<4x512xf32> to vector<4x256xf32>
    %c4_136 = arith.constant 4 : index
    %c0_137 = arith.constant 0 : index
    %c0_138 = arith.constant 0 : index
    %188 = vector.load %arg1[%c4_136, %c0_137, %c0_138] : memref<9x1x256xf32, #tpu.memory_space<vmem>>, vector<1x1x256xf32>
    %189 = vector.shape_cast %188 : vector<1x1x256xf32> to vector<1x256xf32>
    %190 = vector.broadcast %189 : vector<1x256xf32> to vector<4x256xf32>
    %191 = arith.mulf %187, %190 : vector<4x256xf32>
    %c4_139 = arith.constant 4 : index
    %c0_140 = arith.constant 0 : index
    %c0_141 = arith.constant 0 : index
    %192 = vector.load %arg17[%c4_139, %c0_140, %c0_141] : memref<9x4x4xf32, #tpu.memory_space<vmem>>, vector<1x4x4xf32>
    %193 = vector.shape_cast %192 : vector<1x4x4xf32> to vector<4x4xf32>
    %cst_142 = arith.constant dense<0.000000e+00> : vector<4x256xf32>
    %194 = tpu.matmul %193, %191, %cst_142 {dimension_numbers = #tpu.dot_dimension_numbers<[1], [0], [0], [1], [0, 0, 1, 1], [], []>} : vector<4x4xf32>, vector<4x256xf32>, vector<4x256xf32> -> vector<4x256xf32>
    %195 = arith.addf %186, %194 : vector<4x256xf32>
    %196 = vector.extract_strided_slice %146 {offsets = [0, 129], sizes = [4, 256], strides = [1, 1]} : vector<4x512xf32> to vector<4x256xf32>
    %c5_143 = arith.constant 5 : index
    %c0_144 = arith.constant 0 : index
    %c0_145 = arith.constant 0 : index
    %197 = vector.load %arg1[%c5_143, %c0_144, %c0_145] : memref<9x1x256xf32, #tpu.memory_space<vmem>>, vector<1x1x256xf32>
    %198 = vector.shape_cast %197 : vector<1x1x256xf32> to vector<1x256xf32>
    %199 = vector.broadcast %198 : vector<1x256xf32> to vector<4x256xf32>
    %200 = arith.mulf %196, %199 : vector<4x256xf32>
    %c5_146 = arith.constant 5 : index
    %c0_147 = arith.constant 0 : index
    %c0_148 = arith.constant 0 : index
    %201 = vector.load %arg17[%c5_146, %c0_147, %c0_148] : memref<9x4x4xf32, #tpu.memory_space<vmem>>, vector<1x4x4xf32>
    %202 = vector.shape_cast %201 : vector<1x4x4xf32> to vector<4x4xf32>
    %cst_149 = arith.constant dense<0.000000e+00> : vector<4x256xf32>
    %203 = tpu.matmul %202, %200, %cst_149 {dimension_numbers = #tpu.dot_dimension_numbers<[1], [0], [0], [1], [0, 0, 1, 1], [], []>} : vector<4x4xf32>, vector<4x256xf32>, vector<4x256xf32> -> vector<4x256xf32>
    %204 = arith.addf %195, %203 : vector<4x256xf32>
    %205 = vector.extract_strided_slice %146 {offsets = [0, 143], sizes = [4, 256], strides = [1, 1]} : vector<4x512xf32> to vector<4x256xf32>
    %c6_150 = arith.constant 6 : index
    %c0_151 = arith.constant 0 : index
    %c0_152 = arith.constant 0 : index
    %206 = vector.load %arg1[%c6_150, %c0_151, %c0_152] : memref<9x1x256xf32, #tpu.memory_space<vmem>>, vector<1x1x256xf32>
    %207 = vector.shape_cast %206 : vector<1x1x256xf32> to vector<1x256xf32>
    %208 = vector.broadcast %207 : vector<1x256xf32> to vector<4x256xf32>
    %209 = arith.mulf %205, %208 : vector<4x256xf32>
    %c6_153 = arith.constant 6 : index
    %c0_154 = arith.constant 0 : index
    %c0_155 = arith.constant 0 : index
    %210 = vector.load %arg17[%c6_153, %c0_154, %c0_155] : memref<9x4x4xf32, #tpu.memory_space<vmem>>, vector<1x4x4xf32>
    %211 = vector.shape_cast %210 : vector<1x4x4xf32> to vector<4x4xf32>
    %cst_156 = arith.constant dense<0.000000e+00> : vector<4x256xf32>
    %212 = tpu.matmul %211, %209, %cst_156 {dimension_numbers = #tpu.dot_dimension_numbers<[1], [0], [0], [1], [0, 0, 1, 1], [], []>} : vector<4x4xf32>, vector<4x256xf32>, vector<4x256xf32> -> vector<4x256xf32>
    %213 = arith.addf %204, %212 : vector<4x256xf32>
    %214 = vector.extract_strided_slice %146 {offsets = [0, 144], sizes = [4, 256], strides = [1, 1]} : vector<4x512xf32> to vector<4x256xf32>
    %c7_157 = arith.constant 7 : index
    %c0_158 = arith.constant 0 : index
    %c0_159 = arith.constant 0 : index
    %215 = vector.load %arg1[%c7_157, %c0_158, %c0_159] : memref<9x1x256xf32, #tpu.memory_space<vmem>>, vector<1x1x256xf32>
    %216 = vector.shape_cast %215 : vector<1x1x256xf32> to vector<1x256xf32>
    %217 = vector.broadcast %216 : vector<1x256xf32> to vector<4x256xf32>
    %218 = arith.mulf %214, %217 : vector<4x256xf32>
    %c7_160 = arith.constant 7 : index
    %c0_161 = arith.constant 0 : index
    %c0_162 = arith.constant 0 : index
    %219 = vector.load %arg17[%c7_160, %c0_161, %c0_162] : memref<9x4x4xf32, #tpu.memory_space<vmem>>, vector<1x4x4xf32>
    %220 = vector.shape_cast %219 : vector<1x4x4xf32> to vector<4x4xf32>
    %cst_163 = arith.constant dense<0.000000e+00> : vector<4x256xf32>
    %221 = tpu.matmul %220, %218, %cst_163 {dimension_numbers = #tpu.dot_dimension_numbers<[1], [0], [0], [1], [0, 0, 1, 1], [], []>} : vector<4x4xf32>, vector<4x256xf32>, vector<4x256xf32> -> vector<4x256xf32>
    %222 = arith.addf %213, %221 : vector<4x256xf32>
    %223 = vector.extract_strided_slice %146 {offsets = [0, 145], sizes = [4, 256], strides = [1, 1]} : vector<4x512xf32> to vector<4x256xf32>
    %c8_164 = arith.constant 8 : index
    %c0_165 = arith.constant 0 : index
    %c0_166 = arith.constant 0 : index
    %224 = vector.load %arg1[%c8_164, %c0_165, %c0_166] : memref<9x1x256xf32, #tpu.memory_space<vmem>>, vector<1x1x256xf32>
    %225 = vector.shape_cast %224 : vector<1x1x256xf32> to vector<1x256xf32>
    %226 = vector.broadcast %225 : vector<1x256xf32> to vector<4x256xf32>
    %227 = arith.mulf %223, %226 : vector<4x256xf32>
    %c8_167 = arith.constant 8 : index
    %c0_168 = arith.constant 0 : index
    %c0_169 = arith.constant 0 : index
    %228 = vector.load %arg17[%c8_167, %c0_168, %c0_169] : memref<9x4x4xf32, #tpu.memory_space<vmem>>, vector<1x4x4xf32>
    %229 = vector.shape_cast %228 : vector<1x4x4xf32> to vector<4x4xf32>
    %cst_170 = arith.constant dense<0.000000e+00> : vector<4x256xf32>
    %230 = tpu.matmul %229, %227, %cst_170 {dimension_numbers = #tpu.dot_dimension_numbers<[1], [0], [0], [1], [0, 0, 1, 1], [], []>} : vector<4x4xf32>, vector<4x256xf32>, vector<4x256xf32> -> vector<4x256xf32>
    %231 = arith.addf %222, %230 : vector<4x256xf32>
    %cst_171 = arith.constant 0.000000e+00 : f32
    %232 = vector.broadcast %cst_171 : f32 to vector<4x256xf32>
    %233 = arith.maximumf %117, %232 : vector<4x256xf32>
    %cst_172 = arith.constant 0.000000e+00 : f32
    %234 = vector.broadcast %cst_172 : f32 to vector<4x256xf32>
    %235 = arith.maximumf %231, %234 : vector<4x256xf32>
    %236 = tpu.concatenate %233, %235 in 0 : vector<4x256xf32>, vector<4x256xf32> -> vector<8x256xf32>
    %237 = vector.extract_strided_slice %236 {offsets = [0, 0], sizes = [4, 256], strides = [1, 1]} : vector<8x256xf32> to vector<4x256xf32>
    %238 = vector.extract_strided_slice %236 {offsets = [4, 0], sizes = [4, 256], strides = [1, 1]} : vector<8x256xf32> to vector<4x256xf32>
    %c0_173 = arith.constant 0 : index
    %c0_174 = arith.constant 0 : index
    %239 = vector.load %arg19[%c0_173, %c0_174] : memref<2x4xf32, #tpu.memory_space<vmem>>, vector<2x4xf32>
    %cst_175 = arith.constant dense<0.000000e+00> : vector<2x256xf32>
    %240 = tpu.matmul %239, %238, %cst_175 {dimension_numbers = #tpu.dot_dimension_numbers<[1], [0], [0], [1], [0, 0, 1, 1], [], []>} : vector<2x4xf32>, vector<4x256xf32>, vector<2x256xf32> -> vector<2x256xf32>
    %c0_176 = arith.constant 0 : index
    %c0_177 = arith.constant 0 : index
    %241 = vector.load %arg20[%c0_176, %c0_177] : memref<2x1xf32, #tpu.memory_space<vmem>>, vector<2x1xf32>
    %242 = vector.broadcast %241 : vector<2x1xf32> to vector<2x256xf32>
    %243 = arith.addf %240, %242 : vector<2x256xf32>
    %cst_178 = arith.constant 0.000000e+00 : f32
    %244 = vector.broadcast %cst_178 : f32 to vector<2x256xf32>
    %245 = arith.maximumf %243, %244 : vector<2x256xf32>
    %c0_179 = arith.constant 0 : index
    %c0_180 = arith.constant 0 : index
    %246 = vector.load %arg21[%c0_179, %c0_180] : memref<4x2xf32, #tpu.memory_space<vmem>>, vector<4x2xf32>
    %cst_181 = arith.constant dense<0.000000e+00> : vector<4x256xf32>
    %247 = tpu.matmul %246, %245, %cst_181 {dimension_numbers = #tpu.dot_dimension_numbers<[1], [0], [0], [1], [0, 0, 1, 1], [], []>} : vector<4x2xf32>, vector<2x256xf32>, vector<4x256xf32> -> vector<4x256xf32>
    %c0_182 = arith.constant 0 : index
    %c0_183 = arith.constant 0 : index
    %248 = vector.load %arg22[%c0_182, %c0_183] : memref<4x1xf32, #tpu.memory_space<vmem>>, vector<4x1xf32>
    %249 = vector.broadcast %248 : vector<4x1xf32> to vector<4x256xf32>
    %250 = arith.addf %247, %249 : vector<4x256xf32>
    %c0_184 = arith.constant 0 : index
    %c0_185 = arith.constant 0 : index
    %251 = vector.load %arg23[%c0_184, %c0_185] : memref<4x2xf32, #tpu.memory_space<vmem>>, vector<4x2xf32>
    %cst_186 = arith.constant dense<0.000000e+00> : vector<4x256xf32>
    %252 = tpu.matmul %251, %245, %cst_186 {dimension_numbers = #tpu.dot_dimension_numbers<[1], [0], [0], [1], [0, 0, 1, 1], [], []>} : vector<4x2xf32>, vector<2x256xf32>, vector<4x256xf32> -> vector<4x256xf32>
    %c0_187 = arith.constant 0 : index
    %c0_188 = arith.constant 0 : index
    %253 = vector.load %arg24[%c0_187, %c0_188] : memref<4x1xf32, #tpu.memory_space<vmem>>, vector<4x1xf32>
    %254 = vector.broadcast %253 : vector<4x1xf32> to vector<4x256xf32>
    %255 = arith.addf %252, %254 : vector<4x256xf32>
    %cst_189 = arith.constant 0.000000e+00 : f32
    %256 = vector.broadcast %cst_189 : f32 to vector<4x256xf32>
    %257 = arith.subf %256, %250 : vector<4x256xf32>
    %258 = math.exp %257 : vector<4x256xf32>
    %cst_190 = arith.constant 1.000000e+00 : f32
    %259 = vector.broadcast %cst_190 : f32 to vector<4x256xf32>
    %260 = arith.addf %259, %258 : vector<4x256xf32>
    %261 = tpu.reciprocal %260 {approx = true} : vector<4x256xf32> -> vector<4x256xf32>
    %262 = arith.mulf %237, %261 : vector<4x256xf32>
    %263 = arith.addf %262, %255 : vector<4x256xf32>
    %c0_191 = arith.constant 0 : index
    %c128_192 = arith.constant 128 : index
    %264 = vector.load %arg36[%c0_191, %c128_192] : memref<4x512xf32, #tpu.memory_space<vmem>>, vector<4x256xf32>
    tpu.vector_store %arg36[%c0_191, %c128_192], %263 {strides = array<i32>} : memref<4x512xf32, #tpu.memory_space<vmem>>, vector<4x256xf32>,
    %c0_193 = arith.constant 0 : index
    %c0_194 = arith.constant 0 : index
    %265 = vector.load %arg36[%c0_193, %c0_194] : memref<4x512xf32, #tpu.memory_space<vmem>>, vector<4x512xf32>
    %cst_195 = arith.constant 0.000000e+00 : f32
    %266 = vector.broadcast %cst_195 : f32 to vector<4x256xf32>
    %c0_196 = arith.constant 0 : index
    %c0_197 = arith.constant 0 : index
    %267 = vector.load %arg26[%c0_196, %c0_197] : memref<4x1xf32, #tpu.memory_space<vmem>>, vector<4x1xf32>
    %268 = vector.broadcast %267 : vector<4x1xf32> to vector<4x256xf32>
    %269 = arith.addf %266, %268 : vector<4x256xf32>
    %270 = vector.extract_strided_slice %265 {offsets = [0, 111], sizes = [4, 256], strides = [1, 1]} : vector<4x512xf32> to vector<4x256xf32>
    %c0_198 = arith.constant 0 : index
    %c0_199 = arith.constant 0 : index
    %c0_200 = arith.constant 0 : index
    %271 = vector.load %arg1[%c0_198, %c0_199, %c0_200] : memref<9x1x256xf32, #tpu.memory_space<vmem>>, vector<1x1x256xf32>
    %272 = vector.shape_cast %271 : vector<1x1x256xf32> to vector<1x256xf32>
    %273 = vector.broadcast %272 : vector<1x256xf32> to vector<4x256xf32>
    %274 = arith.mulf %270, %273 : vector<4x256xf32>
    %c0_201 = arith.constant 0 : index
    %c0_202 = arith.constant 0 : index
    %c0_203 = arith.constant 0 : index
    %275 = vector.load %arg25[%c0_201, %c0_202, %c0_203] : memref<9x4x4xf32, #tpu.memory_space<vmem>>, vector<1x4x4xf32>
    %276 = vector.shape_cast %275 : vector<1x4x4xf32> to vector<4x4xf32>
    %cst_204 = arith.constant dense<0.000000e+00> : vector<4x256xf32>
    %277 = tpu.matmul %276, %274, %cst_204 {dimension_numbers = #tpu.dot_dimension_numbers<[1], [0], [0], [1], [0, 0, 1, 1], [], []>} : vector<4x4xf32>, vector<4x256xf32>, vector<4x256xf32> -> vector<4x256xf32>
    %278 = arith.addf %269, %277 : vector<4x256xf32>
    %279 = vector.extract_strided_slice %265 {offsets = [0, 112], sizes = [4, 256], strides = [1, 1]} : vector<4x512xf32> to vector<4x256xf32>
    %c1_205 = arith.constant 1 : index
    %c0_206 = arith.constant 0 : index
    %c0_207 = arith.constant 0 : index
    %280 = vector.load %arg1[%c1_205, %c0_206, %c0_207] : memref<9x1x256xf32, #tpu.memory_space<vmem>>, vector<1x1x256xf32>
    %281 = vector.shape_cast %280 : vector<1x1x256xf32> to vector<1x256xf32>
    %282 = vector.broadcast %281 : vector<1x256xf32> to vector<4x256xf32>
    %283 = arith.mulf %279, %282 : vector<4x256xf32>
    %c1_208 = arith.constant 1 : index
    %c0_209 = arith.constant 0 : index
    %c0_210 = arith.constant 0 : index
    %284 = vector.load %arg25[%c1_208, %c0_209, %c0_210] : memref<9x4x4xf32, #tpu.memory_space<vmem>>, vector<1x4x4xf32>
    %285 = vector.shape_cast %284 : vector<1x4x4xf32> to vector<4x4xf32>
    %cst_211 = arith.constant dense<0.000000e+00> : vector<4x256xf32>
    %286 = tpu.matmul %285, %283, %cst_211 {dimension_numbers = #tpu.dot_dimension_numbers<[1], [0], [0], [1], [0, 0, 1, 1], [], []>} : vector<4x4xf32>, vector<4x256xf32>, vector<4x256xf32> -> vector<4x256xf32>
    %287 = arith.addf %278, %286 : vector<4x256xf32>
    %288 = vector.extract_strided_slice %265 {offsets = [0, 113], sizes = [4, 256], strides = [1, 1]} : vector<4x512xf32> to vector<4x256xf32>
    %c2_212 = arith.constant 2 : index
    %c0_213 = arith.constant 0 : index
    %c0_214 = arith.constant 0 : index
    %289 = vector.load %arg1[%c2_212, %c0_213, %c0_214] : memref<9x1x256xf32, #tpu.memory_space<vmem>>, vector<1x1x256xf32>
    %290 = vector.shape_cast %289 : vector<1x1x256xf32> to vector<1x256xf32>
    %291 = vector.broadcast %290 : vector<1x256xf32> to vector<4x256xf32>
    %292 = arith.mulf %288, %291 : vector<4x256xf32>
    %c2_215 = arith.constant 2 : index
    %c0_216 = arith.constant 0 : index
    %c0_217 = arith.constant 0 : index
    %293 = vector.load %arg25[%c2_215, %c0_216, %c0_217] : memref<9x4x4xf32, #tpu.memory_space<vmem>>, vector<1x4x4xf32>
    %294 = vector.shape_cast %293 : vector<1x4x4xf32> to vector<4x4xf32>
    %cst_218 = arith.constant dense<0.000000e+00> : vector<4x256xf32>
    %295 = tpu.matmul %294, %292, %cst_218 {dimension_numbers = #tpu.dot_dimension_numbers<[1], [0], [0], [1], [0, 0, 1, 1], [], []>} : vector<4x4xf32>, vector<4x256xf32>, vector<4x256xf32> -> vector<4x256xf32>
    %296 = arith.addf %287, %295 : vector<4x256xf32>
    %297 = vector.extract_strided_slice %265 {offsets = [0, 127], sizes = [4, 256], strides = [1, 1]} : vector<4x512xf32> to vector<4x256xf32>
    %c3_219 = arith.constant 3 : index
    %c0_220 = arith.constant 0 : index
    %c0_221 = arith.constant 0 : index
    %298 = vector.load %arg1[%c3_219, %c0_220, %c0_221] : memref<9x1x256xf32, #tpu.memory_space<vmem>>, vector<1x1x256xf32>
    %299 = vector.shape_cast %298 : vector<1x1x256xf32> to vector<1x256xf32>
    %300 = vector.broadcast %299 : vector<1x256xf32> to vector<4x256xf32>
    %301 = arith.mulf %297, %300 : vector<4x256xf32>
    %c3_222 = arith.constant 3 : index
    %c0_223 = arith.constant 0 : index
    %c0_224 = arith.constant 0 : index
    %302 = vector.load %arg25[%c3_222, %c0_223, %c0_224] : memref<9x4x4xf32, #tpu.memory_space<vmem>>, vector<1x4x4xf32>
    %303 = vector.shape_cast %302 : vector<1x4x4xf32> to vector<4x4xf32>
    %cst_225 = arith.constant dense<0.000000e+00> : vector<4x256xf32>
    %304 = tpu.matmul %303, %301, %cst_225 {dimension_numbers = #tpu.dot_dimension_numbers<[1], [0], [0], [1], [0, 0, 1, 1], [], []>} : vector<4x4xf32>, vector<4x256xf32>, vector<4x256xf32> -> vector<4x256xf32>
    %305 = arith.addf %296, %304 : vector<4x256xf32>
    %306 = vector.extract_strided_slice %265 {offsets = [0, 128], sizes = [4, 256], strides = [1, 1]} : vector<4x512xf32> to vector<4x256xf32>
    %c4_226 = arith.constant 4 : index
    %c0_227 = arith.constant 0 : index
    %c0_228 = arith.constant 0 : index
    %307 = vector.load %arg1[%c4_226, %c0_227, %c0_228] : memref<9x1x256xf32, #tpu.memory_space<vmem>>, vector<1x1x256xf32>
    %308 = vector.shape_cast %307 : vector<1x1x256xf32> to vector<1x256xf32>
    %309 = vector.broadcast %308 : vector<1x256xf32> to vector<4x256xf32>
    %310 = arith.mulf %306, %309 : vector<4x256xf32>
    %c4_229 = arith.constant 4 : index
    %c0_230 = arith.constant 0 : index
    %c0_231 = arith.constant 0 : index
    %311 = vector.load %arg25[%c4_229, %c0_230, %c0_231] : memref<9x4x4xf32, #tpu.memory_space<vmem>>, vector<1x4x4xf32>
    %312 = vector.shape_cast %311 : vector<1x4x4xf32> to vector<4x4xf32>
    %cst_232 = arith.constant dense<0.000000e+00> : vector<4x256xf32>
    %313 = tpu.matmul %312, %310, %cst_232 {dimension_numbers = #tpu.dot_dimension_numbers<[1], [0], [0], [1], [0, 0, 1, 1], [], []>} : vector<4x4xf32>, vector<4x256xf32>, vector<4x256xf32> -> vector<4x256xf32>
    %314 = arith.addf %305, %313 : vector<4x256xf32>
    %315 = vector.extract_strided_slice %265 {offsets = [0, 129], sizes = [4, 256], strides = [1, 1]} : vector<4x512xf32> to vector<4x256xf32>
    %c5_233 = arith.constant 5 : index
    %c0_234 = arith.constant 0 : index
    %c0_235 = arith.constant 0 : index
    %316 = vector.load %arg1[%c5_233, %c0_234, %c0_235] : memref<9x1x256xf32, #tpu.memory_space<vmem>>, vector<1x1x256xf32>
    %317 = vector.shape_cast %316 : vector<1x1x256xf32> to vector<1x256xf32>
    %318 = vector.broadcast %317 : vector<1x256xf32> to vector<4x256xf32>
    %319 = arith.mulf %315, %318 : vector<4x256xf32>
    %c5_236 = arith.constant 5 : index
    %c0_237 = arith.constant 0 : index
    %c0_238 = arith.constant 0 : index
    %320 = vector.load %arg25[%c5_236, %c0_237, %c0_238] : memref<9x4x4xf32, #tpu.memory_space<vmem>>, vector<1x4x4xf32>
    %321 = vector.shape_cast %320 : vector<1x4x4xf32> to vector<4x4xf32>
    %cst_239 = arith.constant dense<0.000000e+00> : vector<4x256xf32>
    %322 = tpu.matmul %321, %319, %cst_239 {dimension_numbers = #tpu.dot_dimension_numbers<[1], [0], [0], [1], [0, 0, 1, 1], [], []>} : vector<4x4xf32>, vector<4x256xf32>, vector<4x256xf32> -> vector<4x256xf32>
    %323 = arith.addf %314, %322 : vector<4x256xf32>
    %324 = vector.extract_strided_slice %265 {offsets = [0, 143], sizes = [4, 256], strides = [1, 1]} : vector<4x512xf32> to vector<4x256xf32>
    %c6_240 = arith.constant 6 : index
    %c0_241 = arith.constant 0 : index
    %c0_242 = arith.constant 0 : index
    %325 = vector.load %arg1[%c6_240, %c0_241, %c0_242] : memref<9x1x256xf32, #tpu.memory_space<vmem>>, vector<1x1x256xf32>
    %326 = vector.shape_cast %325 : vector<1x1x256xf32> to vector<1x256xf32>
    %327 = vector.broadcast %326 : vector<1x256xf32> to vector<4x256xf32>
    %328 = arith.mulf %324, %327 : vector<4x256xf32>
    %c6_243 = arith.constant 6 : index
    %c0_244 = arith.constant 0 : index
    %c0_245 = arith.constant 0 : index
    %329 = vector.load %arg25[%c6_243, %c0_244, %c0_245] : memref<9x4x4xf32, #tpu.memory_space<vmem>>, vector<1x4x4xf32>
    %330 = vector.shape_cast %329 : vector<1x4x4xf32> to vector<4x4xf32>
    %cst_246 = arith.constant dense<0.000000e+00> : vector<4x256xf32>
    %331 = tpu.matmul %330, %328, %cst_246 {dimension_numbers = #tpu.dot_dimension_numbers<[1], [0], [0], [1], [0, 0, 1, 1], [], []>} : vector<4x4xf32>, vector<4x256xf32>, vector<4x256xf32> -> vector<4x256xf32>
    %332 = arith.addf %323, %331 : vector<4x256xf32>
    %333 = vector.extract_strided_slice %265 {offsets = [0, 144], sizes = [4, 256], strides = [1, 1]} : vector<4x512xf32> to vector<4x256xf32>
    %c7_247 = arith.constant 7 : index
    %c0_248 = arith.constant 0 : index
    %c0_249 = arith.constant 0 : index
    %334 = vector.load %arg1[%c7_247, %c0_248, %c0_249] : memref<9x1x256xf32, #tpu.memory_space<vmem>>, vector<1x1x256xf32>
    %335 = vector.shape_cast %334 : vector<1x1x256xf32> to vector<1x256xf32>
    %336 = vector.broadcast %335 : vector<1x256xf32> to vector<4x256xf32>
    %337 = arith.mulf %333, %336 : vector<4x256xf32>
    %c7_250 = arith.constant 7 : index
    %c0_251 = arith.constant 0 : index
    %c0_252 = arith.constant 0 : index
    %338 = vector.load %arg25[%c7_250, %c0_251, %c0_252] : memref<9x4x4xf32, #tpu.memory_space<vmem>>, vector<1x4x4xf32>
    %339 = vector.shape_cast %338 : vector<1x4x4xf32> to vector<4x4xf32>
    %cst_253 = arith.constant dense<0.000000e+00> : vector<4x256xf32>
    %340 = tpu.matmul %339, %337, %cst_253 {dimension_numbers = #tpu.dot_dimension_numbers<[1], [0], [0], [1], [0, 0, 1, 1], [], []>} : vector<4x4xf32>, vector<4x256xf32>, vector<4x256xf32> -> vector<4x256xf32>
    %341 = arith.addf %332, %340 : vector<4x256xf32>
    %342 = vector.extract_strided_slice %265 {offsets = [0, 145], sizes = [4, 256], strides = [1, 1]} : vector<4x512xf32> to vector<4x256xf32>
    %c8_254 = arith.constant 8 : index
    %c0_255 = arith.constant 0 : index
    %c0_256 = arith.constant 0 : index
    %343 = vector.load %arg1[%c8_254, %c0_255, %c0_256] : memref<9x1x256xf32, #tpu.memory_space<vmem>>, vector<1x1x256xf32>
    %344 = vector.shape_cast %343 : vector<1x1x256xf32> to vector<1x256xf32>
    %345 = vector.broadcast %344 : vector<1x256xf32> to vector<4x256xf32>
    %346 = arith.mulf %342, %345 : vector<4x256xf32>
    %c8_257 = arith.constant 8 : index
    %c0_258 = arith.constant 0 : index
    %c0_259 = arith.constant 0 : index
    %347 = vector.load %arg25[%c8_257, %c0_258, %c0_259] : memref<9x4x4xf32, #tpu.memory_space<vmem>>, vector<1x4x4xf32>
    %348 = vector.shape_cast %347 : vector<1x4x4xf32> to vector<4x4xf32>
    %cst_260 = arith.constant dense<0.000000e+00> : vector<4x256xf32>
    %349 = tpu.matmul %348, %346, %cst_260 {dimension_numbers = #tpu.dot_dimension_numbers<[1], [0], [0], [1], [0, 0, 1, 1], [], []>} : vector<4x4xf32>, vector<4x256xf32>, vector<4x256xf32> -> vector<4x256xf32>
    %350 = arith.addf %341, %349 : vector<4x256xf32>
    %351 = vector.extract_strided_slice %236 {offsets = [4, 0], sizes = [4, 256], strides = [1, 1]} : vector<8x256xf32> to vector<4x256xf32>
    %352 = vector.extract_strided_slice %236 {offsets = [0, 0], sizes = [4, 256], strides = [1, 1]} : vector<8x256xf32> to vector<4x256xf32>
    %c0_261 = arith.constant 0 : index
    %c0_262 = arith.constant 0 : index
    %353 = vector.load %arg27[%c0_261, %c0_262] : memref<2x4xf32, #tpu.memory_space<vmem>>, vector<2x4xf32>
    %cst_263 = arith.constant dense<0.000000e+00> : vector<2x256xf32>
    %354 = tpu.matmul %353, %352, %cst_263 {dimension_numbers = #tpu.dot_dimension_numbers<[1], [0], [0], [1], [0, 0, 1, 1], [], []>} : vector<2x4xf32>, vector<4x256xf32>, vector<2x256xf32> -> vector<2x256xf32>
    %c0_264 = arith.constant 0 : index
    %c0_265 = arith.constant 0 : index
    %355 = vector.load %arg28[%c0_264, %c0_265] : memref<2x1xf32, #tpu.memory_space<vmem>>, vector<2x1xf32>
    %356 = vector.broadcast %355 : vector<2x1xf32> to vector<2x256xf32>
    %357 = arith.addf %354, %356 : vector<2x256xf32>
    %cst_266 = arith.constant 0.000000e+00 : f32
    %358 = vector.broadcast %cst_266 : f32 to vector<2x256xf32>
    %359 = arith.maximumf %357, %358 : vector<2x256xf32>
    %c0_267 = arith.constant 0 : index
    %c0_268 = arith.constant 0 : index
    %360 = vector.load %arg29[%c0_267, %c0_268] : memref<4x2xf32, #tpu.memory_space<vmem>>, vector<4x2xf32>
    %cst_269 = arith.constant dense<0.000000e+00> : vector<4x256xf32>
    %361 = tpu.matmul %360, %359, %cst_269 {dimension_numbers = #tpu.dot_dimension_numbers<[1], [0], [0], [1], [0, 0, 1, 1], [], []>} : vector<4x2xf32>, vector<2x256xf32>, vector<4x256xf32> -> vector<4x256xf32>
    %c0_270 = arith.constant 0 : index
    %c0_271 = arith.constant 0 : index
    %362 = vector.load %arg30[%c0_270, %c0_271] : memref<4x1xf32, #tpu.memory_space<vmem>>, vector<4x1xf32>
    %363 = vector.broadcast %362 : vector<4x1xf32> to vector<4x256xf32>
    %364 = arith.addf %361, %363 : vector<4x256xf32>
    %c0_272 = arith.constant 0 : index
    %c0_273 = arith.constant 0 : index
    %365 = vector.load %arg31[%c0_272, %c0_273] : memref<4x2xf32, #tpu.memory_space<vmem>>, vector<4x2xf32>
    %cst_274 = arith.constant dense<0.000000e+00> : vector<4x256xf32>
    %366 = tpu.matmul %365, %359, %cst_274 {dimension_numbers = #tpu.dot_dimension_numbers<[1], [0], [0], [1], [0, 0, 1, 1], [], []>} : vector<4x2xf32>, vector<2x256xf32>, vector<4x256xf32> -> vector<4x256xf32>
    %c0_275 = arith.constant 0 : index
    %c0_276 = arith.constant 0 : index
    %367 = vector.load %arg32[%c0_275, %c0_276] : memref<4x1xf32, #tpu.memory_space<vmem>>, vector<4x1xf32>
    %368 = vector.broadcast %367 : vector<4x1xf32> to vector<4x256xf32>
    %369 = arith.addf %366, %368 : vector<4x256xf32>
    %cst_277 = arith.constant 0.000000e+00 : f32
    %370 = vector.broadcast %cst_277 : f32 to vector<4x256xf32>
    %371 = arith.subf %370, %364 : vector<4x256xf32>
    %372 = math.exp %371 : vector<4x256xf32>
    %cst_278 = arith.constant 1.000000e+00 : f32
    %373 = vector.broadcast %cst_278 : f32 to vector<4x256xf32>
    %374 = arith.addf %373, %372 : vector<4x256xf32>
    %375 = tpu.reciprocal %374 {approx = true} : vector<4x256xf32> -> vector<4x256xf32>
    %376 = arith.mulf %351, %375 : vector<4x256xf32>
    %377 = arith.addf %376, %369 : vector<4x256xf32>
    %c0_279 = arith.constant 0 : index
    %c128_280 = arith.constant 128 : index
    %378 = vector.load %arg36[%c0_279, %c128_280] : memref<4x512xf32, #tpu.memory_space<vmem>>, vector<4x256xf32>
    tpu.vector_store %arg36[%c0_279, %c128_280], %377 {strides = array<i32>} : memref<4x512xf32, #tpu.memory_space<vmem>>, vector<4x256xf32>,
    %c0_281 = arith.constant 0 : index
    %c0_282 = arith.constant 0 : index
    %379 = vector.load %arg36[%c0_281, %c0_282] : memref<4x512xf32, #tpu.memory_space<vmem>>, vector<4x512xf32>
    %cst_283 = arith.constant 0.000000e+00 : f32
    %380 = vector.broadcast %cst_283 : f32 to vector<4x256xf32>
    %c0_284 = arith.constant 0 : index
    %c0_285 = arith.constant 0 : index
    %381 = vector.load %arg34[%c0_284, %c0_285] : memref<4x1xf32, #tpu.memory_space<vmem>>, vector<4x1xf32>
    %382 = vector.broadcast %381 : vector<4x1xf32> to vector<4x256xf32>
    %383 = arith.addf %380, %382 : vector<4x256xf32>
    %384 = vector.extract_strided_slice %379 {offsets = [0, 111], sizes = [4, 256], strides = [1, 1]} : vector<4x512xf32> to vector<4x256xf32>
    %c0_286 = arith.constant 0 : index
    %c0_287 = arith.constant 0 : index
    %c0_288 = arith.constant 0 : index
    %385 = vector.load %arg1[%c0_286, %c0_287, %c0_288] : memref<9x1x256xf32, #tpu.memory_space<vmem>>, vector<1x1x256xf32>
    %386 = vector.shape_cast %385 : vector<1x1x256xf32> to vector<1x256xf32>
    %387 = vector.broadcast %386 : vector<1x256xf32> to vector<4x256xf32>
    %388 = arith.mulf %384, %387 : vector<4x256xf32>
    %c0_289 = arith.constant 0 : index
    %c0_290 = arith.constant 0 : index
    %c0_291 = arith.constant 0 : index
    %389 = vector.load %arg33[%c0_289, %c0_290, %c0_291] : memref<9x4x4xf32, #tpu.memory_space<vmem>>, vector<1x4x4xf32>
    %390 = vector.shape_cast %389 : vector<1x4x4xf32> to vector<4x4xf32>
    %cst_292 = arith.constant dense<0.000000e+00> : vector<4x256xf32>
    %391 = tpu.matmul %390, %388, %cst_292 {dimension_numbers = #tpu.dot_dimension_numbers<[1], [0], [0], [1], [0, 0, 1, 1], [], []>} : vector<4x4xf32>, vector<4x256xf32>, vector<4x256xf32> -> vector<4x256xf32>
    %392 = arith.addf %383, %391 : vector<4x256xf32>
    %393 = vector.extract_strided_slice %379 {offsets = [0, 112], sizes = [4, 256], strides = [1, 1]} : vector<4x512xf32> to vector<4x256xf32>
    %c1_293 = arith.constant 1 : index
    %c0_294 = arith.constant 0 : index
    %c0_295 = arith.constant 0 : index
    %394 = vector.load %arg1[%c1_293, %c0_294, %c0_295] : memref<9x1x256xf32, #tpu.memory_space<vmem>>, vector<1x1x256xf32>
    %395 = vector.shape_cast %394 : vector<1x1x256xf32> to vector<1x256xf32>
    %396 = vector.broadcast %395 : vector<1x256xf32> to vector<4x256xf32>
    %397 = arith.mulf %393, %396 : vector<4x256xf32>
    %c1_296 = arith.constant 1 : index
    %c0_297 = arith.constant 0 : index
    %c0_298 = arith.constant 0 : index
    %398 = vector.load %arg33[%c1_296, %c0_297, %c0_298] : memref<9x4x4xf32, #tpu.memory_space<vmem>>, vector<1x4x4xf32>
    %399 = vector.shape_cast %398 : vector<1x4x4xf32> to vector<4x4xf32>
    %cst_299 = arith.constant dense<0.000000e+00> : vector<4x256xf32>
    %400 = tpu.matmul %399, %397, %cst_299 {dimension_numbers = #tpu.dot_dimension_numbers<[1], [0], [0], [1], [0, 0, 1, 1], [], []>} : vector<4x4xf32>, vector<4x256xf32>, vector<4x256xf32> -> vector<4x256xf32>
    %401 = arith.addf %392, %400 : vector<4x256xf32>
    %402 = vector.extract_strided_slice %379 {offsets = [0, 113], sizes = [4, 256], strides = [1, 1]} : vector<4x512xf32> to vector<4x256xf32>
    %c2_300 = arith.constant 2 : index
    %c0_301 = arith.constant 0 : index
    %c0_302 = arith.constant 0 : index
    %403 = vector.load %arg1[%c2_300, %c0_301, %c0_302] : memref<9x1x256xf32, #tpu.memory_space<vmem>>, vector<1x1x256xf32>
    %404 = vector.shape_cast %403 : vector<1x1x256xf32> to vector<1x256xf32>
    %405 = vector.broadcast %404 : vector<1x256xf32> to vector<4x256xf32>
    %406 = arith.mulf %402, %405 : vector<4x256xf32>
    %c2_303 = arith.constant 2 : index
    %c0_304 = arith.constant 0 : index
    %c0_305 = arith.constant 0 : index
    %407 = vector.load %arg33[%c2_303, %c0_304, %c0_305] : memref<9x4x4xf32, #tpu.memory_space<vmem>>, vector<1x4x4xf32>
    %408 = vector.shape_cast %407 : vector<1x4x4xf32> to vector<4x4xf32>
    %cst_306 = arith.constant dense<0.000000e+00> : vector<4x256xf32>
    %409 = tpu.matmul %408, %406, %cst_306 {dimension_numbers = #tpu.dot_dimension_numbers<[1], [0], [0], [1], [0, 0, 1, 1], [], []>} : vector<4x4xf32>, vector<4x256xf32>, vector<4x256xf32> -> vector<4x256xf32>
    %410 = arith.addf %401, %409 : vector<4x256xf32>
    %411 = vector.extract_strided_slice %379 {offsets = [0, 127], sizes = [4, 256], strides = [1, 1]} : vector<4x512xf32> to vector<4x256xf32>
    %c3_307 = arith.constant 3 : index
    %c0_308 = arith.constant 0 : index
    %c0_309 = arith.constant 0 : index
    %412 = vector.load %arg1[%c3_307, %c0_308, %c0_309] : memref<9x1x256xf32, #tpu.memory_space<vmem>>, vector<1x1x256xf32>
    %413 = vector.shape_cast %412 : vector<1x1x256xf32> to vector<1x256xf32>
    %414 = vector.broadcast %413 : vector<1x256xf32> to vector<4x256xf32>
    %415 = arith.mulf %411, %414 : vector<4x256xf32>
    %c3_310 = arith.constant 3 : index
    %c0_311 = arith.constant 0 : index
    %c0_312 = arith.constant 0 : index
    %416 = vector.load %arg33[%c3_310, %c0_311, %c0_312] : memref<9x4x4xf32, #tpu.memory_space<vmem>>, vector<1x4x4xf32>
    %417 = vector.shape_cast %416 : vector<1x4x4xf32> to vector<4x4xf32>
    %cst_313 = arith.constant dense<0.000000e+00> : vector<4x256xf32>
    %418 = tpu.matmul %417, %415, %cst_313 {dimension_numbers = #tpu.dot_dimension_numbers<[1], [0], [0], [1], [0, 0, 1, 1], [], []>} : vector<4x4xf32>, vector<4x256xf32>, vector<4x256xf32> -> vector<4x256xf32>
    %419 = arith.addf %410, %418 : vector<4x256xf32>
    %420 = vector.extract_strided_slice %379 {offsets = [0, 128], sizes = [4, 256], strides = [1, 1]} : vector<4x512xf32> to vector<4x256xf32>
    %c4_314 = arith.constant 4 : index
    %c0_315 = arith.constant 0 : index
    %c0_316 = arith.constant 0 : index
    %421 = vector.load %arg1[%c4_314, %c0_315, %c0_316] : memref<9x1x256xf32, #tpu.memory_space<vmem>>, vector<1x1x256xf32>
    %422 = vector.shape_cast %421 : vector<1x1x256xf32> to vector<1x256xf32>
    %423 = vector.broadcast %422 : vector<1x256xf32> to vector<4x256xf32>
    %424 = arith.mulf %420, %423 : vector<4x256xf32>
    %c4_317 = arith.constant 4 : index
    %c0_318 = arith.constant 0 : index
    %c0_319 = arith.constant 0 : index
    %425 = vector.load %arg33[%c4_317, %c0_318, %c0_319] : memref<9x4x4xf32, #tpu.memory_space<vmem>>, vector<1x4x4xf32>
    %426 = vector.shape_cast %425 : vector<1x4x4xf32> to vector<4x4xf32>
    %cst_320 = arith.constant dense<0.000000e+00> : vector<4x256xf32>
    %427 = tpu.matmul %426, %424, %cst_320 {dimension_numbers = #tpu.dot_dimension_numbers<[1], [0], [0], [1], [0, 0, 1, 1], [], []>} : vector<4x4xf32>, vector<4x256xf32>, vector<4x256xf32> -> vector<4x256xf32>
    %428 = arith.addf %419, %427 : vector<4x256xf32>
    %429 = vector.extract_strided_slice %379 {offsets = [0, 129], sizes = [4, 256], strides = [1, 1]} : vector<4x512xf32> to vector<4x256xf32>
    %c5_321 = arith.constant 5 : index
    %c0_322 = arith.constant 0 : index
    %c0_323 = arith.constant 0 : index
    %430 = vector.load %arg1[%c5_321, %c0_322, %c0_323] : memref<9x1x256xf32, #tpu.memory_space<vmem>>, vector<1x1x256xf32>
    %431 = vector.shape_cast %430 : vector<1x1x256xf32> to vector<1x256xf32>
    %432 = vector.broadcast %431 : vector<1x256xf32> to vector<4x256xf32>
    %433 = arith.mulf %429, %432 : vector<4x256xf32>
    %c5_324 = arith.constant 5 : index
    %c0_325 = arith.constant 0 : index
    %c0_326 = arith.constant 0 : index
    %434 = vector.load %arg33[%c5_324, %c0_325, %c0_326] : memref<9x4x4xf32, #tpu.memory_space<vmem>>, vector<1x4x4xf32>
    %435 = vector.shape_cast %434 : vector<1x4x4xf32> to vector<4x4xf32>
    %cst_327 = arith.constant dense<0.000000e+00> : vector<4x256xf32>
    %436 = tpu.matmul %435, %433, %cst_327 {dimension_numbers = #tpu.dot_dimension_numbers<[1], [0], [0], [1], [0, 0, 1, 1], [], []>} : vector<4x4xf32>, vector<4x256xf32>, vector<4x256xf32> -> vector<4x256xf32>
    %437 = arith.addf %428, %436 : vector<4x256xf32>
    %438 = vector.extract_strided_slice %379 {offsets = [0, 143], sizes = [4, 256], strides = [1, 1]} : vector<4x512xf32> to vector<4x256xf32>
    %c6_328 = arith.constant 6 : index
    %c0_329 = arith.constant 0 : index
    %c0_330 = arith.constant 0 : index
    %439 = vector.load %arg1[%c6_328, %c0_329, %c0_330] : memref<9x1x256xf32, #tpu.memory_space<vmem>>, vector<1x1x256xf32>
    %440 = vector.shape_cast %439 : vector<1x1x256xf32> to vector<1x256xf32>
    %441 = vector.broadcast %440 : vector<1x256xf32> to vector<4x256xf32>
    %442 = arith.mulf %438, %441 : vector<4x256xf32>
    %c6_331 = arith.constant 6 : index
    %c0_332 = arith.constant 0 : index
    %c0_333 = arith.constant 0 : index
    %443 = vector.load %arg33[%c6_331, %c0_332, %c0_333] : memref<9x4x4xf32, #tpu.memory_space<vmem>>, vector<1x4x4xf32>
    %444 = vector.shape_cast %443 : vector<1x4x4xf32> to vector<4x4xf32>
    %cst_334 = arith.constant dense<0.000000e+00> : vector<4x256xf32>
    %445 = tpu.matmul %444, %442, %cst_334 {dimension_numbers = #tpu.dot_dimension_numbers<[1], [0], [0], [1], [0, 0, 1, 1], [], []>} : vector<4x4xf32>, vector<4x256xf32>, vector<4x256xf32> -> vector<4x256xf32>
    %446 = arith.addf %437, %445 : vector<4x256xf32>
    %447 = vector.extract_strided_slice %379 {offsets = [0, 144], sizes = [4, 256], strides = [1, 1]} : vector<4x512xf32> to vector<4x256xf32>
    %c7_335 = arith.constant 7 : index
    %c0_336 = arith.constant 0 : index
    %c0_337 = arith.constant 0 : index
    %448 = vector.load %arg1[%c7_335, %c0_336, %c0_337] : memref<9x1x256xf32, #tpu.memory_space<vmem>>, vector<1x1x256xf32>
    %449 = vector.shape_cast %448 : vector<1x1x256xf32> to vector<1x256xf32>
    %450 = vector.broadcast %449 : vector<1x256xf32> to vector<4x256xf32>
    %451 = arith.mulf %447, %450 : vector<4x256xf32>
    %c7_338 = arith.constant 7 : index
    %c0_339 = arith.constant 0 : index
    %c0_340 = arith.constant 0 : index
    %452 = vector.load %arg33[%c7_338, %c0_339, %c0_340] : memref<9x4x4xf32, #tpu.memory_space<vmem>>, vector<1x4x4xf32>
    %453 = vector.shape_cast %452 : vector<1x4x4xf32> to vector<4x4xf32>
    %cst_341 = arith.constant dense<0.000000e+00> : vector<4x256xf32>
    %454 = tpu.matmul %453, %451, %cst_341 {dimension_numbers = #tpu.dot_dimension_numbers<[1], [0], [0], [1], [0, 0, 1, 1], [], []>} : vector<4x4xf32>, vector<4x256xf32>, vector<4x256xf32> -> vector<4x256xf32>
    %455 = arith.addf %446, %454 : vector<4x256xf32>
    %456 = vector.extract_strided_slice %379 {offsets = [0, 145], sizes = [4, 256], strides = [1, 1]} : vector<4x512xf32> to vector<4x256xf32>
    %c8_342 = arith.constant 8 : index
    %c0_343 = arith.constant 0 : index
    %c0_344 = arith.constant 0 : index
    %457 = vector.load %arg1[%c8_342, %c0_343, %c0_344] : memref<9x1x256xf32, #tpu.memory_space<vmem>>, vector<1x1x256xf32>
    %458 = vector.shape_cast %457 : vector<1x1x256xf32> to vector<1x256xf32>
    %459 = vector.broadcast %458 : vector<1x256xf32> to vector<4x256xf32>
    %460 = arith.mulf %456, %459 : vector<4x256xf32>
    %c8_345 = arith.constant 8 : index
    %c0_346 = arith.constant 0 : index
    %c0_347 = arith.constant 0 : index
    %461 = vector.load %arg33[%c8_345, %c0_346, %c0_347] : memref<9x4x4xf32, #tpu.memory_space<vmem>>, vector<1x4x4xf32>
    %462 = vector.shape_cast %461 : vector<1x4x4xf32> to vector<4x4xf32>
    %cst_348 = arith.constant dense<0.000000e+00> : vector<4x256xf32>
    %463 = tpu.matmul %462, %460, %cst_348 {dimension_numbers = #tpu.dot_dimension_numbers<[1], [0], [0], [1], [0, 0, 1, 1], [], []>} : vector<4x4xf32>, vector<4x256xf32>, vector<4x256xf32> -> vector<4x256xf32>
    %464 = arith.addf %455, %463 : vector<4x256xf32>
    %465 = tpu.concatenate %350, %464 in 0 : vector<4x256xf32>, vector<4x256xf32> -> vector<8x256xf32>
    %466 = arith.addf %465, %3 : vector<8x256xf32>
    %c0_349 = arith.constant 0 : index
    %c0_350 = arith.constant 0 : index
    %c0_351 = arith.constant 0 : index
    %467 = vector.load %arg35[%c0_349, %c0_350, %c0_351] : memref<1x8x256xf32, #tpu.memory_space<vmem>>, vector<1x8x256xf32>
    %468 = vector.shape_cast %467 : vector<1x8x256xf32> to vector<8x256xf32>
    %469 = vector.shape_cast %466 : vector<8x256xf32> to vector<1x8x256xf32>
    tpu.vector_store %arg35[%c0_349, %c0_350, %c0_351], %469 {strides = array<i32>} : memref<1x8x256xf32, #tpu.memory_space<vmem>>, vector<1x8x256xf32>,
    return
  }
  func.func @transform_0(%arg0: i32) -> (i32, i32, i32) {
    %c0_i32 = arith.constant 0 : i32
    %c0_i32_0 = arith.constant 0 : i32
    %c0_i32_1 = arith.constant 0 : i32
    %c0_i32_2 = arith.constant 0 : i32
    return %c0_i32, %c0_i32_0, %c0_i32_1 : i32, i32, i32
  }
  func.func @transform_1(%arg0: i32) -> (i32, i32, i32) {
    %c0_i32 = arith.constant 0 : i32
    %c0_i32_0 = arith.constant 0 : i32
    %c0_i32_1 = arith.constant 0 : i32
    return %arg0, %c0_i32, %c0_i32_0 : i32, i32, i32
  }
  func.func @transform_2(%arg0: i32) -> (i32, i32) {
    %c0_i32 = arith.constant 0 : i32
    %c0_i32_0 = arith.constant 0 : i32
    %c0_i32_1 = arith.constant 0 : i32
    return %c0_i32, %c0_i32_0 : i32, i32
  }
  func.func @transform_3(%arg0: i32) -> (i32, i32) {
    %c0_i32 = arith.constant 0 : i32
    %c0_i32_0 = arith.constant 0 : i32
    %c0_i32_1 = arith.constant 0 : i32
    return %c0_i32, %c0_i32_0 : i32, i32
  }
  func.func @transform_4(%arg0: i32) -> (i32, i32) {
    %c0_i32 = arith.constant 0 : i32
    %c0_i32_0 = arith.constant 0 : i32
    %c0_i32_1 = arith.constant 0 : i32
    return %c0_i32, %c0_i32_0 : i32, i32
  }
  func.func @transform_5(%arg0: i32) -> (i32, i32) {
    %c0_i32 = arith.constant 0 : i32
    %c0_i32_0 = arith.constant 0 : i32
    %c0_i32_1 = arith.constant 0 : i32
    return %c0_i32, %c0_i32_0 : i32, i32
  }
  func.func @transform_6(%arg0: i32) -> (i32, i32) {
    %c0_i32 = arith.constant 0 : i32
    %c0_i32_0 = arith.constant 0 : i32
    %c0_i32_1 = arith.constant 0 : i32
    return %c0_i32, %c0_i32_0 : i32, i32
  }
  func.func @transform_7(%arg0: i32) -> (i32, i32) {
    %c0_i32 = arith.constant 0 : i32
    %c0_i32_0 = arith.constant 0 : i32
    %c0_i32_1 = arith.constant 0 : i32
    return %c0_i32, %c0_i32_0 : i32, i32
  }
  func.func @transform_8(%arg0: i32) -> (i32, i32, i32) {
    %c0_i32 = arith.constant 0 : i32
    %c0_i32_0 = arith.constant 0 : i32
    %c0_i32_1 = arith.constant 0 : i32
    %c0_i32_2 = arith.constant 0 : i32
    return %c0_i32, %c0_i32_0, %c0_i32_1 : i32, i32, i32
  }
  func.func @transform_9(%arg0: i32) -> (i32, i32) {
    %c0_i32 = arith.constant 0 : i32
    %c0_i32_0 = arith.constant 0 : i32
    %c0_i32_1 = arith.constant 0 : i32
    return %c0_i32, %c0_i32_0 : i32, i32
  }
  func.func @transform_10(%arg0: i32) -> (i32, i32) {
    %c0_i32 = arith.constant 0 : i32
    %c0_i32_0 = arith.constant 0 : i32
    %c0_i32_1 = arith.constant 0 : i32
    return %c0_i32, %c0_i32_0 : i32, i32
  }
  func.func @transform_11(%arg0: i32) -> (i32, i32) {
    %c0_i32 = arith.constant 0 : i32
    %c0_i32_0 = arith.constant 0 : i32
    %c0_i32_1 = arith.constant 0 : i32
    return %c0_i32, %c0_i32_0 : i32, i32
  }
  func.func @transform_12(%arg0: i32) -> (i32, i32) {
    %c0_i32 = arith.constant 0 : i32
    %c0_i32_0 = arith.constant 0 : i32
    %c0_i32_1 = arith.constant 0 : i32
    return %c0_i32, %c0_i32_0 : i32, i32
  }
  func.func @transform_13(%arg0: i32) -> (i32, i32) {
    %c0_i32 = arith.constant 0 : i32
    %c0_i32_0 = arith.constant 0 : i32
    %c0_i32_1 = arith.constant 0 : i32
    return %c0_i32, %c0_i32_0 : i32, i32
  }
  func.func @transform_14(%arg0: i32) -> (i32, i32) {
    %c0_i32 = arith.constant 0 : i32
    %c0_i32_0 = arith.constant 0 : i32
    %c0_i32_1 = arith.constant 0 : i32
    return %c0_i32, %c0_i32_0 : i32, i32
  }
  func.func @transform_15(%arg0: i32) -> (i32, i32) {
    %c0_i32 = arith.constant 0 : i32
    %c0_i32_0 = arith.constant 0 : i32
    %c0_i32_1 = arith.constant 0 : i32
    return %c0_i32, %c0_i32_0 : i32, i32
  }
  func.func @transform_16(%arg0: i32) -> (i32, i32, i32) {
    %c0_i32 = arith.constant 0 : i32
    %c0_i32_0 = arith.constant 0 : i32
    %c0_i32_1 = arith.constant 0 : i32
    %c0_i32_2 = arith.constant 0 : i32
    return %c0_i32, %c0_i32_0, %c0_i32_1 : i32, i32, i32
  }
  func.func @transform_17(%arg0: i32) -> (i32, i32) {
    %c0_i32 = arith.constant 0 : i32
    %c0_i32_0 = arith.constant 0 : i32
    %c0_i32_1 = arith.constant 0 : i32
    return %c0_i32, %c0_i32_0 : i32, i32
  }
  func.func @transform_18(%arg0: i32) -> (i32, i32) {
    %c0_i32 = arith.constant 0 : i32
    %c0_i32_0 = arith.constant 0 : i32
    %c0_i32_1 = arith.constant 0 : i32
    return %c0_i32, %c0_i32_0 : i32, i32
  }
  func.func @transform_19(%arg0: i32) -> (i32, i32) {
    %c0_i32 = arith.constant 0 : i32
    %c0_i32_0 = arith.constant 0 : i32
    %c0_i32_1 = arith.constant 0 : i32
    return %c0_i32, %c0_i32_0 : i32, i32
  }
  func.func @transform_20(%arg0: i32) -> (i32, i32) {
    %c0_i32 = arith.constant 0 : i32
    %c0_i32_0 = arith.constant 0 : i32
    %c0_i32_1 = arith.constant 0 : i32
    return %c0_i32, %c0_i32_0 : i32, i32
  }
  func.func @transform_21(%arg0: i32) -> (i32, i32) {
    %c0_i32 = arith.constant 0 : i32
    %c0_i32_0 = arith.constant 0 : i32
    %c0_i32_1 = arith.constant 0 : i32
    return %c0_i32, %c0_i32_0 : i32, i32
  }
  func.func @transform_22(%arg0: i32) -> (i32, i32) {
    %c0_i32 = arith.constant 0 : i32
    %c0_i32_0 = arith.constant 0 : i32
    %c0_i32_1 = arith.constant 0 : i32
    return %c0_i32, %c0_i32_0 : i32, i32
  }
  func.func @transform_23(%arg0: i32) -> (i32, i32) {
    %c0_i32 = arith.constant 0 : i32
    %c0_i32_0 = arith.constant 0 : i32
    %c0_i32_1 = arith.constant 0 : i32
    return %c0_i32, %c0_i32_0 : i32, i32
  }
  func.func @transform_24(%arg0: i32) -> (i32, i32, i32) {
    %c0_i32 = arith.constant 0 : i32
    %c0_i32_0 = arith.constant 0 : i32
    %c0_i32_1 = arith.constant 0 : i32
    %c0_i32_2 = arith.constant 0 : i32
    return %c0_i32, %c0_i32_0, %c0_i32_1 : i32, i32, i32
  }
  func.func @transform_25(%arg0: i32) -> (i32, i32) {
    %c0_i32 = arith.constant 0 : i32
    %c0_i32_0 = arith.constant 0 : i32
    %c0_i32_1 = arith.constant 0 : i32
    return %c0_i32, %c0_i32_0 : i32, i32
  }
  func.func @transform_26(%arg0: i32) -> (i32, i32) {
    %c0_i32 = arith.constant 0 : i32
    %c0_i32_0 = arith.constant 0 : i32
    %c0_i32_1 = arith.constant 0 : i32
    return %c0_i32, %c0_i32_0 : i32, i32
  }
  func.func @transform_27(%arg0: i32) -> (i32, i32) {
    %c0_i32 = arith.constant 0 : i32
    %c0_i32_0 = arith.constant 0 : i32
    %c0_i32_1 = arith.constant 0 : i32
    return %c0_i32, %c0_i32_0 : i32, i32
  }
  func.func @transform_28(%arg0: i32) -> (i32, i32) {
    %c0_i32 = arith.constant 0 : i32
    %c0_i32_0 = arith.constant 0 : i32
    %c0_i32_1 = arith.constant 0 : i32
    return %c0_i32, %c0_i32_0 : i32, i32
  }
  func.func @transform_29(%arg0: i32) -> (i32, i32) {
    %c0_i32 = arith.constant 0 : i32
    %c0_i32_0 = arith.constant 0 : i32
    %c0_i32_1 = arith.constant 0 : i32
    return %c0_i32, %c0_i32_0 : i32, i32
  }
  func.func @transform_30(%arg0: i32) -> (i32, i32) {
    %c0_i32 = arith.constant 0 : i32
    %c0_i32_0 = arith.constant 0 : i32
    %c0_i32_1 = arith.constant 0 : i32
    return %c0_i32, %c0_i32_0 : i32, i32
  }
  func.func @transform_31(%arg0: i32) -> (i32, i32) {
    %c0_i32 = arith.constant 0 : i32
    %c0_i32_0 = arith.constant 0 : i32
    %c0_i32_1 = arith.constant 0 : i32
    return %c0_i32, %c0_i32_0 : i32, i32
  }
  func.func @transform_32(%arg0: i32) -> (i32, i32, i32) {
    %c0_i32 = arith.constant 0 : i32
    %c0_i32_0 = arith.constant 0 : i32
    %c0_i32_1 = arith.constant 0 : i32
    %c0_i32_2 = arith.constant 0 : i32
    return %c0_i32, %c0_i32_0, %c0_i32_1 : i32, i32, i32
  }
  func.func @transform_33(%arg0: i32) -> (i32, i32) {
    %c0_i32 = arith.constant 0 : i32
    %c0_i32_0 = arith.constant 0 : i32
    %c0_i32_1 = arith.constant 0 : i32
    return %c0_i32, %c0_i32_0 : i32, i32
  }
  func.func @transform_34(%arg0: i32) -> (i32, i32, i32) {
    %c0_i32 = arith.constant 0 : i32
    %c0_i32_0 = arith.constant 0 : i32
    %c0_i32_1 = arith.constant 0 : i32
    return %arg0, %c0_i32, %c0_i32_0 : i32, i32, i32
  }
}

</mosaic_0001>

<bundles_post_ra>
// kernel: tpu_custom_call.1
= control target key start
LH: loop header
LB: loop body
LE: loop exit
PB: predicated region body
PF: predicated region fallthrough
CT: control target
= control target key end

     0   :  { %s6734_s6 = smov 1   ;;  %s6735_s10 = smov 2   ;;  %s7723_s0 = inlined_call_operand.smem [shape: u32[35], index: -1, kind: input, shape index: {}] }
   0x1   :  { %s6787_s5 = sld [smem:[%s7723_s0]]   ;;  %s6736_s14 = smov 3  }
   0x2   :  { %s6792_s9 = sld [smem:[%s7723_s0 + %s6734_s6]]   ;;  %s6737_s18 = smov 4  }
   0x3   :  { %s6797_s13 = sld [smem:[%s7723_s0 + %s6735_s10]]   ;;  %s6738_s22 = smov 5  }
   0x4   :  { %s6802_s17 = sld [smem:[%s7723_s0 + %s6736_s14]]   ;;  %s6739_s26 = smov 6  }
   0x5   :  { %s6807_s21 = sld [smem:[%s7723_s0 + %s6737_s18]]   ;;  %s6740_s30 = smov 7  }
   0x6   :  { %s6812_s25 = sld [smem:[%s7723_s0 + %s6738_s22]]   ;;  %s6741_s4 = smov 8  }
   0x7   :  { %s6817_s29 = sld [smem:[%s7723_s0 + %s6739_s26]]   ;;  %s6742_s10 = smov 9  }
   0x8   :  { %7743 = sst [smem:[#allocation6_spill]] %s6792_s9  ;;  %s6743_s15 = smov 10  }
   0x9   :  { %7744 = sst [smem:[#allocation7_spill]] %s6797_s13  ;;  %s6744_s20 = smov 11  }
   0xa   :  { %7745 = sst [smem:[#allocation8_spill]] %s6802_s17  ;;  %s6745_s26 = smov 12  }
   0xb   :  { %7746 = sst [smem:[#allocation9_spill]] %s6807_s21  ;;  %s6746_s1 = smov 13  }
   0xc   :  { %s6822_s3 = sld [smem:[%s7723_s0 + %s6740_s30]]   ;;  %s6747_s7 = smov 14  }
   0xd   :  { %s6827_s8 = sld [smem:[%s7723_s0 + %s6741_s4]]   ;;  %s6749_s22 = smov 16  }
   0xe   :  { %s6832_s14 = sld [smem:[%s7723_s0 + %s6742_s10]]   ;;  %s6750_s28 = smov 17  }
   0xf   :  { %s6837_s19 = sld [smem:[%s7723_s0 + %s6743_s15]]   ;;  %s6748_s15 = smov 15  }
  0x10   :  { %s6842_s24 = sld [smem:[%s7723_s0 + %s6744_s20]]  }
  0x11   :  { %s6847_s30 = sld [smem:[%s7723_s0 + %s6745_s26]]  }
  0x12   :  { %7747 = sst [smem:[#allocation10_spill]] %s6822_s3 }
  0x13   :  { %7748 = sst [smem:[#allocation11_spill]] %s6827_s8 }
  0x14   :  { %7749 = sst [smem:[#allocation12_spill]] %s6832_s14 }
  0x15   :  { %7750 = sst [smem:[#allocation13_spill]] %s6837_s19 }
  0x16   :  { %s6852_s6 = sld [smem:[%s7723_s0 + %s6746_s1]]  }
  0x17   :  { %s6857_s12 = sld [smem:[%s7723_s0 + %s6747_s7]]   ;;  %s6751_s7 = smov 18  }
  0x18   :  { %s6862_s20 = sld [smem:[%s7723_s0 + %s6748_s15]]   ;;  %s6752_s15 = smov 19  }
  0x19   :  { %s6867_s27 = sld [smem:[%s7723_s0 + %s6749_s22]]   ;;  %s6753_s22 = smov 20  }
  0x1a   :  { %s6872_s4 = sld [smem:[%s7723_s0 + %s6750_s28]]   ;;  %s6754_s28 = smov 21  }
  0x1b   :  { %s6877_s8 = sld [smem:[%s7723_s0 + %s6751_s7]]   ;;  %s6755_s7 = smov 22  }
  0x1c   :  { %7751 = sst [smem:[#allocation14_spill]] %s6852_s6 }
  0x1d   :  { %7752 = sst [smem:[#allocation15_spill]] %s6857_s12 }
  0x1e   :  { %7753 = sst [smem:[#allocation16_spill]] %s6862_s20 }
  0x1f   :  { %7754 = sst [smem:[#allocation17_spill]] %s6867_s27 }
  0x20   :  { %7755 = sst [smem:[#allocation18_spill]] %s6872_s4 }
  0x21   :  { %7756 = sst [smem:[#allocation19_spill]] %s6877_s8 }
  0x22   :  { %s6882_s14 = sld [smem:[%s7723_s0 + %s6752_s15]]   ;;  %s6756_s15 = smov 23  }
  0x23   :  { %s6887_s27 = sld [smem:[%s7723_s0 + %s6753_s22]]   ;;  %s6757_s22 = smov 24  }
  0x24   :  { %s6892_s4 = sld [smem:[%s7723_s0 + %s6754_s28]]   ;;  %s6758_s28 = smov 25  }
  0x25   :  { %s6897_s8 = sld [smem:[%s7723_s0 + %s6755_s7]]   ;;  %s6759_s7 = smov 26  }
  0x28   :  { %7757 = sst [smem:[#allocation20_spill]] %s6882_s14 }
  0x29   :  { %7758 = sst [smem:[#allocation21_spill]] %s6887_s27 }
  0x2a   :  { %7759 = sst [smem:[#allocation22_spill]] %s6892_s4 }
  0x2b   :  { %7760 = sst [smem:[#allocation23_spill]] %s6897_s8 }
  0x2c   :  { %s6902_s14 = sld [smem:[%s7723_s0 + %s6756_s15]]   ;;  %s6760_s15 = smov 27  }
  0x2d   :  { %s6907_s27 = sld [smem:[%s7723_s0 + %s6757_s22]]   ;;  %s6761_s22 = smov 28  }
  0x2e   :  { %s6912_s4 = sld [smem:[%s7723_s0 + %s6758_s28]]   ;;  %s6762_s28 = smov 29  }
  0x2f   :  { %s6917_s8 = sld [smem:[%s7723_s0 + %s6759_s7]]   ;;  %s6763_s7 = smov 30  }
  0x32   :  { %7761 = sst [smem:[#allocation24_spill]] %s6902_s14 }
  0x33   :  { %7762 = sst [smem:[#allocation25_spill]] %s6907_s27 }
  0x34   :  { %7763 = sst [smem:[#allocation26_spill]] %s6912_s4 }
  0x35   :  { %7764 = sst [smem:[#allocation27_spill]] %s6917_s8 }
  0x36   :  { %s6922_s14 = sld [smem:[%s7723_s0 + %s6760_s15]]   ;;  %s6764_s15 = smov 31  }
  0x37   :  { %s6927_s27 = sld [smem:[%s7723_s0 + %s6761_s22]]   ;;  %s6765_s22 = smov 32  }
  0x38   :  { %s6932_s4 = sld [smem:[%s7723_s0 + %s6762_s28]]   ;;  %s6766_s28 = smov 33  }
  0x39   :  { %s6937_s8 = sld [smem:[%s7723_s0 + %s6763_s7]]   ;;  %s6767_s7 = smov 34  }
  0x3c   :  { %7765 = sst [smem:[#allocation28_spill]] %s6922_s14 }
  0x3d   :  { %7766 = sst [smem:[#allocation29_spill]] %s6927_s27 }
  0x3e   :  { %7767 = sst [smem:[#allocation30_spill]] %s6932_s4 }
  0x3f   :  { %7768 = sst [smem:[#allocation31_spill]] %s6937_s8 }
  0x40   :  { %s6942_s14 = sld [smem:[%s7723_s0 + %s6764_s15]]  }
  0x41   :  { %s6947_s27 = sld [smem:[%s7723_s0 + %s6765_s22]]  }
  0x42   :  { %s6952_s4 = sld [smem:[%s7723_s0 + %s6766_s28]]  }
  0x43   :  { %s6957_s8 = sld [smem:[%s7723_s0 + %s6767_s7]]  }
  0x44   :  { %74 = vsyncpa [#allocation4], 0 }
  0x45   :  { %76 = vsyncpa [#allocation4 + $0x1], 0  ;;  %s6959_s15 = smov 0   ;;  %s6961_s16 = smov 0  }
  0x46   :  { %s6963_s18 = smov 0   ;;  %s6965_s22 = smov 0  }
  0x47 LB: > { %s6980_s0 = sadd.s32 4294967295, %s6732_s22   ;;  %s6257_s23 = sadd.s32 4294967294, %s6732_s22   ;;  %s6732_s22 = sphi %s6965_s22, %s7808_s22   ;;  %s6728_s18 = sphi %s6963_s18, %s7807_s18   ;;  %s6724_s16 = sphi %s6961_s16, %s7806_s16   ;;  %s6720_s15 = sphi %s6959_s15, %s7805_s15  }
  0x48   : > { %s6984_s26 = sadd.s32 1, %s6732_s22   ;;  %s808_s28 = sadd.s32 1, %s6728_s18 }
  0x49   : > { %s805_s1 = ssub.s32 %s6732_s22, %s6984_s26  ;;  %p818_p0 = scmp.ne.s32.totalorder %s6728_s18, %s6724_s16 }
  0x4a   : > { %p806_p1 = scmp.eq.s32.totalorder %s805_s1, 0  ;;  %p819_p2 = scmp.eq.s32.totalorder %s6980_s0, 1 }
  0x4b   : > { %p824_p3 = scmp.ne.s32.totalorder %s6724_s16, %s6720_s15  ;;  %p825_p4 = scmp.eq.s32.totalorder %s6257_s23, 1 }
  0x4c   : > { %s6995_s2 = scalar_select %p806_p1, %s6728_s18, %s808_s28  }
  0x4d   : > { %p6997_p5 = por %p819_p2, %p818_p0  ;;  %p7001_p6 = por %p825_p4, %p824_p3 }
  0x4e   : > { %p6260_p7 = scmp.ge.s32.totalorder %s6732_s22, 1  ;;  %p950_p8 = scmp.lt.s32.totalorder %s6732_s22, 3 }
  0x50   : > { %p951_p9 = pnand %p6260_p7, %p950_p8 }
  0x51   : > { %s7771_s17 = sld [smem:[#allocation8_spill]] (!%p951_p9)  ;;  %s7772_s9 = sld [smem:[#allocation6_spill]] (!%p951_p9)  ;;  %v6768_v0 = vmov (!%p951_p9), 0.0   ;;  %v6769_v2 = vmov (!%p951_p9), 0   ;;  %vm1060_vm0 = vcmask (!%p951_p9), 1043456   ;;  %vm1056_vm1 = vcmask (!%p951_p9), 31744  }
  0x52   : > { %954 = sbr.rel (%p951_p9) target bundleno = 1912 (0x778), region = 156  ;;  %p1036_p10 = scmp.lt.s32.totalorder (!%p951_p9), %s6980_s0, 1  ;;  %2404 = vmatprep.mubr.f32.mxu0 (!%p951_p9), %v6768_v0  ;;  %1041 = vst [vmem:[#allocation2] sm:$0xff] (!%p951_p9), %v6768_v0  ;;  %1042 = vst [vmem:[#allocation2 + $0x8] sm:$0xff] (!%p951_p9), %v6768_v0  ;;  %1129 = vmatprep.mubr.f32.mxu1 (!%p951_p9), %v6768_v0  ;;  %v2327_v3 = vld [vmem:[%s6842_s24] sm:$0x3] (!%p951_p9)  ;;  %v1338_v12 = vlaneseq (!%p951_p9) }
  0x53   : > { %s7773_s19 = sld [smem:[#allocation13_spill]] (!%p951_p9)  ;;  %6634 = vset.pattern.permute.xlu0 (!%p951_p9), %v6769_v2  ;;  %s7774_s13 = sld [smem:[#allocation7_spill]] (!%p951_p9)  ;;  %6635 = vset.pattern.permute.xlu1 (!%p951_p9), %v6769_v2  ;;  %v1139_v11 = vld [vmem:[%s6812_s25] sm:$0xf] (!%p951_p9)  ;;  %v6333_v28 = vld [vmem:[%s6787_s5 + $0x4] sm:$0x3] (!%p951_p9) }
  0x54   : > { %s7775_s3 = sld [smem:[#allocation10_spill]] (!%p951_p9)  ;;  %s7776_s6 = sld [smem:[#allocation14_spill]] (!%p951_p9)  ;;  %1142 = vperm.xlu1 (!%p951_p9), %6635, %v1139_v11   ;;  %v1339_v14 = vshrl.u32 (!%p951_p9), %v1338_v12, 7  ;;  %v1336_v15 = vld [vmem:[%s6787_s5] sm:$0x3] (!%p951_p9)  ;;  %vm1149_vm2 = vcmask (!%p951_p9), 1041408  }
  0x55   : > { %s7777_s20 = sld [smem:[#allocation16_spill]] (!%p951_p9)  ;;  %v2621_v18 = vld [vmem:[%s6787_s5] sm:$0x3] (!%p951_p9)  ;;  %v6276_v19 = vld [vmem:[%s6787_s5 + $0x2] sm:$0x3] (!%p951_p9)  ;;  %s7727_s1 = smov (!%p951_p9), 111  }
  0x56   : > { %v7042_v16 = vsub.s32 (!%p951_p9), 0, %v1339_v14  ;;  %v7044_v17 = vsub.s32 (!%p951_p9), 1, %v1339_v14  ;;  %v6328_v23 = vld [vmem:[%s6787_s5 + $0x2] sm:$0x3] (!%p951_p9)  ;;  %v6281_v33 = vld [vmem:[%s6787_s5 + $0x4] sm:$0x3] (!%p951_p9) }
  0x57   : > { %v1046_v1 = vld [vmem:[%s7771_s17] sm:$0x3] (!%p951_p9)  ;;  %v6338_v37 = vld [vmem:[%s6787_s5 + $0x6] sm:$0x3] (!%p951_p9)  ;;  %s7778_s21 = sld [smem:[#allocation9_spill]] (!%p951_p9)  ;;  %s7779_s12 = sld [smem:[#allocation15_spill]] (!%p951_p9) }
  0x58   : > { %1049 = vperm.xlu0 (!%p951_p9), %6634, %v1046_v1   ;;  %v1341_v21 = vrot.slane (!%p951_p9), %v1336_v15, %v7042_v16  ;;  %v1345_v22 = vrot.slane (!%p951_p9), %v1336_v15, %v7044_v17  ;;  %v2626_v24 = vrot.slane (!%p951_p9), %v2621_v18, %v7042_v16  ;;  %v2630_v25 = vrot.slane (!%p951_p9), %v2621_v18, %v7044_v17  ;;  %v6286_v41 = vld [vmem:[%s6787_s5 + $0x6] sm:$0x3] (!%p951_p9)  ;;  %v2413_v62 = vld [vmem:[%s6847_s30] sm:$0xf] (!%p951_p9)  ;;  %s7788_s17 = sld [smem:[#allocation30_spill]] (!%p951_p9) }
  0x59   : > { %s1037_s11 = scalar_select %p1036_p10, %s6980_s0, 1  ;;  %v2326_v6 = vld [vmem:[%s7773_s19] sm:$0x3]  ;;  %v1455_v26 = vrot.slane %v6276_v19, %v7042_v16  ;;  %v1459_v27 = vrot.slane %v6276_v19, %v7044_v17  ;;  %v2737_v31 = vrot.slane %v6328_v23, %v7042_v16  ;;  %v2741_v32 = vrot.slane %v6328_v23, %v7044_v17 }
  0x5a   : > { %v1045_v9 = vld [vmem:[%s7774_s13] sm:$0x3]  ;;  %v1346_v29 = vcombine.low %v1341_v21, %v1345_v22  ;;  %v2631_v30 = vcombine.low %v2626_v24, %v2630_v25  ;;  %v2849_v35 = vrot.slane %v6333_v28, %v7042_v16  ;;  %v2853_v36 = vrot.slane %v6333_v28, %v7044_v17  ;;  %s7787_s13 = sld [smem:[#allocation22_spill]]  ;;  %s7789_s19 = smov 111  }
  0x5b   : > { %s6477_s23 = sshll.u32 %s1037_s11, 4  ;;  %v1228_v10 = vld [vmem:[%s7775_s3] sm:$0xf]  ;;  %v2742_v34 = vcombine.low %v2737_v31, %v2741_v32  ;;  %v1460_v38 = vcombine.low %v1455_v26, %v1459_v27  ;;  %v1570_v39 = vrot.slane %v6281_v33, %v7042_v16  ;;  %v1574_v40 = vrot.slane %v6281_v33, %v7044_v17  ;;  %s7729_s11 = smov 112  }
  0x5c   : > { %s7016_s28 = scalar_lea.vmem %s7772_s9, %s6477_s23  ;;  %2330 = vperm.xlu0 %6634, %v2327_v3   ;;  %v2414_v13 = vld [vmem:[%s7776_s6] sm:$0xf]  ;;  %v2854_v42 = vcombine.low %v2849_v35, %v2853_v36  ;;  %v2961_v43 = vrot.slane %v6338_v37, %v7042_v16  ;;  %v2965_v44 = vrot.slane %v6338_v37, %v7044_v17  ;;  %v1685_v46 = vrot.slane %v6286_v41, %v7042_v16  ;;  %s7731_s23 = smov 113  }
  0x5d   : > { %v7019_v4 = vld [vmem:[%s7016_s28 + $0x8] sm:$0xff]  ;;  %v7022_v5 = vld [vmem:[%s7016_s28] sm:$0xff]  ;;  %2417 = vperm.xlu1 %6635, %v2414_v13   ;;  %v1575_v45 = vcombine.low %v1570_v39, %v1574_v40  ;;  %v1689_v47 = vrot.slane %v6286_v41, %v7044_v17  ;;  %vm1145_vm3 = vcmask 15360   ;;  %vm1350_vm4 = vcmask 908288   ;;  %s7782_s3 = sld [smem:[#allocation12_spill]]  ;;  %s7783_s6 = smov 113  }
  0x5e   : > { %6316 = vmatprep.subr.msk.mxu0 %vm1060_vm0, %v7019_v4  ;;  %v1055_v7 = vrot.slane %v7019_v4, 4  ;;  %v1054_v8 = vrot.slane %v7022_v5, 4  ;;  %v2501_v20 = vld [vmem:[%s7777_s20] sm:$0xf]  ;;  %v2966_v48 = vcombine.low %v2961_v43, %v2965_v44  ;;  %vm1464_vm5 = vcmask 916480   ;;  %s7785_s9 = sld [smem:[#allocation28_spill]] }
  0x5f   : > { %6317 = vmatpush1.msk.msra.mxu0 %vm1060_vm0, %v7022_v5  ;;  %v1690_v49 = vcombine.low %v1685_v46, %v1689_v47  ;;  %v1138_v2 = vld [vmem:[%s7778_s21] sm:$0xf]  ;;  %vm1579_vm6 = vcmask 924672   ;;  %vm1694_vm7 = vcmask 1039360   ;;  %s7790_s20 = sld [smem:[#allocation24_spill]]  ;;  %s7791_s21 = sld [smem:[#allocation11_spill]] }
  0x60   : > { %6264 = vmatprep.subr.msk.mxu1 %vm1060_vm0, %v1055_v7  ;;  %6318 = vmatmul.mubr.msk.f32.vlgmr.msra.gmra.mrb[0].mxu0 %vm1056_vm1, %v2326_v6  ;;  %v2500_v3 = vld [vmem:[%s7779_s12] sm:$0xf]  ;;  %s7786_s12 = smov 112   ;;  %vm1366_vm8 = vcmask 138240   ;;  %vm1481_vm9 = vcmask 130048   ;;  %vm1596_vm10 = vcmask 121856  }
  0x61   : > { %6265 = vmatpush1.msk.msra.mxu1 %vm1060_vm0, %v1054_v8  ;;  %2493 = vmatprep.mubr.f32.mxu0 %v6768_v0  ;;  %v1227_v6 = vld [vmem:[%s6817_s29] sm:$0xf]  ;;  %vm1711_vm11 = vcmask 7168  }
  0x62   : > { %6266 = vmatmul.mubr.msk.f32.vlgmr.msra.gmra.mrb[0].mxu1 %vm1056_vm1, %v1045_v9  ;;  %1231 = vperm.xlu0 %6634, %v1228_v10  }
  0x63   : > { %1220 = vmatprep.mubr.f32.mxu1 %v6768_v0  ;;  %2504 = vperm.xlu1 %6635, %v2501_v20  }
  0x66   : > { %2632 = vrot.lane.b32.xlu0 %v2631_v30, %s7727_s1 }
  0x67   : > { %1347 = vrot.lane.b32.xlu1 %v1346_v29, %s7727_s1  ;;  %s7733_s1 = smov 127  }
  0x6a   : > { %2743 = vrot.lane.b32.xlu0 %v2742_v34, %s7729_s11 }
  0x6b   : > { %1461 = vrot.lane.b32.xlu1 %v1460_v38, %s7729_s11  ;;  %s7739_s11 = smov 17  }
  0x6e   : > { %2855 = vrot.lane.b32.xlu0 %v2854_v42, %s7731_s23 }
  0x6f   : > { %1576 = vrot.lane.b32.xlu1 %v1575_v45, %s7731_s23  ;;  %s7735_s23 = smov 16  }
  0x72   : > { %2967 = vrot.lane.b32.xlu0 %v2966_v48, %s7733_s1 }
  0x73   : > { %1691 = vrot.lane.b32.xlu1 %v1690_v49, %s7733_s1  ;;  %s7737_s1 = smov 15  }
  0xd3   : > { %v1143_v7 = vpop.permute.xlu1 %1142 }
  0xd7   : > { %v1050_v50 = vpop.permute.xlu0 %1049 }
  0xdb   : > { %v2331_v51 = vpop.permute.xlu0 %2330 }
  0xdc   : > { %v2418_v8 = vpop.permute.xlu1 %2417 }
  0xe1   : > { %v1232_v46 = vpop.permute.xlu0 %1231 }
  0xe2   : > { %v2505_v39 = vpop.permute.xlu1 %2504 }
 0x133   : > { %v2406_v52 = vpop.f32.mrb[0].mxu0 }
 0x134   : > { %v2407_v53 = vadd.f32 %v2406_v52, %v2331_v51  ;;  %v2408_v54 = vpop.f32.mrb[1].mxu0 }
 0x135   : > { %v2409_v55 = vadd.f32 %v2408_v54, %v2331_v51  ;;  %v1131_v56 = vpop.f32.mrb[0].mxu1 }
 0x136   : > { %v2411_v57 = vmax.f32 %v2407_v53, 0.0  ;;  %v1132_v58 = vadd.f32 %v1131_v56, %v1050_v50  ;;  %v1133_v59 = vpop.f32.mrb[1].mxu1 }
 0x137   : > { %v2412_v60 = vmax.f32 %v2409_v55, 0.0  ;;  %v1134_v61 = vadd.f32 %v1133_v59, %v1050_v50 }
 0x138   : > { %v1136_v1 = vmax.f32 %v1132_v58, 0.0 }
 0x139   : > { %v1137_v63 = vmax.f32 %v1134_v61, 0.0  ;;  %6319 = vmatprep.subr.msk.mxu0 %vm1149_vm2, %v2412_v60 }
 0x13a   : > { %6320 = vmatpush1.msk.msra.mxu0 %vm1149_vm2, %v2411_v57 }
 0x13b   : > { %6267 = vmatprep.subr.msk.mxu1 %vm1149_vm2, %v1137_v63  ;;  %6321 = vmatmul.mubr.msk.f32.vlgmr.msra.gmra.mrb[2].mxu0 %vm1145_vm3, %v2413_v62 }
 0x13c   : > { %6322 = vmatprep.subr.msk.mxu0 %vm1149_vm2, %v2412_v60  ;;  %6268 = vmatpush1.msk.msra.mxu1 %vm1149_vm2, %v1136_v1 }
 0x13d   : > { %6323 = vmatpush1.msk.msra.mxu0 %vm1149_vm2, %v2411_v57  ;;  %6269 = vmatmul.mubr.msk.f32.vlgmr.msra.gmra.mrb[2].mxu1 %vm1145_vm3, %v1138_v2 }
 0x13e   : > { %6270 = vmatprep.subr.msk.mxu1 %vm1149_vm2, %v1137_v63  ;;  %2574 = vmatprep.mubr.f32.mxu0 %v6768_v0  ;;  %v1348_v63 = vpop.permute.xlu1 %1347 }
 0x13f   : > { %6271 = vmatpush1.msk.msra.mxu1 %vm1149_vm2, %v1136_v1  ;;  %6324 = vmatmul.mubr.msk.f32.vlgmr.msra.gmra.mrb[4].mxu0 %vm1145_vm3, %v2500_v3  ;;  %v1349_v1 = vrot.slane %v1348_v63, 4 }
 0x140   : > { %1301 = vmatprep.mubr.f32.mxu1 %v6768_v0  ;;  %2723 = vmatprep.mubr.f32.mxu0 %v6768_v0 }
 0x141   : > { %6272 = vmatmul.mubr.msk.f32.vlgmr.msra.gmra.mrb[4].mxu1 %vm1145_vm3, %v1227_v6  ;;  %v1351_v3 = vsel %vm1350_vm4, %v1349_v1, %v1348_v63  ;;  %v2633_v6 = vpop.permute.xlu0 %2632 }
 0x142   : > { %1440 = vmatprep.mubr.f32.mxu1 %v6768_v0  ;;  %v1462_v2 = vpop.permute.xlu1 %1461 }
 0x20e   : > { %v2495_v9 = vpop.f32.mrb[2].mxu0 }
 0x20f   : > { %v2496_v10 = vadd.f32 %v2495_v9, %v2418_v8  ;;  %v2497_v11 = vpop.f32.mrb[3].mxu0 }
 0x210   : > { %v2498_v12 = vadd.f32 %v2497_v11, %v2418_v8  ;;  %v1222_v13 = vpop.f32.mrb[2].mxu1  ;;  %v2634_v11 = vrot.slane %v2633_v6, 4 }
 0x211   : > { %v2581_v14 = vsub.f32 0.0, %v2496_v10  ;;  %v1223_v15 = vadd.f32 %v1222_v13, %v1143_v7  ;;  %v1224_v18 = vpop.f32.mrb[3].mxu1 }
 0x212   : > { %v2582_v19 = vsub.f32 0.0, %v2498_v12  ;;  %v1225_v20 = vadd.f32 %v1224_v18, %v1143_v7  ;;  %v2576_v21 = vpop.f32.mrb[4].mxu0  ;;  %v2744_v12 = vpop.permute.xlu0 %2743  ;;  %v2635_v18 = vsel %vm1350_vm4, %v2634_v11, %v2633_v6 }
 0x213   : > { %v2583_v22 = vmul.f32 1.442695, %v2581_v14  ;;  %v1308_v23 = vsub.f32 0.0, %v1223_v15  ;;  %v2578_v24 = vpop.f32.mrb[5].mxu0  ;;  %v2577_v40 = vadd.f32 %v2576_v21, %v2505_v39  ;;  %v2745_v15 = vrot.slane %v2744_v12, 4 }
 0x214   : > { %v2585_v25 = vmul.f32 1.442695, %v2582_v19  ;;  %v1309_v26 = vsub.f32 0.0, %v1225_v20  ;;  %v1303_v27 = vpop.f32.mrb[4].mxu1  ;;  %v2579_v42 = vadd.f32 %v2578_v24, %v2505_v39 }
 0x215   : > { %6636 = vpow2.f32 %v2583_v22  ;;  %v1310_v28 = vmul.f32 1.442695, %v1308_v23  ;;  %v1305_v29 = vpop.f32.mrb[5].mxu1  ;;  %v2601_v50 = vrot.slane %v2577_v40, 4  ;;  %v1304_v51 = vadd.f32 %v1303_v27, %v1232_v46 }
 0x216   : > { %6638 = vpow2.f32 %v2585_v25  ;;  %v1312_v30 = vmul.f32 1.442695, %v1309_v26  ;;  %v2602_v54 = vrot.slane %v2579_v42, 4  ;;  %v1306_v55 = vadd.f32 %v1305_v29, %v1232_v46  ;;  %v2856_v23 = vpop.permute.xlu0 %2855 }
 0x217   : > { %6640 = vpow2.f32 %v1310_v28  ;;  %v2746_v22 = vsel %vm1464_vm5, %v2745_v15, %v2744_v12  ;;  %v2857_v26 = vrot.slane %v2856_v23, 4  ;;  %v1577_v28 = vpop.permute.xlu1 %1576 }
 0x218   : > { %6642 = vpow2.f32 %v1312_v30 }
 0x21a   : > { %v2968_v40 = vpop.permute.xlu0 %2967 }
 0x21b   : > { %v1692_v39 = vpop.permute.xlu1 %1691 }
 0x21f   : > { %v6637_v31 = vpop.eup %6636 }
 0x220   : > { %v6639_v32 = vpop.eup %6638  ;;  %v2587_v33 = vadd.f32 1.0, %v6637_v31  ;;  %v1578_v31 = vrot.slane %v1577_v28, 4 }
 0x221   : > { %v6641_v34 = vpop.eup %6640  ;;  %v2588_v35 = vadd.f32 1.0, %v6639_v32  ;;  %v2858_v32 = vsel %vm1579_vm6, %v2857_v26, %v2856_v23 }
 0x222   : > { %v6643_v36 = vpop.eup %6642  ;;  %6644 = vrcp.f32 %v2587_v33  ;;  %v1314_v37 = vadd.f32 1.0, %v6641_v34 }
 0x223   : > { %6646 = vrcp.f32 %v2588_v35  ;;  %v1315_v38 = vadd.f32 1.0, %v6643_v36  ;;  %v1580_v35 = vsel %vm1579_vm6, %v1578_v31, %v1577_v28 }
 0x224   : > { %6648 = vrcp.f32 %v1314_v37 }
 0x225   : > { %6650 = vrcp.f32 %v1315_v38 }
 0x22c   : > { %v6645_v41 = vpop.eup %6644 }
 0x22d   : > { %v6647_v43 = vpop.eup %6646  ;;  %v2593_v44 = vrot.slane %v6645_v41, 4 }
 0x22e   : > { %v6649_v45 = vpop.eup %6648  ;;  %v2594_v47 = vrot.slane %v6647_v43, 4  ;;  %v1693_v43 = vrot.slane %v1692_v39, 4 }
 0x22f   : > { %v6651_v48 = vpop.eup %6650  ;;  %v2597_v49 = vmul.f32 %v2593_v44, %v7022_v5  ;;  %v1318_v52 = vmul.f32 %v6649_v45, %v7022_v5  ;;  %v1463_v5 = vrot.slane %v1462_v2, 4  ;;  %v2969_v44 = vrot.slane %v2968_v40, 4 }
 0x230   : > { %v2598_v53 = vmul.f32 %v2594_v47, %v7019_v4  ;;  %v1319_v56 = vmul.f32 %v6651_v48, %v7019_v4  ;;  %v1695_v46 = vsel %vm1694_vm7, %v1693_v43, %v1692_v39  ;;  %v6291_v39 = vld [vmem:[%s6787_s5 + $0x8] sm:$0x3] }
 0x231   : > { %v2605_v57 = vadd.f32 %v2601_v50, %v2597_v49  ;;  %v1320_v58 = vadd.f32 %v1318_v52, %v1304_v51  ;;  %v1465_v10 = vsel %vm1464_vm5, %v1463_v5, %v1462_v2  ;;  %v2970_v47 = vsel %vm1694_vm7, %v2969_v44, %v2968_v40 }
 0x232   : > { %v2606_v59 = vadd.f32 %v2602_v54, %v2598_v53  ;;  %v1321_v60 = vadd.f32 %v1319_v56, %v1306_v55  ;;  %v1329_v55 = vld [vmem:[%s7782_s3] sm:$0xf]  ;;  %s7795_s3 = sld [smem:[#allocation29_spill]] }
 0x234   : > { %v2609_v61 = vcombine.high %v2605_v57, %v2606_v59  ;;  %v1324_v62 = vcombine.low %v1320_v58, %v1321_v60  ;;  %v4869_v57 = vld [vmem:[%s7785_s9] sm:$0x3]  ;;  %s7792_s9 = sld [smem:[#allocation17_spill]] }
 0x235   : > { %v3699_v58 = vld [vmem:[%s7787_s13] sm:$0xf]  ;;  %s7793_s13 = sld [smem:[#allocation27_spill]] }
 0x236   : > { %1326 = vst [vmem:[#allocation2 + $0x4] sm:$0xff] %v1324_v62  ;;  %v4956_v59 = vld [vmem:[%s7788_s17] sm:$0xf]  ;;  %s7794_s17 = sld [smem:[#allocation19_spill]] }
 0x237   : > { %v3786_v60 = vld [vmem:[%s7790_s20] sm:$0xf]  ;;  %s7796_s20 = sld [smem:[#allocation21_spill]] }
 0x23d   : > { %v7103_v7 = vld [vmem:[#allocation2] sm:$0xff]  ;;  %v7105_v8 = vld [vmem:[#allocation2 + $0x8] sm:$0xff] }
 0x23e   : > { %2611 = vst [vmem:[#allocation2 + $0x4] sm:$0xff] %v2609_v61  ;;  %v1355_v4 = vmul.f32 %v1349_v1, %v7105_v8  ;;  %v1354_v9 = vmul.f32 %v1351_v3, %v7103_v7  ;;  %v1469_v13 = vmul.f32 %v1463_v5, %v7105_v8  ;;  %v1468_v14 = vmul.f32 %v1465_v10, %v7103_v7  ;;  %v5043_v61 = vld [vmem:[%s6942_s14] sm:$0xf] }
 0x23f   : > { %v1583_v36 = vmul.f32 %v1580_v35, %v7103_v7  ;;  %v1584_v41 = vmul.f32 %v1578_v31, %v7105_v8  ;;  %v1698_v48 = vmul.f32 %v1695_v46, %v7103_v7  ;;  %v1699_v53 = vmul.f32 %v1693_v43, %v7105_v8  ;;  %v6343_v31 = vld [vmem:[%s6787_s5 + $0x8] sm:$0x3] }
 0x240   : > { %1364 = vrot.lane.b32.xlu0 %v1355_v4, %s7739_s11  ;;  %1360 = vrot.lane.b32.xlu1 %v1354_v9, %s7739_s11  ;;  %v1359_v21 = vcombine.high %v1354_v9, %v1354_v9  ;;  %v1474_v25 = vcombine.high %v1468_v14, %v1468_v14  ;;  %v1356_v9 = vld [vmem:[%s7791_s21] sm:$0xf]  ;;  %v3073_v35 = vrot.slane %v6343_v31, %v7042_v16  ;;  %v6334_v46 = vld [vmem:[%s7792_s9 + $0x8] sm:$0xf] }
 0x241   : > { %v1589_v42 = vcombine.high %v1583_v36, %v1583_v36  ;;  %v1704_v52 = vcombine.high %v1698_v48, %v1698_v48 }
 0x244   : > { %1479 = vrot.lane.b32.xlu0 %v1469_v13, %s7735_s23  ;;  %1475 = vrot.lane.b32.xlu1 %v1468_v14, %s7735_s23 }
 0x245   : > { %v7117_v19 = vld [vmem:[#allocation2] sm:$0xff]  ;;  %v7124_v27 = vld [vmem:[#allocation2 + $0x8] sm:$0xff] }
 0x246   : > { %v2638_v20 = vmul.f32 %v2635_v18, %v7117_v19  ;;  %v2749_v24 = vmul.f32 %v2746_v22, %v7117_v19  ;;  %v2639_v30 = vmul.f32 %v2634_v11, %v7124_v27  ;;  %v2861_v33 = vmul.f32 %v2858_v32, %v7117_v19  ;;  %v6277_v22 = vld [vmem:[%s7791_s21 + $0x4] sm:$0xf] }
 0x247   : > { %v2750_v34 = vmul.f32 %v2745_v15, %v7124_v27  ;;  %v2862_v38 = vmul.f32 %v2857_v26, %v7124_v27  ;;  %v2973_v49 = vmul.f32 %v2970_v47, %v7117_v19  ;;  %v2974_v50 = vmul.f32 %v2969_v44, %v7124_v27 }
 0x248   : > { %2644 = vrot.lane.b32.xlu0 %v2638_v20, %s7739_s11  ;;  %1362 = vrot.lane.b32.xlu1 %v1359_v21, %s7739_s11  ;;  %v2643_v29 = vcombine.high %v2638_v20, %v2638_v20  ;;  %v2755_v37 = vcombine.high %v2749_v24, %v2749_v24  ;;  %v2867_v45 = vcombine.high %v2861_v33, %v2861_v33  ;;  %v2640_v21 = vld [vmem:[%s7792_s9] sm:$0xf] }
 0x249   : > { %v2979_v51 = vcombine.high %v2973_v49, %v2973_v49 }
 0x24c   : > { %2756 = vrot.lane.b32.xlu0 %v2749_v24, %s7735_s23  ;;  %1477 = vrot.lane.b32.xlu1 %v1474_v25, %s7735_s23 }
 0x250   : > { %2646 = vrot.lane.b32.xlu0 %v2643_v29, %s7739_s11  ;;  %2648 = vrot.lane.b32.xlu1 %v2639_v30, %s7739_s11  ;;  %s7781_s11 = sld [smem:[#allocation18_spill]]  ;;  %v6329_v30 = vld [vmem:[%s7792_s9 + $0x4] sm:$0xf] }
 0x254   : > { %2868 = vrot.lane.b32.xlu0 %v2861_v33, %s7737_s1  ;;  %2760 = vrot.lane.b32.xlu1 %v2750_v34, %s7735_s23 }
 0x256   : > { %v2614_v54 = vld [vmem:[%s7781_s11] sm:$0xf]  ;;  %s7797_s11 = sld [smem:[#allocation31_spill]] }
 0x258   : > { %2758 = vrot.lane.b32.xlu0 %v2755_v37, %s7735_s23  ;;  %2872 = vrot.lane.b32.xlu1 %v2862_v38, %s7737_s1  ;;  %s7741_s23 = smov 1   ;;  %v3080_v37 = vrot.slane %v7117_v19, 4  ;;  %v3081_v38 = vrot.slane %v7124_v27, 4 }
 0x25c   : > { %1594 = vrot.lane.b32.xlu0 %v1584_v41, %s7737_s1  ;;  %1592 = vrot.lane.b32.xlu1 %v1589_v42, %s7737_s1  ;;  %v6282_v42 = vld [vmem:[%s7791_s21 + $0x8] sm:$0xf] }
 0x260   : > { %2870 = vrot.lane.b32.xlu0 %v2867_v45, %s7737_s1  ;;  %1590 = vrot.lane.b32.xlu1 %v1583_v36, %s7737_s1  ;;  %s7780_s1 = smov 127   ;;  %v3077_v36 = vrot.slane %v6343_v31, %v7044_v17 }
 0x262   : > { %v3084_v47 = vcombine.low %v3073_v35, %v3077_v36 }
 0x264   : > { %2980 = vrot.lane.b32.xlu0 %v2973_v49, %s7741_s23  ;;  %2984 = vrot.lane.b32.xlu1 %v2974_v50, %s7741_s23  ;;  %v1807_v49 = vrot.slane %v7103_v7, 4  ;;  %v1808_v50 = vrot.slane %v7105_v8, 4 }
 0x268   : > { %2982 = vrot.lane.b32.xlu0 %v2979_v51, %s7741_s23  ;;  %1707 = vrot.lane.b32.xlu1 %v1704_v52, %s7741_s23 }
 0x26c   : > { %1709 = vrot.lane.b32.xlu0 %v1699_v53, %s7741_s23  ;;  %1705 = vrot.lane.b32.xlu1 %v1698_v48, %s7741_s23  ;;  %s7784_s23 = sld [smem:[#allocation20_spill]]  ;;  %v3082_v48 = vsel %vm1060_vm0, %v3080_v37, %v3081_v38 }
 0x26d   : > { %v3086_v53 = vmul.f32 %v3084_v47, %v3082_v48  ;;  %v6358_v47 = vld [vmem:[%s6787_s5 + $0xe] sm:$0x3] }
 0x270   : > { %3181 = vrot.lane.b32.xlu0 %v7117_v19, %s7780_s1  ;;  %3183 = vrot.lane.b32.xlu1 %v7124_v27, %s7780_s1 }
 0x272   : > { %v3608_v56 = vld [vmem:[%s7784_s23] sm:$0x3]  ;;  %s7798_s23 = sld [smem:[#allocation23_spill]] }
 0x274   : > { %1909 = vrot.lane.b32.xlu0 %v7103_v7, %s7780_s1  ;;  %1911 = vrot.lane.b32.xlu1 %v7105_v8, %s7780_s1 }
 0x278   : > { %3287 = vrot.lane.b32.xlu0 %v7117_v19, %s7783_s6  ;;  %3289 = vrot.lane.b32.xlu1 %v7124_v27, %s7783_s6 }
 0x27c   : > { %2016 = vrot.lane.b32.xlu0 %v7103_v7, %s7783_s6  ;;  %2018 = vrot.lane.b32.xlu1 %v7105_v8, %s7783_s6 }
 0x280   : > { %3393 = vrot.lane.b32.xlu0 %v7117_v19, %s7786_s12  ;;  %3395 = vrot.lane.b32.xlu1 %v7124_v27, %s7786_s12 }
 0x284   : > { %2123 = vrot.lane.b32.xlu0 %v7103_v7, %s7786_s12  ;;  %2125 = vrot.lane.b32.xlu1 %v7105_v8, %s7786_s12 }
 0x288   : > { %3499 = vrot.lane.b32.xlu0 %v7117_v19, %s7789_s19  ;;  %3501 = vrot.lane.b32.xlu1 %v7124_v27, %s7789_s19  ;;  %v1800_v19 = vrot.slane %v6291_v39, %v7042_v16  ;;  %v1804_v27 = vrot.slane %v6291_v39, %v7044_v17 }
 0x28c   : > { %2230 = vrot.lane.b32.xlu0 %v7103_v7, %s7789_s19  ;;  %2232 = vrot.lane.b32.xlu1 %v7105_v8, %s7789_s19  ;;  %v6339_v8 = vld [vmem:[%s7792_s9 + $0xc] sm:$0xf] }
 0x290   : > { %2617 = vperm.xlu0 %6634, %v2614_v54   ;;  %1332 = vperm.xlu1 %6635, %v1329_v55   ;;  %v1811_v54 = vcombine.low %v1800_v19, %v1804_v27  ;;  %v1809_v55 = vsel %vm1060_vm0, %v1807_v49, %v1808_v50 }
 0x294   : > { %3611 = vperm.xlu0 %6634, %v3608_v56   ;;  %4872 = vperm.xlu1 %6635, %v4869_v57  }
 0x298   : > { %3702 = vperm.xlu0 %6634, %v3699_v58   ;;  %4959 = vperm.xlu1 %6635, %v4956_v59   ;;  %v6348_v59 = vld [vmem:[%s6787_s5 + $0xa] sm:$0x3] }
 0x29c   : > { %3789 = vperm.xlu0 %6634, %v3786_v60   ;;  %5046 = vperm.xlu1 %6635, %v5043_v61   ;;  %v3090_v60 = vcombine.high %v3086_v53, %v3086_v53  ;;  %v1813_v61 = vmul.f32 %v1811_v54, %v1809_v55 }
 0x2b2   : > { %v1365_v62 = vpop.permute.xlu0 %1364  ;;  %v1361_v63 = vpop.permute.xlu1 %1360 }
 0x2b6   : > { %v1480_v1 = vpop.permute.xlu0 %1479  ;;  %v1476_v2 = vpop.permute.xlu1 %1475 }
 0x2ba   : > { %v2645_v3 = vpop.permute.xlu0 %2644  ;;  %v1363_v5 = vpop.permute.xlu1 %1362 }
 0x2bb   : > { %v1367_v6 = vsel %vm1366_vm8, %v1361_v63, %v1363_v5  ;;  %v1368_v4 = vsel %vm1366_vm8, %v1363_v5, %v1365_v62 }
 0x2bc   : > { %6273 = vmatprep.subr.msk.mxu1 %vm1060_vm0, %v1368_v4  ;;  %v1817_v4 = vcombine.high %v1813_v61, %v1813_v61 }
 0x2bd   : > { %6274 = vmatpush1.msk.msra.mxu1 %vm1060_vm0, %v1367_v6  ;;  %v6287_v6 = vld [vmem:[%s7791_s21 + $0xc] sm:$0xf] }
 0x2be   : > { %v2757_v10 = vpop.permute.xlu0 %2756  ;;  %v1478_v11 = vpop.permute.xlu1 %1477  ;;  %6275 = vmatmul.mubr.msk.f32.vlgmr.msra.gmra.mrb[6].mxu1 %vm1056_vm1, %v1356_v9  ;;  %v6296_v9 = vld [vmem:[%s6787_s5 + $0xa] sm:$0x3] }
 0x2bf   : > { %v1482_v12 = vsel %vm1481_vm9, %v1476_v2, %v1478_v11  ;;  %v1483_v13 = vsel %vm1481_vm9, %v1478_v11, %v1480_v1  ;;  %1555 = vmatprep.mubr.f32.mxu1 %v6768_v0  ;;  %v3176_v1 = vrot.slane %v6348_v59, %v7042_v16  ;;  %v3180_v2 = vrot.slane %v6348_v59, %v7044_v17 }
 0x2c0   : > { %6278 = vmatprep.subr.msk.mxu1 %vm1060_vm0, %v1483_v13 }
 0x2c1   : > { %6279 = vmatpush1.msk.msra.mxu1 %vm1060_vm0, %v1482_v12  ;;  %v3190_v11 = vcombine.low %v3176_v1, %v3180_v2 }
 0x2c2   : > { %v2647_v14 = vpop.permute.xlu0 %2646  ;;  %v2649_v15 = vpop.permute.xlu1 %2648 }
 0x2c3   : > { %v2650_v18 = vsel %vm1366_vm8, %v2645_v3, %v2647_v14  ;;  %v2651_v20 = vsel %vm1366_vm8, %v2647_v14, %v2649_v15  ;;  %v6344_v15 = vld [vmem:[%s7792_s9 + $0x10] sm:$0xf] }
 0x2c4   : > { %6325 = vmatprep.subr.msk.mxu0 %vm1060_vm0, %v2651_v20  ;;  %v1908_v20 = vrot.slane %v6296_v9, %v7044_v17 }
 0x2c5   : > { %6326 = vmatpush1.msk.msra.mxu0 %vm1060_vm0, %v2650_v18  ;;  %v1904_v18 = vrot.slane %v6296_v9, %v7042_v16 }
 0x2c6   : > { %v2869_v23 = vpop.permute.xlu0 %2868  ;;  %6327 = vmatmul.mubr.msk.f32.vlgmr.msra.gmra.mrb[6].mxu0 %vm1056_vm1, %v2640_v21  ;;  %v2761_v24 = vpop.permute.xlu1 %2760  ;;  %6280 = vmatmul.mubr.msk.f32.vlgmr.msra.gmra.mrb[6].mxu1 %vm1056_vm1, %v6277_v22  ;;  %v6353_v21 = vld [vmem:[%s6787_s5 + $0xc] sm:$0x3] }
 0x2c7   : > { %2835 = vmatprep.mubr.f32.mxu0 %v6768_v0  ;;  %1670 = vmatprep.mubr.f32.mxu1 %v6768_v0  ;;  %v1918_v31 = vcombine.low %v1904_v18, %v1908_v20 }
 0x2ca   : > { %v2759_v25 = vpop.permute.xlu0 %2758  ;;  %v2873_v26 = vpop.permute.xlu1 %2872 }
 0x2cb   : > { %v2762_v28 = vsel %vm1481_vm9, %v2757_v10, %v2759_v25  ;;  %v2763_v29 = vsel %vm1481_vm9, %v2759_v25, %v2761_v24 }
 0x2cc   : > { %6330 = vmatprep.subr.msk.mxu0 %vm1060_vm0, %v2763_v29 }
 0x2cd   : > { %6331 = vmatpush1.msk.msra.mxu0 %vm1060_vm0, %v2762_v28  ;;  %v3286_v28 = vrot.slane %v6353_v21, %v7044_v17 }
 0x2ce   : > { %v1595_v32 = vpop.permute.xlu0 %1594  ;;  %6332 = vmatmul.mubr.msk.f32.vlgmr.msra.gmra.mrb[6].mxu0 %vm1056_vm1, %v6329_v30  ;;  %v1593_v33 = vpop.permute.xlu1 %1592 }
 0x2cf   : > { %v1598_v34 = vsel %vm1596_vm10, %v1593_v33, %v1595_v32  ;;  %2947 = vmatprep.mubr.f32.mxu0 %v6768_v0 }
 0x2d0   : > { %6283 = vmatprep.subr.msk.mxu1 %vm1060_vm0, %v1598_v34  ;;  %v6301_v34 = vld [vmem:[%s6787_s5 + $0xc] sm:$0x3] }
 0x2d2   : > { %v2871_v40 = vpop.permute.xlu0 %2870  ;;  %v1591_v41 = vpop.permute.xlu1 %1590 }
 0x2d3   : > { %v2874_v43 = vsel %vm1596_vm10, %v2869_v23, %v2871_v40  ;;  %v2875_v44 = vsel %vm1596_vm10, %v2871_v40, %v2873_v26  ;;  %v1597_v45 = vsel %vm1596_vm10, %v1591_v41, %v1593_v33  ;;  %v3282_v26 = vrot.slane %v6353_v21, %v7042_v16  ;;  %v6292_v33 = vld [vmem:[%s7791_s21 + $0x10] sm:$0xf] }
 0x2d4   : > { %6284 = vmatpush1.msk.msra.mxu1 %vm1060_vm0, %v1597_v45  ;;  %6335 = vmatprep.subr.msk.mxu0 %vm1060_vm0, %v2875_v44  ;;  %v2011_v41 = vrot.slane %v6301_v34, %v7042_v16  ;;  %v6349_v45 = vld [vmem:[%s7792_s9 + $0x14] sm:$0xf] }
 0x2d5   : > { %6336 = vmatpush1.msk.msra.mxu0 %vm1060_vm0, %v2874_v43  ;;  %6285 = vmatmul.mubr.msk.f32.vlgmr.msra.gmra.mrb[6].mxu1 %vm1056_vm1, %v6282_v42  ;;  %v3296_v39 = vcombine.low %v3282_v26, %v3286_v28 }
 0x2d6   : > { %v2981_v51 = vpop.permute.xlu0 %2980  ;;  %6337 = vmatmul.mubr.msk.f32.vlgmr.msra.gmra.mrb[6].mxu0 %vm1056_vm1, %v6334_v46  ;;  %v2985_v52 = vpop.permute.xlu1 %2984  ;;  %1785 = vmatprep.mubr.f32.mxu1 %v6768_v0  ;;  %v2015_v46 = vrot.slane %v6301_v34, %v7044_v17 }
 0x2d7   : > { %3059 = vmatprep.mubr.f32.mxu0 %v6768_v0 }
 0x2d8   : > { %v2025_v55 = vcombine.low %v2011_v41, %v2015_v46 }
 0x2da   : > { %v2983_v56 = vpop.permute.xlu0 %2982  ;;  %v1708_v57 = vpop.permute.xlu1 %1707 }
 0x2db   : > { %v2986_v7 = vsel %vm1711_vm11, %v2981_v51, %v2983_v56  ;;  %v2987_v58 = vsel %vm1711_vm11, %v2983_v56, %v2985_v52  ;;  %v3388_v51 = vrot.slane %v6358_v47, %v7042_v16  ;;  %v3392_v52 = vrot.slane %v6358_v47, %v7044_v17  ;;  %v6307_v47 = vld [vmem:[%s7791_s21 + $0x1c] sm:$0xf] }
 0x2dc   : > { %6340 = vmatprep.subr.msk.mxu0 %vm1060_vm0, %v2987_v58 }
 0x2dd   : > { %6341 = vmatpush1.msk.msra.mxu0 %vm1060_vm0, %v2986_v7  ;;  %v6306_v7 = vld [vmem:[%s6787_s5 + $0xe] sm:$0x3] }
 0x2de   : > { %v1710_v62 = vpop.permute.xlu0 %1709  ;;  %6342 = vmatmul.mubr.msk.f32.vlgmr.msra.gmra.mrb[6].mxu0 %vm1056_vm1, %v6339_v8  ;;  %6345 = vmatprep.subr.msk.mxu0 %vm1060_vm0, %v3090_v60  ;;  %v1706_v63 = vpop.permute.xlu1 %1705 }
 0x2df   : > { %v1713_v3 = vsel %vm1711_vm11, %v1708_v57, %v1710_v62  ;;  %v1712_v5 = vsel %vm1711_vm11, %v1706_v63, %v1708_v57  ;;  %6346 = vmatpush1.msk.msra.mxu0 %vm1060_vm0, %v3086_v53  ;;  %3162 = vmatprep.mubr.f32.mxu0 %v6768_v0  ;;  %v6297_v57 = vld [vmem:[%s7791_s21 + $0x14] sm:$0xf]  ;;  %v2118_v63 = vrot.slane %v6306_v7, %v7042_v16 }
 0x2e0   : > { %6288 = vmatprep.subr.msk.mxu1 %vm1060_vm0, %v1713_v3 }
 0x2e1   : > { %6289 = vmatpush1.msk.msra.mxu1 %vm1060_vm0, %v1712_v5  ;;  %v6354_v5 = vld [vmem:[%s7792_s9 + $0x18] sm:$0xf] }
 0x2e2   : > { %v3182_v10 = vpop.permute.xlu0 %3181  ;;  %6290 = vmatmul.mubr.msk.f32.vlgmr.msra.gmra.mrb[6].mxu1 %vm1056_vm1, %v6287_v6  ;;  %6293 = vmatprep.subr.msk.mxu1 %vm1060_vm0, %v1817_v4  ;;  %v3184_v12 = vpop.permute.xlu1 %3183  ;;  %v2122_v6 = vrot.slane %v6306_v7, %v7044_v17  ;;  %v6363_v4 = vld [vmem:[%s6787_s5 + $0x10] sm:$0x3] }
 0x2e3   : > { %v3185_v13 = vrot.slane %v3182_v10, 4  ;;  %v3186_v14 = vrot.slane %v3184_v12, 4  ;;  %6294 = vmatpush1.msk.msra.mxu1 %vm1060_vm0, %v1813_v61  ;;  %1889 = vmatprep.mubr.f32.mxu1 %v6768_v0  ;;  %v3402_v61 = vcombine.low %v3388_v51, %v3392_v52  ;;  %v6312_v52 = vld [vmem:[%s7791_s21 + $0x20] sm:$0xf] }
 0x2e4   : > { %v2132_v21 = vcombine.low %v2118_v63, %v2122_v6 }
 0x2e5   : > { %v3187_v22 = vsel %vm1060_vm0, %v3185_v13, %v3186_v14  ;;  %v3494_v14 = vrot.slane %v6363_v4, %v7042_v16 }
 0x2e6   : > { %v3188_v23 = vsel %vm1694_vm7, %v3187_v22, %v3184_v12  ;;  %v1910_v24 = vpop.permute.xlu0 %1909  ;;  %6347 = vmatmul.mubr.msk.f32.vlgmr.msra.gmra.mrb[6].mxu0 %vm1056_vm1, %v6344_v15  ;;  %v1912_v25 = vpop.permute.xlu1 %1911  ;;  %v3498_v15 = vrot.slane %v6363_v4, %v7044_v17  ;;  %v4868_v4 = vld [vmem:[%s7793_s13] sm:$0x3]  ;;  %s7799_s13 = smov 17  }
 0x2e7   : > { %v3192_v29 = vmul.f32 %v3190_v11, %v3188_v23  ;;  %v1913_v30 = vrot.slane %v1910_v24, 4  ;;  %v1914_v32 = vrot.slane %v1912_v25, 4  ;;  %3268 = vmatprep.mubr.f32.mxu0 %v6768_v0  ;;  %v6302_v23 = vld [vmem:[%s7791_s21 + $0x18] sm:$0xf]  ;;  %v6311_v24 = vld [vmem:[%s6787_s5 + $0x10] sm:$0x3] }
 0x2e9   : > { %v3196_v35 = vcombine.high %v3192_v29, %v3192_v29  ;;  %v1915_v36 = vsel %vm1060_vm0, %v1913_v30, %v1914_v32  ;;  %v3508_v30 = vcombine.low %v3494_v14, %v3498_v15  ;;  %v2225_v32 = vrot.slane %v6311_v24, %v7042_v16  ;;  %v5163_v14 = vld [vmem:[%s6787_s5] sm:$0x3] }
 0x2ea   : > { %v1916_v37 = vsel %vm1694_vm7, %v1915_v36, %v1912_v25  ;;  %v3288_v38 = vpop.permute.xlu0 %3287  ;;  %6295 = vmatmul.mubr.msk.f32.vlgmr.msra.gmra.mrb[6].mxu1 %vm1056_vm1, %v6292_v33  ;;  %v3290_v40 = vpop.permute.xlu1 %3289  ;;  %v6359_v36 = vld [vmem:[%s7792_s9 + $0x1c] sm:$0xf] }
 0x2eb   : > { %v1920_v42 = vmul.f32 %v1918_v31, %v1916_v37  ;;  %v3291_v43 = vrot.slane %v3288_v38, 4  ;;  %v3292_v44 = vrot.slane %v3290_v40, 4  ;;  %6350 = vmatprep.subr.msk.mxu0 %vm1060_vm0, %v3196_v35  ;;  %1996 = vmatprep.mubr.f32.mxu1 %v6768_v0  ;;  %v2229_v37 = vrot.slane %v6311_v24, %v7044_v17 }
 0x2ec   : > { %6351 = vmatpush1.msk.msra.mxu0 %vm1060_vm0, %v3192_v29  ;;  %v5172_v24 = vrot.slane %v5163_v14, %v7044_v17 }
 0x2ed   : > { %v1924_v19 = vcombine.high %v1920_v42, %v1920_v42  ;;  %v3293_v27 = vsel %vm1060_vm0, %v3291_v43, %v3292_v44 }
 0x2ee   : > { %v3294_v48 = vsel %vm1579_vm6, %v3293_v27, %v3290_v40  ;;  %v2017_v49 = vpop.permute.xlu0 %2016  ;;  %6352 = vmatmul.mubr.msk.f32.vlgmr.msra.gmra.mrb[6].mxu0 %vm1056_vm1, %v6349_v45  ;;  %v2019_v50 = vpop.permute.xlu1 %2018  ;;  %v2239_v45 = vcombine.low %v2225_v32, %v2229_v37 }
 0x2ef   : > { %v3298_v53 = vmul.f32 %v3296_v39, %v3294_v48  ;;  %v2020_v54 = vrot.slane %v2017_v49, 4  ;;  %v2021_v56 = vrot.slane %v2019_v50, 4  ;;  %6298 = vmatprep.subr.msk.mxu1 %vm1060_vm0, %v1924_v19  ;;  %3374 = vmatprep.mubr.f32.mxu0 %v6768_v0 }
 0x2f0   : > { %6299 = vmatpush1.msk.msra.mxu1 %vm1060_vm0, %v1920_v42 }
 0x2f1   : > { %v3302_v58 = vcombine.high %v3298_v53, %v3298_v53  ;;  %v2022_v8 = vsel %vm1060_vm0, %v2020_v54, %v2021_v56 }
 0x2f2   : > { %v2023_v59 = vsel %vm1579_vm6, %v2022_v8, %v2019_v50  ;;  %v3394_v60 = vpop.permute.xlu0 %3393  ;;  %6300 = vmatmul.mubr.msk.f32.vlgmr.msra.gmra.mrb[6].mxu1 %vm1056_vm1, %v6297_v57  ;;  %v3396_v62 = vpop.permute.xlu1 %3395  ;;  %v6364_v50 = vld [vmem:[%s7792_s9 + $0x20] sm:$0xf] }
 0x2f3   : > { %v2027_v1 = vmul.f32 %v2025_v55, %v2023_v59  ;;  %v3397_v2 = vrot.slane %v3394_v60, 4  ;;  %v3398_v3 = vrot.slane %v3396_v62, 4  ;;  %6355 = vmatprep.subr.msk.mxu0 %vm1060_vm0, %v3302_v58  ;;  %2103 = vmatprep.mubr.f32.mxu1 %v6768_v0 }
 0x2f4   : > { %6356 = vmatpush1.msk.msra.mxu0 %vm1060_vm0, %v3298_v53 }
 0x2f5   : > { %v2031_v9 = vcombine.high %v2027_v1, %v2027_v1  ;;  %v3399_v10 = vsel %vm1060_vm0, %v3397_v2, %v3398_v3 }
 0x2f6   : > { %v3400_v11 = vsel %vm1464_vm5, %v3399_v10, %v3396_v62  ;;  %v2124_v12 = vpop.permute.xlu0 %2123  ;;  %6357 = vmatmul.mubr.msk.f32.vlgmr.msra.gmra.mrb[6].mxu0 %vm1056_vm1, %v6354_v5  ;;  %v2126_v13 = vpop.permute.xlu1 %2125 }
 0x2f7   : > { %v3404_v18 = vmul.f32 %v3402_v61, %v3400_v11  ;;  %v2127_v20 = vrot.slane %v2124_v12, 4  ;;  %v2128_v22 = vrot.slane %v2126_v13, 4  ;;  %6303 = vmatprep.subr.msk.mxu1 %vm1060_vm0, %v2031_v9  ;;  %3480 = vmatprep.mubr.f32.mxu0 %v6768_v0  ;;  %v3607_v11 = vld [vmem:[%s7794_s17] sm:$0x3]  ;;  %s7800_s17 = smov 16  }
 0x2f8   : > { %6304 = vmatpush1.msk.msra.mxu1 %vm1060_vm0, %v2027_v1  ;;  %v3894_v12 = vld [vmem:[%s6787_s5] sm:$0x3] }
 0x2f9   : > { %v3408_v25 = vcombine.high %v3404_v18, %v3404_v18  ;;  %v2129_v26 = vsel %vm1060_vm0, %v2127_v20, %v2128_v22  ;;  %v3899_v15 = vrot.slane %v3894_v12, %v7042_v16  ;;  %v6432_v22 = vld [vmem:[%s6787_s5 + $0x2] sm:$0x3] }
 0x2fa   : > { %v2130_v28 = vsel %vm1464_vm5, %v2129_v26, %v2126_v13  ;;  %v3500_v29 = vpop.permute.xlu0 %3499  ;;  %6305 = vmatmul.mubr.msk.f32.vlgmr.msra.gmra.mrb[6].mxu1 %vm1056_vm1, %v6302_v23  ;;  %v3502_v31 = vpop.permute.xlu1 %3501  ;;  %v6380_v13 = vld [vmem:[%s6787_s5 + $0x2] sm:$0x3]  ;;  %v5168_v23 = vrot.slane %v5163_v14, %v7042_v16 }
 0x2fb   : > { %v2134_v33 = vmul.f32 %v2132_v21, %v2130_v28  ;;  %v3503_v34 = vrot.slane %v3500_v29, 4  ;;  %v3504_v35 = vrot.slane %v3502_v31, 4  ;;  %6360 = vmatprep.subr.msk.mxu0 %vm1060_vm0, %v3408_v25  ;;  %2210 = vmatprep.mubr.f32.mxu1 %v6768_v0  ;;  %v4010_v20 = vrot.slane %v6380_v13, %v7042_v16  ;;  %v6385_v25 = vld [vmem:[%s6787_s5 + $0x4] sm:$0x3] }
 0x2fc   : > { %6361 = vmatpush1.msk.msra.mxu0 %vm1060_vm0, %v3404_v18  ;;  %v3903_v18 = vrot.slane %v3894_v12, %v7044_v17  ;;  %v4014_v21 = vrot.slane %v6380_v13, %v7044_v17  ;;  %v5279_v28 = vrot.slane %v6432_v22, %v7042_v16  ;;  %v5283_v29 = vrot.slane %v6432_v22, %v7044_v17 }
 0x2fd   : > { %v2138_v38 = vcombine.high %v2134_v33, %v2134_v33  ;;  %v3505_v39 = vsel %vm1060_vm0, %v3503_v34, %v3504_v35  ;;  %v4126_v34 = vrot.slane %v6385_v25, %v7044_v17 }
 0x2fe   : > { %v3506_v40 = vsel %vm1350_vm4, %v3505_v39, %v3502_v31  ;;  %v2231_v41 = vpop.permute.xlu0 %2230  ;;  %6362 = vmatmul.mubr.msk.f32.vlgmr.msra.gmra.mrb[6].mxu0 %vm1056_vm1, %v6359_v36  ;;  %v2233_v42 = vpop.permute.xlu1 %2232  ;;  %v3904_v26 = vcombine.low %v3899_v15, %v3903_v18  ;;  %v5173_v31 = vcombine.low %v5168_v23, %v5172_v24  ;;  %v4015_v32 = vcombine.low %v4010_v20, %v4014_v21  ;;  %v6390_v36 = vld [vmem:[%s6787_s5 + $0x6] sm:$0x3] }
 0x2ff   : > { %v3510_v43 = vmul.f32 %v3508_v30, %v3506_v40  ;;  %v2234_v44 = vrot.slane %v2231_v41, 4  ;;  %v2235_v46 = vrot.slane %v2233_v42, 4  ;;  %6308 = vmatprep.subr.msk.mxu1 %vm1060_vm0, %v2138_v38  ;;  %3586 = vmatprep.mubr.f32.mxu0 %v6768_v0  ;;  %v6437_v30 = vld [vmem:[%s6787_s5 + $0x4] sm:$0x3]  ;;  %v5284_v35 = vcombine.low %v5279_v28, %v5283_v29  ;;  %v6442_v39 = vld [vmem:[%s6787_s5 + $0x6] sm:$0x3] }
 0x300   : > { %6309 = vmatpush1.msk.msra.mxu1 %vm1060_vm0, %v2134_v33  ;;  %3905 = vrot.lane.b32.xlu1 %v3904_v26, %s7789_s19  ;;  %v4122_v33 = vrot.slane %v6385_v25, %v7042_v16  ;;  %v5391_v37 = vrot.slane %v6437_v30, %v7042_v16  ;;  %v5395_v38 = vrot.slane %v6437_v30, %v7044_v17 }
 0x301   : > { %v3514_v19 = vcombine.high %v3510_v43, %v3510_v43  ;;  %v2236_v27 = vsel %vm1060_vm0, %v2234_v44, %v2235_v46  ;;  %5174 = vrot.lane.b32.xlu0 %v5173_v31, %s7789_s19  ;;  %v4234_v41 = vrot.slane %v6390_v36, %v7042_v16  ;;  %v5503_v44 = vrot.slane %v6442_v39, %v7042_v16 }
 0x302   : > { %v2237_v48 = vsel %vm1350_vm4, %v2236_v27, %v2233_v42  ;;  %6310 = vmatmul.mubr.msk.f32.vlgmr.msra.gmra.mrb[6].mxu1 %vm1056_vm1, %v6307_v47  ;;  %v4127_v40 = vcombine.low %v4122_v33, %v4126_v34  ;;  %v4238_v42 = vrot.slane %v6390_v36, %v7044_v17 }
 0x303   : > { %v2241_v49 = vmul.f32 %v2239_v45, %v2237_v48  ;;  %6365 = vmatprep.subr.msk.mxu0 %vm1060_vm0, %v3514_v19  ;;  %2317 = vmatprep.mubr.f32.mxu1 %v6768_v0  ;;  %v5507_v45 = vrot.slane %v6442_v39, %v7044_v17 }
 0x304   : > { %6366 = vmatpush1.msk.msra.mxu0 %vm1060_vm0, %v3510_v43  ;;  %4016 = vrot.lane.b32.xlu1 %v4015_v32, %s7786_s12  ;;  %v5396_v43 = vcombine.low %v5391_v37, %v5395_v38  ;;  %v4239_v46 = vcombine.low %v4234_v41, %v4238_v42 }
 0x305   : > { %v2245_v51 = vcombine.high %v2241_v49, %v2241_v49  ;;  %5285 = vrot.lane.b32.xlu0 %v5284_v35, %s7786_s12  ;;  %v5508_v47 = vcombine.low %v5503_v44, %v5507_v45 }
 0x306   : > { %6367 = vmatmul.mubr.msk.f32.vlgmr.msra.gmra.mrb[6].mxu0 %vm1056_vm1, %v6364_v50 }
 0x307   : > { %6313 = vmatprep.subr.msk.mxu1 %vm1060_vm0, %v2245_v51  ;;  %4946 = vmatprep.mubr.f32.mxu0 %v6768_v0 }
 0x308   : > { %6314 = vmatpush1.msk.msra.mxu1 %vm1060_vm0, %v2241_v49  ;;  %4128 = vrot.lane.b32.xlu1 %v4127_v40, %s7783_s6 }
 0x309   : > { %5397 = vrot.lane.b32.xlu0 %v5396_v43, %s7783_s6 }
 0x30a   : > { %6315 = vmatmul.mubr.msk.f32.vlgmr.msra.gmra.mrb[6].mxu1 %vm1056_vm1, %v6312_v52 }
 0x30b   : > { %3689 = vmatprep.mubr.f32.mxu1 %v6768_v0 }
 0x30c   : > { %4240 = vrot.lane.b32.xlu1 %v4239_v46, %s7780_s1 }
 0x30d   : > { %5509 = vrot.lane.b32.xlu0 %v5508_v47, %s7780_s1 }
 0x30f   : > { %v2618_v53 = vpop.permute.xlu0 %2617  ;;  %v1333_v58 = vpop.permute.xlu1 %1332 }
 0x313   : > { %v4873_v19 = vpop.permute.xlu1 %4872  ;;  %v3612_v50 = vpop.permute.xlu0 %3611 }
 0x3d9   : > { %v3588_v54 = vpop.f32.mrb[6].mxu0 }
 0x3da   : > { %v6481_v55 = vadd.f32 %v3588_v54, %v2618_v53  ;;  %v3590_v56 = vpop.f32.mrb[7].mxu0 }
 0x3db   : > { %v6482_v57 = vadd.f32 %v3590_v56, %v2618_v53 }
 0x3dc   : > { %v3597_v7 = vmax.f32 %v6481_v55, 0.0 }
 0x3dd   : > { %v3598_v8 = vmax.f32 %v6482_v57, 0.0  ;;  %v2319_v59 = vpop.f32.mrb[6].mxu1 }
 0x3de   : > { %v6479_v60 = vadd.f32 %v2319_v59, %v1333_v58  ;;  %v2321_v61 = vpop.f32.mrb[7].mxu1  ;;  %v3601_v63 = vrot.slane %v3597_v7, 4  ;;  %v4955_v7 = vld [vmem:[%s7795_s3] sm:$0xf]  ;;  %s7801_s3 = smov 15  }
 0x3df   : > { %v6480_v62 = vadd.f32 %v2321_v61, %v1333_v58  ;;  %v3602_v2 = vrot.slane %v3598_v8, 4  ;;  %v3698_v59 = vld [vmem:[%s7796_s20] sm:$0xf]  ;;  %s7802_s20 = smov 1  }
 0x3e0   : > { %v3595_v1 = vmax.f32 %v6479_v60, 0.0  ;;  %v5042_v60 = vld [vmem:[%s7797_s11] sm:$0xf]  ;;  %s7803_s11 = sld [smem:[#allocation26_spill]] }
 0x3e1   : > { %v3596_v3 = vmax.f32 %v6480_v62, 0.0  ;;  %v3785_v61 = vld [vmem:[%s7798_s23] sm:$0xf]  ;;  %v4960_v62 = vpop.permute.xlu1 %4959 }
 0x3e2   : > { %v7357_v5 = vsel %vm1060_vm0, %v3595_v1, %v3601_v63 }
 0x3e3   : > { %v7360_v6 = vsel %vm1060_vm0, %v3596_v3, %v3602_v2  ;;  %v3616_v10 = vrot.slane %v7357_v5, 4  ;;  %v3703_v3 = vpop.permute.xlu0 %3702 }
 0x3e4   : > { %6420 = vmatprep.subr.msk.mxu0 %vm1060_vm0, %v7360_v6  ;;  %v3617_v9 = vrot.slane %v7360_v6, 4 }
 0x3e5   : > { %6421 = vmatpush1.msk.msra.mxu0 %vm1060_vm0, %v7357_v5  ;;  %v5047_v37 = vpop.permute.xlu1 %5046 }
 0x3e6   : > { %6368 = vmatprep.subr.msk.mxu1 %vm1060_vm0, %v3617_v9  ;;  %6422 = vmatmul.mubr.msk.f32.vlgmr.msra.gmra.mrb[8].mxu0 %vm1056_vm1, %v4868_v4 }
 0x3e7   : > { %6369 = vmatpush1.msk.msra.mxu1 %vm1060_vm0, %v3616_v10  ;;  %5035 = vmatprep.mubr.f32.mxu0 %v6768_v0  ;;  %v3790_v44 = vpop.permute.xlu0 %3789 }
 0x3e8   : > { %6370 = vmatmul.mubr.msk.f32.vlgmr.msra.gmra.mrb[8].mxu1 %vm1056_vm1, %v3607_v11 }
 0x3e9   : > { %3778 = vmatprep.mubr.f32.mxu1 %v6768_v0 }
 0x4b9   : > { %v4948_v27 = vpop.f32.mrb[8].mxu0 }
 0x4ba   : > { %v4949_v48 = vadd.f32 %v4948_v27, %v4873_v19  ;;  %v4950_v49 = vpop.f32.mrb[9].mxu0 }
 0x4bb   : > { %v4951_v51 = vadd.f32 %v4950_v49, %v4873_v19  ;;  %v3691_v52 = vpop.f32.mrb[8].mxu1 }
 0x4bc   : > { %v3692_v53 = vadd.f32 %v3691_v52, %v3612_v50  ;;  %v3693_v54 = vpop.f32.mrb[9].mxu1  ;;  %v4953_v57 = vmax.f32 %v4949_v48, 0.0 }
 0x4bd   : > { %v4954_v55 = vmax.f32 %v4951_v51, 0.0  ;;  %v3694_v56 = vadd.f32 %v3693_v54, %v3612_v50 }
 0x4be   : > { %v3696_v8 = vmax.f32 %v3692_v53, 0.0 }
 0x4bf   : > { %v3697_v58 = vmax.f32 %v3694_v56, 0.0  ;;  %6423 = vmatprep.subr.msk.mxu0 %vm1149_vm2, %v4954_v55 }
 0x4c0   : > { %6424 = vmatpush1.msk.msra.mxu0 %vm1149_vm2, %v4953_v57 }
 0x4c1   : > { %6371 = vmatprep.subr.msk.mxu1 %vm1149_vm2, %v3697_v58  ;;  %6425 = vmatmul.mubr.msk.f32.vlgmr.msra.gmra.mrb[10].mxu0 %vm1145_vm3, %v4955_v7 }
 0x4c2   : > { %6426 = vmatprep.subr.msk.mxu0 %vm1149_vm2, %v4954_v55  ;;  %6372 = vmatpush1.msk.msra.mxu1 %vm1149_vm2, %v3696_v8 }
 0x4c3   : > { %6427 = vmatpush1.msk.msra.mxu0 %vm1149_vm2, %v4953_v57  ;;  %6373 = vmatmul.mubr.msk.f32.vlgmr.msra.gmra.mrb[10].mxu1 %vm1145_vm3, %v3698_v59 }
 0x4c4   : > { %6374 = vmatprep.subr.msk.mxu1 %vm1149_vm2, %v3697_v58  ;;  %5116 = vmatprep.mubr.f32.mxu0 %v6768_v0  ;;  %v3906_v58 = vpop.permute.xlu1 %3905 }
 0x4c5   : > { %6375 = vmatpush1.msk.msra.mxu1 %vm1149_vm2, %v3696_v8  ;;  %6428 = vmatmul.mubr.msk.f32.vlgmr.msra.gmra.mrb[12].mxu0 %vm1145_vm3, %v5042_v60  ;;  %v3907_v8 = vrot.slane %v3906_v58, 4 }
 0x4c6   : > { %3859 = vmatprep.mubr.f32.mxu1 %v6768_v0  ;;  %5265 = vmatprep.mubr.f32.mxu0 %v6768_v0 }
 0x4c7   : > { %6376 = vmatmul.mubr.msk.f32.vlgmr.msra.gmra.mrb[12].mxu1 %vm1145_vm3, %v3785_v61  ;;  %v3908_v60 = vsel %vm1350_vm4, %v3907_v8, %v3906_v58 }
 0x4c8   : > { %3996 = vmatprep.mubr.f32.mxu1 %v6768_v0  ;;  %v4017_v59 = vpop.permute.xlu1 %4016 }
 0x4c9   : > { %v4018_v61 = vrot.slane %v4017_v59, 4 }
 0x594   : > { %v5037_v63 = vpop.f32.mrb[10].mxu0 }
 0x595   : > { %v5038_v1 = vadd.f32 %v5037_v63, %v4960_v62  ;;  %v5039_v2 = vpop.f32.mrb[11].mxu0 }
 0x596   : > { %v5040_v4 = vadd.f32 %v5039_v2, %v4960_v62  ;;  %v3780_v9 = vpop.f32.mrb[10].mxu1  ;;  %v4019_v2 = vsel %vm1464_vm5, %v4018_v61, %v4017_v59 }
 0x597   : > { %v5123_v10 = vsub.f32 0.0, %v5038_v1  ;;  %v3781_v11 = vadd.f32 %v3780_v9, %v3703_v3  ;;  %v3782_v12 = vpop.f32.mrb[11].mxu1 }
 0x598   : > { %v5124_v13 = vsub.f32 0.0, %v5040_v4  ;;  %v3783_v14 = vadd.f32 %v3782_v12, %v3703_v3  ;;  %v5118_v15 = vpop.f32.mrb[12].mxu0 }
 0x599   : > { %v5125_v18 = vmul.f32 1.442695, %v5123_v10  ;;  %v3866_v20 = vsub.f32 0.0, %v3781_v11  ;;  %v5120_v21 = vpop.f32.mrb[13].mxu0  ;;  %v5119_v38 = vadd.f32 %v5118_v15, %v5047_v37 }
 0x59a   : > { %v5127_v22 = vmul.f32 1.442695, %v5124_v13  ;;  %v3867_v23 = vsub.f32 0.0, %v3783_v14  ;;  %v3861_v24 = vpop.f32.mrb[12].mxu1  ;;  %v5121_v40 = vadd.f32 %v5120_v21, %v5047_v37 }
 0x59b   : > { %6652 = vpow2.f32 %v5125_v18  ;;  %v3868_v25 = vmul.f32 1.442695, %v3866_v20  ;;  %v3863_v26 = vpop.f32.mrb[13].mxu1  ;;  %v5143_v19 = vrot.slane %v5119_v38, 4  ;;  %v3862_v27 = vadd.f32 %v3861_v24, %v3790_v44 }
 0x59c   : > { %6654 = vpow2.f32 %v5127_v22  ;;  %v3870_v28 = vmul.f32 1.442695, %v3867_v23  ;;  %v5144_v50 = vrot.slane %v5121_v40, 4  ;;  %v3864_v51 = vadd.f32 %v3863_v26, %v3790_v44  ;;  %v4129_v26 = vpop.permute.xlu1 %4128 }
 0x59d   : > { %6656 = vpow2.f32 %v3868_v25 }
 0x59e   : > { %6658 = vpow2.f32 %v3870_v28 }
 0x5a0   : > { %v4241_v37 = vpop.permute.xlu1 %4240 }
 0x5a5   : > { %v6653_v29 = vpop.eup %6652 }
 0x5a6   : > { %v6655_v30 = vpop.eup %6654  ;;  %v5129_v31 = vadd.f32 1.0, %v6653_v29  ;;  %v4130_v29 = vrot.slane %v4129_v26, 4 }
 0x5a7   : > { %v6657_v32 = vpop.eup %6656  ;;  %v5130_v33 = vadd.f32 1.0, %v6655_v30 }
 0x5a8   : > { %v6659_v34 = vpop.eup %6658  ;;  %6660 = vrcp.f32 %v5129_v31  ;;  %v3872_v35 = vadd.f32 1.0, %v6657_v32 }
 0x5a9   : > { %6662 = vrcp.f32 %v5130_v33  ;;  %v3873_v36 = vadd.f32 1.0, %v6659_v34  ;;  %v4131_v33 = vsel %vm1579_vm6, %v4130_v29, %v4129_v26 }
 0x5aa   : > { %6664 = vrcp.f32 %v3872_v35 }
 0x5ab   : > { %6666 = vrcp.f32 %v3873_v36 }
 0x5b2   : > { %v6661_v39 = vpop.eup %6660 }
 0x5b3   : > { %v6663_v41 = vpop.eup %6662  ;;  %v5135_v42 = vrot.slane %v6661_v39, 4 }
 0x5b4   : > { %v6665_v43 = vpop.eup %6664  ;;  %v5136_v45 = vrot.slane %v6663_v41, 4  ;;  %v4242_v41 = vrot.slane %v4241_v37, 4 }
 0x5b5   : > { %v6667_v46 = vpop.eup %6666  ;;  %v5139_v47 = vmul.f32 %v5135_v42, %v7357_v5  ;;  %v3876_v48 = vmul.f32 %v6665_v43, %v7357_v5  ;;  %v5175_v5 = vpop.permute.xlu0 %5174 }
 0x5b6   : > { %v5140_v49 = vmul.f32 %v5136_v45, %v7360_v6  ;;  %v3877_v52 = vmul.f32 %v6667_v46, %v7360_v6  ;;  %v5176_v3 = vrot.slane %v5175_v5, 4  ;;  %v4243_v44 = vsel %vm1694_vm7, %v4242_v41, %v4241_v37 }
 0x5b7   : > { %v5147_v53 = vadd.f32 %v5143_v19, %v5139_v47  ;;  %v3878_v54 = vadd.f32 %v3876_v48, %v3862_v27 }
 0x5b8   : > { %v5148_v55 = vadd.f32 %v5144_v50, %v5140_v49  ;;  %v3879_v56 = vadd.f32 %v3877_v52, %v3864_v51  ;;  %v5177_v13 = vsel %vm1350_vm4, %v5176_v3, %v5175_v5  ;;  %v5156_v50 = vld [vmem:[%s6952_s4] sm:$0xf] }
 0x5b9   : > { %v5286_v10 = vpop.permute.xlu0 %5285  ;;  %v3887_v51 = vld [vmem:[%s7803_s11] sm:$0xf] }
 0x5ba   : > { %v5151_v57 = vcombine.high %v5147_v53, %v5148_v55  ;;  %v3882_v7 = vcombine.low %v3878_v54, %v3879_v56  ;;  %v5287_v11 = vrot.slane %v5286_v10, 4 }
 0x5bc   : > { %3884 = vst [vmem:[#allocation2 + $0x4] sm:$0xff] %v3882_v7  ;;  %v5288_v18 = vsel %vm1464_vm5, %v5287_v11, %v5286_v10 }
 0x5bd   : > { %v5398_v21 = vpop.permute.xlu0 %5397 }
 0x5be   : > { %v5399_v24 = vrot.slane %v5398_v21, 4 }
 0x5c0   : > { %v5400_v30 = vsel %vm1579_vm6, %v5399_v24, %v5398_v21  ;;  %v6447_v21 = vld [vmem:[%s6787_s5 + $0x8] sm:$0x3] }
 0x5c1   : > { %v5510_v38 = vpop.permute.xlu0 %5509  ;;  %v5615_v26 = vrot.slane %v6447_v21, %v7042_v16 }
 0x5c2   : > { %v5511_v42 = vrot.slane %v5510_v38, 4 }
 0x5c3   : > { %v7433_v62 = vld [vmem:[#allocation2] sm:$0xff]  ;;  %v7435_v63 = vld [vmem:[#allocation2 + $0x8] sm:$0xff] }
 0x5c4   : > { %5153 = vst [vmem:[#allocation2 + $0x4] sm:$0xff] %v5151_v57  ;;  %v3911_v6 = vmul.f32 %v3908_v60, %v7433_v62  ;;  %v3912_v1 = vmul.f32 %v3907_v8, %v7435_v63  ;;  %v4022_v4 = vmul.f32 %v4019_v2, %v7433_v62  ;;  %v4023_v9 = vmul.f32 %v4018_v61, %v7435_v63 }
 0x5c5   : > { %v4134_v34 = vmul.f32 %v4131_v33, %v7433_v62  ;;  %v4135_v39 = vmul.f32 %v4130_v29, %v7435_v63  ;;  %v5512_v45 = vsel %vm1694_vm7, %v5511_v42, %v5510_v38  ;;  %v4246_v46 = vmul.f32 %v4243_v44, %v7433_v62  ;;  %v6438_v38 = vld [vmem:[%s6947_s27 + $0x8] sm:$0xf] }
 0x5c6   : > { %3921 = vrot.lane.b32.xlu0 %v3912_v1, %s7799_s13  ;;  %3917 = vrot.lane.b32.xlu1 %v3911_v6, %s7799_s13  ;;  %v3916_v15 = vcombine.high %v3911_v6, %v3911_v6  ;;  %v4028_v22 = vcombine.high %v4022_v4, %v4022_v4  ;;  %v4247_v49 = vmul.f32 %v4242_v41, %v7435_v63  ;;  %v4353_v41 = vrot.slane %v7433_v62, 4 }
 0x5c7   : > { %v4140_v40 = vcombine.high %v4134_v34, %v4134_v34  ;;  %v4252_v48 = vcombine.high %v4246_v46, %v4246_v46 }
 0x5ca   : > { %4033 = vrot.lane.b32.xlu0 %v4023_v9, %s7800_s17  ;;  %4029 = vrot.lane.b32.xlu1 %v4022_v4, %s7800_s17  ;;  %v5182_v4 = vld [vmem:[%s6947_s27] sm:$0xf] }
 0x5cb   : > { %v7446_v12 = vld [vmem:[#allocation2] sm:$0xff]  ;;  %v7454_v23 = vld [vmem:[#allocation2 + $0x8] sm:$0xff] }
 0x5cc   : > { %v5180_v14 = vmul.f32 %v5177_v13, %v7446_v12  ;;  %v5291_v20 = vmul.f32 %v5288_v18, %v7446_v12  ;;  %v5181_v25 = vmul.f32 %v5176_v3, %v7454_v23  ;;  %v5292_v31 = vmul.f32 %v5287_v11, %v7454_v23 }
 0x5cd   : > { %v5403_v32 = vmul.f32 %v5400_v30, %v7446_v12  ;;  %v5404_v35 = vmul.f32 %v5399_v24, %v7454_v23  ;;  %v5515_v47 = vmul.f32 %v5512_v45, %v7446_v12  ;;  %v5516_v19 = vmul.f32 %v5511_v42, %v7454_v23 }
 0x5ce   : > { %5186 = vrot.lane.b32.xlu0 %v5180_v14, %s7799_s13  ;;  %3919 = vrot.lane.b32.xlu1 %v3916_v15, %s7799_s13  ;;  %v5185_v28 = vcombine.high %v5180_v14, %v5180_v14  ;;  %v5297_v36 = vcombine.high %v5291_v20, %v5291_v20  ;;  %v5622_v29 = vrot.slane %v7446_v12, 4  ;;  %v5623_v30 = vrot.slane %v7454_v23, 4 }
 0x5cf   : > { %v5409_v43 = vcombine.high %v5403_v32, %v5403_v32  ;;  %v5521_v27 = vcombine.high %v5515_v47, %v5515_v47  ;;  %v4354_v42 = vrot.slane %v7435_v63, 4 }
 0x5d2   : > { %5298 = vrot.lane.b32.xlu0 %v5291_v20, %s7800_s17  ;;  %4031 = vrot.lane.b32.xlu1 %v4028_v22, %s7800_s17  ;;  %v6433_v20 = vld [vmem:[%s6947_s27 + $0x4] sm:$0xf] }
 0x5d6   : > { %5188 = vrot.lane.b32.xlu0 %v5185_v28, %s7799_s13  ;;  %5190 = vrot.lane.b32.xlu1 %v5181_v25, %s7799_s13  ;;  %v5619_v28 = vrot.slane %v6447_v21, %v7044_v17 }
 0x5da   : > { %5410 = vrot.lane.b32.xlu0 %v5403_v32, %s7801_s3  ;;  %5302 = vrot.lane.b32.xlu1 %v5292_v31, %s7800_s17  ;;  %v6395_v31 = vld [vmem:[%s6787_s5 + $0x8] sm:$0x3] }
 0x5de   : > { %5300 = vrot.lane.b32.xlu0 %v5297_v36, %s7800_s17  ;;  %5414 = vrot.lane.b32.xlu1 %v5404_v35, %s7801_s3 }
 0x5e2   : > { %4145 = vrot.lane.b32.xlu0 %v4135_v39, %s7801_s3  ;;  %4143 = vrot.lane.b32.xlu1 %v4140_v40, %s7801_s3  ;;  %v5626_v39 = vcombine.low %v5615_v26, %v5619_v28  ;;  %v5624_v40 = vsel %vm1060_vm0, %v5622_v29, %v5623_v30 }
 0x5e4   : > { %v5628_v45 = vmul.f32 %v5626_v39, %v5624_v40  ;;  %v6462_v39 = vld [vmem:[%s6787_s5 + $0xe] sm:$0x3] }
 0x5e6   : > { %5412 = vrot.lane.b32.xlu0 %v5409_v43, %s7801_s3  ;;  %4141 = vrot.lane.b32.xlu1 %v4134_v34, %s7801_s3 }
 0x5ea   : > { %5522 = vrot.lane.b32.xlu0 %v5515_v47, %s7802_s20  ;;  %5526 = vrot.lane.b32.xlu1 %v5516_v19, %s7802_s20  ;;  %v4355_v47 = vsel %vm1060_vm0, %v4353_v41, %v4354_v42 }
 0x5ee   : > { %5524 = vrot.lane.b32.xlu0 %v5521_v27, %s7802_s20  ;;  %4255 = vrot.lane.b32.xlu1 %v4252_v48, %s7802_s20 }
 0x5f2   : > { %4257 = vrot.lane.b32.xlu0 %v4247_v49, %s7802_s20  ;;  %4253 = vrot.lane.b32.xlu1 %v4246_v46, %s7802_s20  ;;  %v6452_v49 = vld [vmem:[%s6787_s5 + $0xa] sm:$0x3]  ;;  %s6778_s20 = smov [#allocation3]  }
 0x5f3   : > { %s6674_s11 = sshll.u32 %s6778_s20, 4  ;;  %s6675_s11 = int_to_ptr.vmem [resolvable:$false] %s6674_s11 }
 0x5f6   : > { %5723 = vrot.lane.b32.xlu0 %v7446_v12, %s7780_s1  ;;  %5725 = vrot.lane.b32.xlu1 %v7454_v23, %s7780_s1 }
 0x5fa   : > { %4454 = vrot.lane.b32.xlu0 %v7433_v62, %s7780_s1  ;;  %4456 = vrot.lane.b32.xlu1 %v7435_v63, %s7780_s1  ;;  %s7804_s1 = sld [smem:[#allocation25_spill]] }
 0x5fe   : > { %5829 = vrot.lane.b32.xlu0 %v7446_v12, %s7783_s6  ;;  %5831 = vrot.lane.b32.xlu1 %v7454_v23, %s7783_s6 }
 0x600   : > { %v3913_v8 = vld [vmem:[%s7804_s1] sm:$0xf]  ;;  %v6381_v9 = vld [vmem:[%s7804_s1 + $0x4] sm:$0xf]  ;;  %v6386_v34 = vld [vmem:[%s7804_s1 + $0x8] sm:$0xf] }
 0x602   : > { %4560 = vrot.lane.b32.xlu0 %v7433_v62, %s7783_s6  ;;  %4562 = vrot.lane.b32.xlu1 %v7435_v63, %s7783_s6 }
 0x606   : > { %5935 = vrot.lane.b32.xlu0 %v7446_v12, %s7786_s12  ;;  %5937 = vrot.lane.b32.xlu1 %v7454_v23, %s7786_s12 }
 0x60a   : > { %4666 = vrot.lane.b32.xlu0 %v7433_v62, %s7786_s12  ;;  %4668 = vrot.lane.b32.xlu1 %v7435_v63, %s7786_s12  ;;  %s6478_s12 = sshll.u32 %s6980_s0, 8 }
 0x60b   : > { %s7685_s17 = scalar_lea.hbm %s6957_s8, %s6478_s12 }
 0x60e   : > { %6041 = vrot.lane.b32.xlu0 %v7446_v12, %s7789_s19  ;;  %6043 = vrot.lane.b32.xlu1 %v7454_v23, %s7789_s19  ;;  %v4346_v12 = vrot.slane %v6395_v31, %v7042_v16  ;;  %v4350_v23 = vrot.slane %v6395_v31, %v7044_v17 }
 0x610   : > { %v4357_v46 = vcombine.low %v4346_v12, %v4350_v23 }
 0x612   : > { %4772 = vrot.lane.b32.xlu0 %v7433_v62, %s7789_s19  ;;  %4774 = vrot.lane.b32.xlu1 %v7435_v63, %s7789_s19  ;;  %v6443_v63 = vld [vmem:[%s6947_s27 + $0xc] sm:$0xf]  ;;  %s1033_s19 = sand.u32 1, %s6724_s16  }
 0x613   : > { %s6261_s6 = sshll.u32 %s1033_s19, 4  ;;  %s6150_s0 = scalar_lea.sflag [#allocation4], %s1033_s19 }
 0x614   : > { %s1035_s23 = scalar_lea.vmem [#allocation3], %s6261_s6 }
 0x615   : > { %s6164_s13 = sshll.u32 %s1035_s23, 4  ;;  %s7687_s13 = int_to_ptr.vmem [resolvable:$true] %s6164_s13 }
 0x616   : > { %5159 = vperm.xlu0 %6634, %v5156_v50   ;;  %3890 = vperm.xlu1 %6635, %v3887_v51   ;;  %v5632_v50 = vcombine.high %v5628_v45, %v5628_v45  ;;  %v4359_v51 = vmul.f32 %v4357_v46, %v4355_v47  ;;  %s6670_s3 = scalar_lea.vmem %s7687_s13, 256  ;;  %p6677_p0 = scmp.lt.s32.totalorder %s7687_s13, %s6675_s11 }
 0x617   : > { %p6671_p11 = scmp.ne.s32.totalorder %s7687_s13, %s6670_s3 }
 0x619   : > { %p6672_p12 = pnand %p6671_p11, %p6997_p5 }
 0x61b   : > { %p6673_p13 = pneg %p6672_p12 }
 0x638   : > { %v3922_v52 = vpop.permute.xlu0 %3921  ;;  %v3918_v53 = vpop.permute.xlu1 %3917 }
 0x63c   : > { %v4034_v54 = vpop.permute.xlu0 %4033  ;;  %v4030_v55 = vpop.permute.xlu1 %4029 }
 0x640   : > { %v5187_v56 = vpop.permute.xlu0 %5186  ;;  %v3920_v57 = vpop.permute.xlu1 %3919 }
 0x641   : > { %v3923_v7 = vsel %vm1366_vm8, %v3918_v53, %v3920_v57  ;;  %v3924_v58 = vsel %vm1366_vm8, %v3920_v57, %v3922_v52 }
 0x642   : > { %6377 = vmatprep.subr.msk.mxu1 %vm1060_vm0, %v3924_v58  ;;  %v4363_v58 = vcombine.high %v4359_v51, %v4359_v51 }
 0x643   : > { %6378 = vmatpush1.msk.msra.mxu1 %vm1060_vm0, %v3923_v7  ;;  %v6391_v7 = vld [vmem:[%s7804_s1 + $0xc] sm:$0xf] }
 0x644   : > { %v5299_v59 = vpop.permute.xlu0 %5298  ;;  %v4032_v60 = vpop.permute.xlu1 %4031  ;;  %6379 = vmatmul.mubr.msk.f32.vlgmr.msra.gmra.mrb[14].mxu1 %vm1056_vm1, %v3913_v8  ;;  %v6400_v8 = vld [vmem:[%s6787_s5 + $0xa] sm:$0x3] }
 0x645   : > { %v4035_v61 = vsel %vm1481_vm9, %v4030_v55, %v4032_v60  ;;  %v4036_v5 = vsel %vm1481_vm9, %v4032_v60, %v4034_v54  ;;  %4108 = vmatprep.mubr.f32.mxu1 %v6768_v0  ;;  %v5718_v54 = vrot.slane %v6452_v49, %v7042_v16  ;;  %v5722_v55 = vrot.slane %v6452_v49, %v7044_v17 }
 0x646   : > { %6382 = vmatprep.subr.msk.mxu1 %vm1060_vm0, %v4036_v5 }
 0x647   : > { %6383 = vmatpush1.msk.msra.mxu1 %vm1060_vm0, %v4035_v61  ;;  %v5732_v60 = vcombine.low %v5718_v54, %v5722_v55 }
 0x648   : > { %v5189_v6 = vpop.permute.xlu0 %5188  ;;  %v5191_v1 = vpop.permute.xlu1 %5190 }
 0x649   : > { %v5192_v2 = vsel %vm1366_vm8, %v5187_v56, %v5189_v6  ;;  %v5193_v3 = vsel %vm1366_vm8, %v5189_v6, %v5191_v1  ;;  %v6448_v1 = vld [vmem:[%s6947_s27 + $0x10] sm:$0xf] }
 0x64a   : > { %6429 = vmatprep.subr.msk.mxu0 %vm1060_vm0, %v5193_v3  ;;  %v4453_v3 = vrot.slane %v6400_v8, %v7044_v17 }
 0x64b   : > { %6430 = vmatpush1.msk.msra.mxu0 %vm1060_vm0, %v5192_v2  ;;  %v4449_v2 = vrot.slane %v6400_v8, %v7042_v16 }
 0x64c   : > { %v5411_v10 = vpop.permute.xlu0 %5410  ;;  %6431 = vmatmul.mubr.msk.f32.vlgmr.msra.gmra.mrb[14].mxu0 %vm1056_vm1, %v5182_v4  ;;  %v5303_v11 = vpop.permute.xlu1 %5302  ;;  %6384 = vmatmul.mubr.msk.f32.vlgmr.msra.gmra.mrb[14].mxu1 %vm1056_vm1, %v6381_v9  ;;  %v6457_v4 = vld [vmem:[%s6787_s5 + $0xc] sm:$0x3] }
 0x64d   : > { %5377 = vmatprep.mubr.f32.mxu0 %v6768_v0  ;;  %4220 = vmatprep.mubr.f32.mxu1 %v6768_v0  ;;  %v4463_v21 = vcombine.low %v4449_v2, %v4453_v3 }
 0x650   : > { %v5301_v13 = vpop.permute.xlu0 %5300  ;;  %v5415_v14 = vpop.permute.xlu1 %5414 }
 0x651   : > { %v5304_v15 = vsel %vm1481_vm9, %v5299_v59, %v5301_v13  ;;  %v5305_v18 = vsel %vm1481_vm9, %v5301_v13, %v5303_v11 }
 0x652   : > { %6434 = vmatprep.subr.msk.mxu0 %vm1060_vm0, %v5305_v18 }
 0x653   : > { %6435 = vmatpush1.msk.msra.mxu0 %vm1060_vm0, %v5304_v15  ;;  %v5828_v15 = vrot.slane %v6457_v4, %v7044_v17 }
 0x654   : > { %v4146_v22 = vpop.permute.xlu0 %4145  ;;  %6436 = vmatmul.mubr.msk.f32.vlgmr.msra.gmra.mrb[14].mxu0 %vm1056_vm1, %v6433_v20  ;;  %v4144_v24 = vpop.permute.xlu1 %4143 }
 0x655   : > { %v4148_v25 = vsel %vm1596_vm10, %v4144_v24, %v4146_v22  ;;  %5489 = vmatprep.mubr.f32.mxu0 %v6768_v0 }
 0x656   : > { %6387 = vmatprep.subr.msk.mxu1 %vm1060_vm0, %v4148_v25  ;;  %v6405_v25 = vld [vmem:[%s6787_s5 + $0xc] sm:$0x3] }
 0x658   : > { %v5413_v32 = vpop.permute.xlu0 %5412  ;;  %v4142_v33 = vpop.permute.xlu1 %4141 }
 0x659   : > { %v5416_v35 = vsel %vm1596_vm10, %v5411_v10, %v5413_v32  ;;  %v5417_v36 = vsel %vm1596_vm10, %v5413_v32, %v5415_v14  ;;  %v4147_v37 = vsel %vm1596_vm10, %v4142_v33, %v4144_v24  ;;  %v5824_v14 = vrot.slane %v6457_v4, %v7042_v16  ;;  %v6396_v24 = vld [vmem:[%s7804_s1 + $0x10] sm:$0xf] }
 0x65a   : > { %6388 = vmatpush1.msk.msra.mxu1 %vm1060_vm0, %v4147_v37  ;;  %6439 = vmatprep.subr.msk.mxu0 %vm1060_vm0, %v5417_v36  ;;  %v4555_v33 = vrot.slane %v6405_v25, %v7042_v16  ;;  %v6453_v37 = vld [vmem:[%s6947_s27 + $0x14] sm:$0xf] }
 0x65b   : > { %6440 = vmatpush1.msk.msra.mxu0 %vm1060_vm0, %v5416_v35  ;;  %6389 = vmatmul.mubr.msk.f32.vlgmr.msra.gmra.mrb[14].mxu1 %vm1056_vm1, %v6386_v34  ;;  %v5838_v31 = vcombine.low %v5824_v14, %v5828_v15 }
 0x65c   : > { %v5523_v43 = vpop.permute.xlu0 %5522  ;;  %6441 = vmatmul.mubr.msk.f32.vlgmr.msra.gmra.mrb[14].mxu0 %vm1056_vm1, %v6438_v38  ;;  %v5527_v44 = vpop.permute.xlu1 %5526  ;;  %4332 = vmatprep.mubr.f32.mxu1 %v6768_v0  ;;  %v4559_v38 = vrot.slane %v6405_v25, %v7044_v17 }
 0x65d   : > { %5601 = vmatprep.mubr.f32.mxu0 %v6768_v0 }
 0x65e   : > { %v4569_v47 = vcombine.low %v4555_v33, %v4559_v38 }
 0x660   : > { %v5525_v19 = vpop.permute.xlu0 %5524  ;;  %v4256_v27 = vpop.permute.xlu1 %4255 }
 0x661   : > { %v5528_v48 = vsel %vm1711_vm11, %v5523_v43, %v5525_v19  ;;  %v5529_v62 = vsel %vm1711_vm11, %v5525_v19, %v5527_v44  ;;  %v5930_v43 = vrot.slane %v6462_v39, %v7042_v16  ;;  %v5934_v44 = vrot.slane %v6462_v39, %v7044_v17 }
 0x662   : > { %6444 = vmatprep.subr.msk.mxu0 %vm1060_vm0, %v5529_v62 }
 0x663   : > { %6445 = vmatpush1.msk.msra.mxu0 %vm1060_vm0, %v5528_v48  ;;  %v6410_v48 = vld [vmem:[%s6787_s5 + $0xe] sm:$0x3] }
 0x664   : > { %v4258_v52 = vpop.permute.xlu0 %4257  ;;  %6446 = vmatmul.mubr.msk.f32.vlgmr.msra.gmra.mrb[14].mxu0 %vm1056_vm1, %v6443_v63  ;;  %6449 = vmatprep.subr.msk.mxu0 %vm1060_vm0, %v5632_v50  ;;  %v4254_v53 = vpop.permute.xlu1 %4253 }
 0x665   : > { %v4260_v56 = vsel %vm1711_vm11, %v4256_v27, %v4258_v52  ;;  %v4259_v57 = vsel %vm1711_vm11, %v4254_v53, %v4256_v27  ;;  %6450 = vmatpush1.msk.msra.mxu0 %vm1060_vm0, %v5628_v45  ;;  %5704 = vmatprep.mubr.f32.mxu0 %v6768_v0  ;;  %v6401_v27 = vld [vmem:[%s7804_s1 + $0x14] sm:$0xf]  ;;  %v4661_v53 = vrot.slane %v6410_v48, %v7042_v16 }
 0x666   : > { %6392 = vmatprep.subr.msk.mxu1 %vm1060_vm0, %v4260_v56 }
 0x667   : > { %6393 = vmatpush1.msk.msra.mxu1 %vm1060_vm0, %v4259_v57  ;;  %v6458_v57 = vld [vmem:[%s6947_s27 + $0x18] sm:$0xf] }
 0x668   : > { %v5724_v59 = vpop.permute.xlu0 %5723  ;;  %6394 = vmatmul.mubr.msk.f32.vlgmr.msra.gmra.mrb[14].mxu1 %vm1056_vm1, %v6391_v7  ;;  %6397 = vmatprep.subr.msk.mxu1 %vm1060_vm0, %v4363_v58  ;;  %v5726_v61 = vpop.permute.xlu1 %5725  ;;  %v4665_v7 = vrot.slane %v6410_v48, %v7044_v17  ;;  %v6467_v58 = vld [vmem:[%s6787_s5 + $0x10] sm:$0x3] }
 0x669   : > { %v5727_v5 = vrot.slane %v5724_v59, 4  ;;  %v5728_v6 = vrot.slane %v5726_v61, 4  ;;  %6398 = vmatpush1.msk.msra.mxu1 %vm1060_vm0, %v4359_v51  ;;  %4435 = vmatprep.mubr.f32.mxu1 %v6768_v0  ;;  %v5944_v51 = vcombine.low %v5930_v43, %v5934_v44 }
 0x66a   : > { %v4675_v4 = vcombine.low %v4661_v53, %v4665_v7 }
 0x66b   : > { %v5729_v9 = vsel %vm1060_vm0, %v5727_v5, %v5728_v6  ;;  %v6036_v6 = vrot.slane %v6467_v58, %v7042_v16 }
 0x66c   : > { %v5730_v10 = vsel %vm1694_vm7, %v5729_v9, %v5726_v61  ;;  %v4455_v11 = vpop.permute.xlu0 %4454  ;;  %6451 = vmatmul.mubr.msk.f32.vlgmr.msra.gmra.mrb[14].mxu0 %vm1056_vm1, %v6448_v1  ;;  %v4457_v13 = vpop.permute.xlu1 %4456  ;;  %v6040_v1 = vrot.slane %v6467_v58, %v7044_v17 }
 0x66d   : > { %v5734_v18 = vmul.f32 %v5732_v60, %v5730_v10  ;;  %v4458_v20 = vrot.slane %v4455_v11, 4  ;;  %v4459_v22 = vrot.slane %v4457_v13, 4  ;;  %5810 = vmatprep.mubr.f32.mxu0 %v6768_v0  ;;  %v6406_v10 = vld [vmem:[%s7804_s1 + $0x18] sm:$0xf]  ;;  %v6415_v11 = vld [vmem:[%s6787_s5 + $0x10] sm:$0x3] }
 0x66f   : > { %v5738_v26 = vcombine.high %v5734_v18, %v5734_v18  ;;  %v4460_v28 = vsel %vm1060_vm0, %v4458_v20, %v4459_v22  ;;  %v6050_v20 = vcombine.low %v6036_v6, %v6040_v1  ;;  %v4767_v22 = vrot.slane %v6415_v11, %v7042_v16 }
 0x670   : > { %v4461_v29 = vsel %vm1694_vm7, %v4460_v28, %v4457_v13  ;;  %v5830_v30 = vpop.permute.xlu0 %5829  ;;  %6399 = vmatmul.mubr.msk.f32.vlgmr.msra.gmra.mrb[14].mxu1 %vm1056_vm1, %v6396_v24  ;;  %v5832_v32 = vpop.permute.xlu1 %5831  ;;  %v6463_v28 = vld [vmem:[%s6947_s27 + $0x1c] sm:$0xf] }
 0x671   : > { %v4465_v34 = vmul.f32 %v4463_v21, %v4461_v29  ;;  %v5833_v35 = vrot.slane %v5830_v30, 4  ;;  %v5834_v36 = vrot.slane %v5832_v32, 4  ;;  %6454 = vmatprep.subr.msk.mxu0 %vm1060_vm0, %v5738_v26  ;;  %4541 = vmatprep.mubr.f32.mxu1 %v6768_v0  ;;  %v4771_v29 = vrot.slane %v6415_v11, %v7044_v17  ;;  %v6411_v17 = vld [vmem:[%s7804_s1 + $0x1c] sm:$0xf] }
 0x672   : > { %6455 = vmatpush1.msk.msra.mxu0 %vm1060_vm0, %v5734_v18 }
 0x673   : > { %v4469_v12 = vcombine.high %v4465_v34, %v4465_v34  ;;  %v5835_v23 = vsel %vm1060_vm0, %v5833_v35, %v5834_v36  ;;  %v4781_v36 = vcombine.low %v4767_v22, %v4771_v29 }
 0x674   : > { %v5836_v40 = vsel %vm1579_vm6, %v5835_v23, %v5832_v32  ;;  %v4561_v41 = vpop.permute.xlu0 %4560  ;;  %6456 = vmatmul.mubr.msk.f32.vlgmr.msra.gmra.mrb[14].mxu0 %vm1056_vm1, %v6453_v37  ;;  %v4563_v42 = vpop.permute.xlu1 %4562 }
 0x675   : > { %v5840_v45 = vmul.f32 %v5838_v31, %v5836_v40  ;;  %v4564_v46 = vrot.slane %v4561_v41, 4  ;;  %v4565_v19 = vrot.slane %v4563_v42, 4  ;;  %6402 = vmatprep.subr.msk.mxu1 %vm1060_vm0, %v4469_v12  ;;  %5916 = vmatprep.mubr.f32.mxu0 %v6768_v0  ;;  %v6468_v40 = vld [vmem:[%s6947_s27 + $0x20] sm:$0xf] }
 0x676   : > { %6403 = vmatpush1.msk.msra.mxu1 %vm1060_vm0, %v4465_v34 }
 0x677   : > { %v5844_v62 = vcombine.high %v5840_v45, %v5840_v45  ;;  %v4566_v63 = vsel %vm1060_vm0, %v4564_v46, %v4565_v19 }
 0x678   : > { %v4567_v49 = vsel %vm1579_vm6, %v4566_v63, %v4563_v42  ;;  %v5936_v50 = vpop.permute.xlu0 %5935  ;;  %6404 = vmatmul.mubr.msk.f32.vlgmr.msra.gmra.mrb[14].mxu1 %vm1056_vm1, %v6401_v27  ;;  %v5938_v52 = vpop.permute.xlu1 %5937  ;;  %v6416_v42 = vld [vmem:[%s7804_s1 + $0x20] sm:$0xf] }
 0x679   : > { %v4571_v54 = vmul.f32 %v4569_v47, %v4567_v49  ;;  %v5939_v55 = vrot.slane %v5936_v50, 4  ;;  %v5940_v56 = vrot.slane %v5938_v52, 4  ;;  %6459 = vmatprep.subr.msk.mxu0 %vm1060_vm0, %v5844_v62  ;;  %4647 = vmatprep.mubr.f32.mxu1 %v6768_v0 }
 0x67a   : > { %6460 = vmatpush1.msk.msra.mxu0 %vm1060_vm0, %v5840_v45 }
 0x67b   : > { %v4575_v8 = vcombine.high %v4571_v54, %v4571_v54  ;;  %v5941_v59 = vsel %vm1060_vm0, %v5939_v55, %v5940_v56 }
 0x67c   : > { %v5942_v60 = vsel %vm1464_vm5, %v5941_v59, %v5938_v52  ;;  %v4667_v61 = vpop.permute.xlu0 %4666  ;;  %6461 = vmatmul.mubr.msk.f32.vlgmr.msra.gmra.mrb[14].mxu0 %vm1056_vm1, %v6458_v57  ;;  %v4669_v5 = vpop.permute.xlu1 %4668 }
 0x67d   : > { %v5946_v2 = vmul.f32 %v5944_v51, %v5942_v60  ;;  %v4670_v3 = vrot.slane %v4667_v61, 4  ;;  %v4671_v9 = vrot.slane %v4669_v5, 4  ;;  %6407 = vmatprep.subr.msk.mxu1 %vm1060_vm0, %v4575_v8  ;;  %6022 = vmatprep.mubr.f32.mxu0 %v6768_v0  ;;  %v6668_v51 = vld [vmem:[%s7016_s28] sm:$0xff] }
 0x67e   : > { %6408 = vmatpush1.msk.msra.mxu1 %vm1060_vm0, %v4571_v54  ;;  %v6669_v54 = vld [vmem:[%s7016_s28 + $0x8] sm:$0xff]  ;;  %s6676_s28 = scalar_lea.vmem %s6675_s11, 512 }
 0x67f   : > { %v5950_v13 = vcombine.high %v5946_v2, %v5946_v2  ;;  %v4672_v14 = vsel %vm1060_vm0, %v4670_v3, %v4671_v9  ;;  %p6678_p1 = scmp.lt.s32.totalorder %s6676_s28, %s6670_s3 }
 0x680   : > { %v4673_v15 = vsel %vm1464_vm5, %v4672_v14, %v4669_v5  ;;  %v6042_v18 = vpop.permute.xlu0 %6041  ;;  %6409 = vmatmul.mubr.msk.f32.vlgmr.msra.gmra.mrb[14].mxu1 %vm1056_vm1, %v6406_v10  ;;  %v6044_v21 = vpop.permute.xlu1 %6043 }
 0x681   : > { %v4677_v24 = vmul.f32 %v4675_v4, %v4673_v15  ;;  %v6045_v25 = vrot.slane %v6042_v18, 4  ;;  %v6046_v26 = vrot.slane %v6044_v21, 4  ;;  %6464 = vmatprep.subr.msk.mxu0 %vm1060_vm0, %v5950_v13  ;;  %4753 = vmatprep.mubr.f32.mxu1 %v6768_v0  ;;  %p6679_p2 = por %p6678_p1, %p6677_p0 }
 0x682   : > { %6465 = vmatpush1.msk.msra.mxu0 %vm1060_vm0, %v5946_v2 }
 0x683   : > { %v4681_v30 = vcombine.high %v4677_v24, %v4677_v24  ;;  %v6047_v31 = vsel %vm1060_vm0, %v6045_v25, %v6046_v26  ;;  %p6680_p3 = pnand %p6679_p2, %p6673_p13 }
 0x684   : > { %v6048_v32 = vsel %vm1350_vm4, %v6047_v31, %v6044_v21  ;;  %v4773_v33 = vpop.permute.xlu0 %4772  ;;  %6466 = vmatmul.mubr.msk.f32.vlgmr.msra.gmra.mrb[14].mxu0 %vm1056_vm1, %v6463_v28  ;;  %v4775_v16 = vpop.permute.xlu1 %4774 }
 0x685   : > { %v6052_v34 = vmul.f32 %v6050_v20, %v6048_v32  ;;  %v4776_v35 = vrot.slane %v4773_v33, 4  ;;  %v4777_v37 = vrot.slane %v4775_v16, 4  ;;  %6412 = vmatprep.subr.msk.mxu1 %vm1060_vm0, %v4681_v30  ;;  %6128 = vmatprep.mubr.f32.mxu0 %v6768_v0 }
 0x686   : > { %6413 = vmatpush1.msk.msra.mxu1 %vm1060_vm0, %v4677_v24 }
 0x687   : > { %v6056_v38 = vcombine.high %v6052_v34, %v6052_v34  ;;  %v4778_v39 = vsel %vm1060_vm0, %v4776_v35, %v4777_v37 }
 0x688   : > { %v4779_v12 = vsel %vm1350_vm4, %v4778_v39, %v4775_v16  ;;  %6414 = vmatmul.mubr.msk.f32.vlgmr.msra.gmra.mrb[14].mxu1 %vm1056_vm1, %v6411_v17 }
 0x689   : > { %v4783_v23 = vmul.f32 %v4781_v36, %v4779_v12  ;;  %6469 = vmatprep.subr.msk.mxu0 %vm1060_vm0, %v6056_v38  ;;  %4859 = vmatprep.mubr.f32.mxu1 %v6768_v0 }
 0x68a   : > { %6470 = vmatpush1.msk.msra.mxu0 %vm1060_vm0, %v6052_v34 }
 0x68b   : > { %v4787_v41 = vcombine.high %v4783_v23, %v4783_v23 }
 0x68c   : > { %6471 = vmatmul.mubr.msk.f32.vlgmr.msra.gmra.mrb[14].mxu0 %vm1056_vm1, %v6468_v40 }
 0x68d   : > { %6417 = vmatprep.subr.msk.mxu1 %vm1060_vm0, %v4787_v41 }
 0x68e   : > { %6418 = vmatpush1.msk.msra.mxu1 %vm1060_vm0, %v4783_v23 }
 0x690   : > { %6419 = vmatmul.mubr.msk.f32.vlgmr.msra.gmra.mrb[14].mxu1 %vm1056_vm1, %v6416_v42 }
 0x695   : > { %v5160_v43 = vpop.permute.xlu0 %5159  ;;  %v3891_v47 = vpop.permute.xlu1 %3890 }
 0x75f   : > { %v6130_v44 = vpop.f32.mrb[14].mxu0 }
 0x760   : > { %v6485_v45 = vadd.f32 %v6130_v44, %v5160_v43  ;;  %v6132_v0 = vpop.f32.mrb[15].mxu0 }
 0x761   : > { %v6486_v46 = vadd.f32 %v6132_v0, %v5160_v43 }
 0x762   : > { %v6139_v27 = vrot.slane %v6485_v45, 4 }
 0x763   : > { %v4861_v19 = vpop.f32.mrb[14].mxu1  ;;  %v6140_v63 = vrot.slane %v6486_v46, 4 }
 0x764   : > { %v6483_v48 = vadd.f32 %v4861_v19, %v3891_v47  ;;  %v4863_v62 = vpop.f32.mrb[15].mxu1 }
 0x765   : > { %v6484_v49 = vadd.f32 %v4863_v62, %v3891_v47 }
 0x766   : > { %v6143_v50 = vsel %vm1060_vm0, %v6483_v48, %v6139_v27 }
 0x767   : > { %v6145_v52 = vadd.f32 %v6668_v51, %v6143_v50  ;;  %v6144_v53 = vsel %vm1060_vm0, %v6484_v49, %v6140_v63 }
 0x768   : > { %v6146_v55 = vadd.f32 %v6669_v54, %v6144_v53 }
 0x769   : > { %6147 = vst [vmem:[%s1035_s23] sm:$0xff] %v6145_v52 }
 0x76a   : > { %6148 = vst [vmem:[%s1035_s23 + $0x8] sm:$0xff] %v6146_v55 }
 0x76b   : > { %6683 = shalt.err (!%p6680_p3)
}
 0x76c   : > { %s6684_s19 = scalar_lea.hbm %s7685_s17, 256  ;;  %s6688_s6 = scalar_lea.hbm %s6957_s8, 512 }
 0x76d   : > { %p6685_p4 = scmp.ne.s32.totalorder %s7685_s17, %s6684_s19  ;;  %p6689_p9 = scmp.lt.u32.totalorder %s7685_s17, %s6957_s8 }
 0x76e   : > { %p6690_p10 = scmp.lt.u32.totalorder %s6688_s6, %s6684_s19  ;;  %p6692_p12 = scmp.lt.u32.totalorder %s6684_s19, %s7685_s17 }
 0x76f   : > { %p6686_p7 = pnand %p6685_p4, %p6997_p5 }
 0x770   : > { %p6691_p11 = por %p6690_p10, %p6689_p9 }
 0x771   : > { %p6687_p8 = pneg %p6686_p7 }
 0x772   : > { %p6693_p0 = por %p6692_p12, %p6691_p11 }
 0x774   : > { %p6694_p13 = pnand %p6693_p0, %p6687_p8 }
 0x776   : > { %6697 = shalt.err (!%p6694_p13)
}
 0x777   : > { %6551 = dma.vmem_to_hbm [thread:$0]  (%p6997_p5), %s7687_s13, 256, %s7685_s17, %s6150_s0  }
 0x778 PF: > { %p6557_p1 = scmp.ge.s32.totalorder %s6732_s22, 2  ;;  %s6176_s12 = sand.u32 1, %s6720_s15  }
 0x779   : > { %s6177_s23 = scalar_lea.sflag [#allocation4], %s6176_s12 }
 0x77a   : > { %p6554_p2 = pnand %p6557_p1, %p7001_p6 }
 0x77c   : > { %6715 = dma.done.wait (!%p6554_p2), %s6177_s23, 256  }
 0x77d   : > { %6717 = vsyncadd (!%p6554_p2), %s6177_s23, 4294967040  ;;  %p79_p3 = scmp.ge.s32.totalorder %s6984_s26, 4   ;;  %s7805_s15 = smov %s6724_s16 }
 0x77e   : > { %s7806_s16 = smov %s6728_s18  ;;  %s7807_s18 = smov %s6995_s2 }
 0x77f   : > { %s7808_s22 = smov %s6984_s26  ;;  %81 = sbr.rel (!%p79_p3) target bundleno = 71 (0x47), region = 265 }
 0x786   :  { %6182 = vsyncpa [#allocation4], 1 }
 0x787   :  { %6184 = vsyncpa [#allocation4 + $0x1], 1 }

</bundles_post_ra>
